<compile_context>
chip_gen: v5e
topology: v5e:2x2
jax: 0.10.0
libtpu: 0.0.40
codegen_flags: <defaults>
</compile_context>

<pallas_src>
from functools import partial

import jax
import jax.numpy as jnp
from jax import lax
from jax.experimental import pallas as pl
from jax.experimental.pallas import tpu as pltpu

_VMEM_LIMIT = 32 * 1024 * 1024


def _round_up(x, m):
    return ((x + m - 1) // m) * m


# ----------------------------------------------------------------------------
# Tiled linear (matmul + bias) Pallas kernel
# ----------------------------------------------------------------------------
def _matmul_bias_kernel(x_ref, w_ref, b_ref, o_ref, acc_ref):
    @pl.when(pl.program_id(2) == 0)
    def _():
        acc_ref[...] = jnp.zeros_like(acc_ref)

    acc_ref[...] += jnp.dot(x_ref[...], w_ref[...],
                            preferred_element_type=jnp.float32)

    @pl.when(pl.program_id(2) == pl.num_programs(2) - 1)
    def _():
        o_ref[...] = (acc_ref[...] + b_ref[...]).astype(o_ref.dtype)


def pallas_linear(x, w, b, *, out_dtype=jnp.float32, tm=128, tn=128, tk=512):
    """x: (M, K), w: (K, N), b: (1, N) -> (M, N).  Pads to tile multiples."""
    M, K = x.shape
    _, N = w.shape
    tm = min(tm, _round_up(M, 8))
    tn = min(tn, _round_up(N, 128))
    tk = min(tk, _round_up(K, 128))
    Mp, Kp, Np = _round_up(M, tm), _round_up(K, tk), _round_up(N, tn)
    x = jnp.pad(x, ((0, Mp - M), (0, Kp - K)))
    w = jnp.pad(w, ((0, Kp - K), (0, Np - N)))
    b = jnp.pad(b, ((0, 0), (0, Np - N)))
    out = pl.pallas_call(
        _matmul_bias_kernel,
        out_shape=jax.ShapeDtypeStruct((Mp, Np), out_dtype),
        grid=(Mp // tm, Np // tn, Kp // tk),
        in_specs=[pl.BlockSpec((tm, tk), lambda i, j, k: (i, k)),
                  pl.BlockSpec((tk, tn), lambda i, j, k: (k, j)),
                  pl.BlockSpec((1, tn), lambda i, j, k: (0, j))],
        out_specs=pl.BlockSpec((tm, tn), lambda i, j, k: (i, j)),
        scratch_shapes=[pltpu.VMEM((tm, tn), jnp.float32)],
        compiler_params=pltpu.CompilerParams(
            dimension_semantics=("parallel", "parallel", "arbitrary"),
            vmem_limit_bytes=_VMEM_LIMIT),
    )(x, w, b)
    return out[:M, :N]


# ----------------------------------------------------------------------------
# Fused encoder layer kernel (per batch element)
# ----------------------------------------------------------------------------
def _layernorm(x, g, b, d_real, eps=1e-5):
    # Padded feature lanes of `x` are exactly zero by construction, so plain
    # sums over the padded lane dim equal sums over the real features.
    inv_d = 1.0 / d_real
    mu = jnp.sum(x, axis=-1, keepdims=True) * inv_d
    var = jnp.sum(x * x, axis=-1, keepdims=True) * inv_d - mu * mu
    # gamma/beta are zero in padded lanes -> padded features stay exactly zero.
    return (x - mu) * lax.rsqrt(var + eps) * g + b


def _encoder_layer_kernel(num_heads, hd_pad, d_real, s_real,
                          x_ref, ln1g_ref, ln1b_ref, wqkv_ref, bqkv_ref,
                          wo_ref, bo_ref, ln2g_ref, ln2b_ref,
                          w1_ref, b1_ref, w2_ref, b2_ref, o_ref):
    x = x_ref[0]                                   # (S_pad, D_pad) f32
    s_pad, d_pad = x.shape
    d_attn = num_heads * hd_pad

    # ---------------- multi-head self-attention (pre-norm) ----------------
    h = _layernorm(x, ln1g_ref[...], ln1b_ref[...], d_real)
    # Fused QKV projection: bf16 operands, f32 accumulation on the MXU.
    qkv = jnp.dot(h.astype(jnp.bfloat16), wqkv_ref[...],
                  preferred_element_type=jnp.float32) + bqkv_ref[...]

    # Mask padded key positions (sequence was padded from s_real to s_pad).
    key_mask = lax.broadcasted_iota(jnp.int32, (1, s_pad), 1) < s_real

    attn = jnp.zeros((s_pad, d_pad), jnp.float32)
    for hh in range(num_heads):        # static unroll; slices are 128-aligned
        lo = hh * hd_pad
        qh = qkv[:, lo:lo + hd_pad]
        kh = qkv[:, d_attn + lo:d_attn + lo + hd_pad]
        vh = qkv[:, 2 * d_attn + lo:2 * d_attn + lo + hd_pad]
        # scores = qh @ kh.T ; the 1/sqrt(head_dim) scale was folded into wq.
        scores = lax.dot_general(
            qh.astype(jnp.bfloat16), kh.astype(jnp.bfloat16),
            (((1,), (1,)), ((), ())),
            preferred_element_type=jnp.float32)            # (S, S)
        scores = jnp.where(key_mask, scores, -1e30)
        scores = scores - jnp.max(scores, axis=-1, keepdims=True)
        p = jnp.exp(scores)
        p = p * pl.reciprocal(jnp.sum(p, axis=-1, keepdims=True), approx=True)
        ctx = jnp.dot(p.astype(jnp.bfloat16), vh.astype(jnp.bfloat16),
                      preferred_element_type=jnp.float32)  # (S, hd_pad)
        # Accumulate the output projection per head block (no concatenate).
        attn = attn + jnp.dot(ctx.astype(jnp.bfloat16),
                              wo_ref[lo:lo + hd_pad, :],
                              preferred_element_type=jnp.float32)
    x = x + attn + bo_ref[...]

    # --------------------------- MLP (pre-norm) ----------------------------
    h2 = _layernorm(x, ln2g_ref[...], ln2b_ref[...], d_real)
    m = jnp.dot(h2.astype(jnp.bfloat16), w1_ref[...],
                preferred_element_type=jnp.float32) + b1_ref[...]
    # TODO(synk): reference MLP activation unspecified; tanh-GELU assumed.
    m = jax.nn.gelu(m, approximate=True)
    m = jnp.dot(m.astype(jnp.bfloat16), w2_ref[...],
                preferred_element_type=jnp.float32) + b2_ref[...]

    o_ref[0] = (x + m).astype(o_ref.dtype)


def encoder_layer(x, lp, dims):
    B, s_pad, d_pad = x.shape
    ins = [x, lp["ln1g"], lp["ln1b"], lp["wqkv"], lp["bqkv"], lp["wo"],
           lp["bo"], lp["ln2g"], lp["ln2b"], lp["w1"], lp["b1"], lp["w2"],
           lp["b2"]]
    in_specs = [pl.BlockSpec((1, s_pad, d_pad), lambda b: (b, 0, 0))]
    in_specs += [pl.BlockSpec(a.shape, lambda b: (0, 0)) for a in ins[1:]]
    return pl.pallas_call(
        partial(_encoder_layer_kernel, dims["heads"], dims["hd_pad"],
                dims["d_real"], dims["s_real"]),
        out_shape=jax.ShapeDtypeStruct((B, s_pad, d_pad), x.dtype),
        grid=(B,),
        in_specs=in_specs,
        out_specs=pl.BlockSpec((1, s_pad, d_pad), lambda b: (b, 0, 0)),
        compiler_params=pltpu.CompilerParams(
            dimension_semantics=("parallel",),
            vmem_limit_bytes=_VMEM_LIMIT),
    )(*ins)


# ----------------------------------------------------------------------------
# Parameter init (deterministic, synthetic) in padded / kernel-ready layout
# ----------------------------------------------------------------------------
def init_params(key, *, input_size, patch_size, channels, embed_dim, mlp_dim,
                heads, classes, layers):
    num_patches = (input_size // patch_size) ** 2
    patch_dim = channels * patch_size * patch_size
    s_real = num_patches + 1
    assert embed_dim % heads == 0
    hd_real = embed_dim // heads

    d_pad = _round_up(embed_dim, 128)          # residual-stream width
    hd_pad = _round_up(hd_real, 128)           # per-head width (lane aligned)
    d_attn = heads * hd_pad
    mlp_pad = _round_up(mlp_dim, 128)
    patch_dim_pad = _round_up(patch_dim, 128)
    classes_pad = _round_up(classes, 128)
    s_pad = _round_up(s_real, 8)

    dims = dict(patch_size=patch_size, num_patches=num_patches,
                patch_dim=patch_dim, patch_dim_pad=patch_dim_pad,
                s_real=s_real, s_pad=s_pad, d_real=embed_dim, d_pad=d_pad,
                hd_real=hd_real, hd_pad=hd_pad, classes=classes,
                classes_pad=classes_pad, heads=heads)

    keys = iter(jax.random.split(key, 8 + 8 * layers))

    def nrm(shape, scale=0.02):
        return scale * jax.random.normal(next(keys), shape, jnp.float32)

    def pad2(a, rows, cols):
        return jnp.pad(a, ((0, rows - a.shape[0]), (0, cols - a.shape[1])))

    def head_block(w, b, scale=1.0):
        # Logical (embed_dim, embed_dim)/(1, embed_dim) q/k/v params into the
        # head-blocked padded layout: head h's hd_real real outputs land at
        # columns [h*hd_pad, h*hd_pad + hd_real); everything else is zero.
        w = (w * scale).reshape(embed_dim, heads, hd_real)
        w = jnp.pad(w, ((0, d_pad - embed_dim), (0, 0), (0, hd_pad - hd_real)))
        b = (b * scale).reshape(1, heads, hd_real)
        b = jnp.pad(b, ((0, 0), (0, 0), (0, hd_pad - hd_real)))
        return w.reshape(d_pad, d_attn), b.reshape(1, d_attn)

    params = {
        "patch_w": pad2(nrm((patch_dim, embed_dim)),
                        patch_dim_pad, d_pad).astype(jnp.bfloat16),
        "patch_b": jnp.zeros((1, d_pad), jnp.float32),
        "cls_token": jnp.pad(
            jax.random.normal(next(keys), (1, 1, embed_dim), jnp.float32),
            ((0, 0), (0, 0), (0, d_pad - embed_dim))),
        "pos_embedding": jnp.pad(
            jax.random.normal(next(keys), (1, s_real, embed_dim), jnp.float32),
            ((0, 0), (0, s_pad - s_real), (0, d_pad - embed_dim))),
        "head_w": pad2(nrm((embed_dim, classes)),
                       d_pad, classes_pad).astype(jnp.bfloat16),
        "head_b": jnp.zeros((1, classes_pad), jnp.float32),
        "layers": [],
    }

    qk_scale = 1.0 / (hd_real ** 0.5)          # folded into the q projection
    zeros_e = jnp.zeros((1, embed_dim), jnp.float32)
    for _ in range(layers):
        wq, bq = head_block(nrm((embed_dim, embed_dim)), zeros_e, qk_scale)
        wk, bk = head_block(nrm((embed_dim, embed_dim)), zeros_e)
        wv, bv = head_block(nrm((embed_dim, embed_dim)), zeros_e)
        wo = nrm((embed_dim, embed_dim)).reshape(heads, hd_real, embed_dim)
        wo = jnp.pad(wo, ((0, 0), (0, hd_pad - hd_real),
                          (0, d_pad - embed_dim))).reshape(d_attn, d_pad)
        lp = {
            "ln1g": pad2(jnp.ones((1, embed_dim), jnp.float32), 1, d_pad),
            "ln1b": jnp.zeros((1, d_pad), jnp.float32),
            "wqkv": jnp.concatenate([wq, wk, wv], axis=1).astype(jnp.bfloat16),
            "bqkv": jnp.concatenate([bq, bk, bv], axis=1),
            "wo": wo.astype(jnp.bfloat16),
            "bo": jnp.zeros((1, d_pad), jnp.float32),
            "ln2g": pad2(jnp.ones((1, embed_dim), jnp.float32), 1, d_pad),
            "ln2b": jnp.zeros((1, d_pad), jnp.float32),
            "w1": pad2(nrm((embed_dim, mlp_dim)),
                       d_pad, mlp_pad).astype(jnp.bfloat16),
            "b1": jnp.zeros((1, mlp_pad), jnp.float32),
            "w2": pad2(nrm((mlp_dim, embed_dim)),
                       mlp_pad, d_pad).astype(jnp.bfloat16),
            "b2": jnp.zeros((1, d_pad), jnp.float32),
        }
        params["layers"].append(lp)
    return params, dims


# ----------------------------------------------------------------------------
# Forward pass
# ----------------------------------------------------------------------------
def vit_forward(inp, params, dims):
    B, C, H, W = inp.shape
    ps = dims["patch_size"]
    n_patch, patch_dim = dims["num_patches"], dims["patch_dim"]
    patch_dim_pad = dims["patch_dim_pad"]
    d_pad, s_real, s_pad = dims["d_pad"], dims["s_real"], dims["s_pad"]

    # --- patch extraction: exact torch unfold/unfold/contiguous/view glue ---
    x = inp.reshape(B, C, H // ps, ps, W // ps, ps).transpose(0, 1, 2, 4, 3, 5)
    x = x.reshape(B, n_patch, patch_dim)
    x = jnp.pad(x, ((0, 0), (0, 0), (0, patch_dim_pad - patch_dim)))

    # --- patch_to_embedding: tiled Pallas matmul over all B*num_patches rows ---
    x = pallas_linear(x.reshape(B * n_patch, patch_dim_pad).astype(jnp.bfloat16),
                      params["patch_w"], params["patch_b"])
    x = x.reshape(B, n_patch, d_pad)

    # --- cls token + positional embedding; pad sequence to s_pad (glue) ---
    cls = jnp.broadcast_to(params["cls_token"], (B, 1, d_pad))
    x = jnp.concatenate([cls, x], axis=1)
    x = jnp.pad(x, ((0, 0), (0, s_pad - s_real), (0, 0)))
    x = x + params["pos_embedding"]     # padded rows/lanes of pos are zero

    # --- transformer encoder layers (one fused Pallas kernel per layer) ---
    for lp in params["layers"]:
        x = encoder_layer(x, lp, dims)

    # --- classification head: dropout = identity (eval) + Linear (Pallas) ---
    cls_out = x[:, 0]
    out = pallas_linear(cls_out.astype(jnp.bfloat16),
                        params["head_w"], params["head_b"])
    return out[:, :dims["classes"]]


# ----------------------------------------------------------------------------
if __name__ == "__main__":
    input_size, patch_size, channels = 16, 4, 3
    heads, classes, layers = 4, 10, 2
    embed_dim, mlp_dim = 32, 64
    B = 2

    key = jax.random.PRNGKey(0)
    k_param, k_input = jax.random.split(key)

    params, dims = init_params(
        k_param, input_size=input_size, patch_size=patch_size,
        channels=channels, embed_dim=embed_dim, mlp_dim=mlp_dim,
        heads=heads, classes=classes, layers=layers)

    x = jax.random.normal(k_input, (B, channels, input_size, input_size),
                          jnp.float32)

    fwd = jax.jit(lambda inp, prm: vit_forward(inp, prm, dims))
    out = jax.block_until_ready(fwd(x, params))
    assert out.shape == (B, classes), out.shape
    assert bool(jnp.all(jnp.isfinite(out)))
    print("KERNEL_OK")
</pallas_src>

<mosaic_0001>
module attributes {stable_mosaic.version = 11 : i64} {
  func.func @_matmul_bias_kernel(%arg0: i32, %arg1: i32, %arg2: i32, %arg3: memref<32x128xbf16, #tpu.memory_space<vmem>>, %arg4: memref<128x128xbf16, #tpu.memory_space<vmem>>, %arg5: memref<1x128xf32, #tpu.memory_space<vmem>>, %arg6: memref<32x128xf32, #tpu.memory_space<vmem>>, %arg7: memref<32x128xf32, #tpu.memory_space<vmem>>) attributes {dimension_semantics = [#tpu.dimension_semantics<parallel>, #tpu.dimension_semantics<parallel>, #tpu.dimension_semantics<arbitrary>], iteration_bounds = array<i64: 1, 1, 1>, scalar_prefetch = 0 : i64, scratch_operands = 1 : i64, tpu.core_type = #tpu.core_type<tc>, window_params = [{transform_indices = @transform_0, window_bounds = array<i64: 32, 128>}, {transform_indices = @transform_1, window_bounds = array<i64: 128, 128>}, {transform_indices = @transform_2, window_bounds = array<i64: 1, 128>}, {transform_indices = @transform_3, window_bounds = array<i64: 32, 128>}]} {
    %c0_i32 = arith.constant 0 : i32
    %0 = arith.cmpi eq, %arg2, %c0_i32 : i32
    %1 = arith.extui %0 : i1 to i32
    %c0_i32_0 = arith.constant 0 : i32
    %2 = arith.cmpi ne, %1, %c0_i32_0 : i32
    scf.if %2 {
      %cst_10 = arith.constant 0.000000e+00 : f32
      %12 = vector.broadcast %cst_10 : f32 to vector<32x128xf32>
      %c0_11 = arith.constant 0 : index
      %c0_12 = arith.constant 0 : index
      %13 = vector.load %arg7[%c0_11, %c0_12] : memref<32x128xf32, #tpu.memory_space<vmem>>, vector<32x128xf32>
      tpu.vector_store %arg7[%c0_11, %c0_12], %12 {strides = array<i32>} : memref<32x128xf32, #tpu.memory_space<vmem>>, vector<32x128xf32>,
    } else {
    }
    %c0 = arith.constant 0 : index
    %c0_1 = arith.constant 0 : index
    %3 = vector.load %arg7[%c0, %c0_1] : memref<32x128xf32, #tpu.memory_space<vmem>>, vector<32x128xf32>
    %c0_2 = arith.constant 0 : index
    %c0_3 = arith.constant 0 : index
    %4 = vector.load %arg3[%c0_2, %c0_3] : memref<32x128xbf16, #tpu.memory_space<vmem>>, vector<32x128xbf16>
    %c0_4 = arith.constant 0 : index
    %c0_5 = arith.constant 0 : index
    %5 = vector.load %arg4[%c0_4, %c0_5] : memref<128x128xbf16, #tpu.memory_space<vmem>>, vector<128x128xbf16>
    %cst = arith.constant dense<0.000000e+00> : vector<32x128xf32>
    %6 = tpu.matmul %4, %5, %cst {dimension_numbers = #tpu.dot_dimension_numbers<[1], [0], [0], [1], [0, 0, 1, 1], [], []>} : vector<32x128xbf16>, vector<128x128xbf16>, vector<32x128xf32> -> vector<32x128xf32>
    %7 = arith.addf %3, %6 : vector<32x128xf32>
    %c0_6 = arith.constant 0 : index
    %c0_7 = arith.constant 0 : index
    %8 = vector.load %arg7[%c0_6, %c0_7] : memref<32x128xf32, #tpu.memory_space<vmem>>, vector<32x128xf32>
    tpu.vector_store %arg7[%c0_6, %c0_7], %7 {strides = array<i32>} : memref<32x128xf32, #tpu.memory_space<vmem>>, vector<32x128xf32>,
    %c0_i32_8 = arith.constant 0 : i32
    %9 = arith.cmpi eq, %arg2, %c0_i32_8 : i32
    %10 = arith.extui %9 : i1 to i32
    %c0_i32_9 = arith.constant 0 : i32
    %11 = arith.cmpi ne, %10, %c0_i32_9 : i32
    scf.if %11 {
      %c0_10 = arith.constant 0 : index
      %c0_11 = arith.constant 0 : index
      %12 = vector.load %arg7[%c0_10, %c0_11] : memref<32x128xf32, #tpu.memory_space<vmem>>, vector<32x128xf32>
      %c0_12 = arith.constant 0 : index
      %c0_13 = arith.constant 0 : index
      %13 = vector.load %arg5[%c0_12, %c0_13] : memref<1x128xf32, #tpu.memory_space<vmem>>, vector<1x128xf32>
      %14 = vector.broadcast %13 : vector<1x128xf32> to vector<32x128xf32>
      %15 = arith.addf %12, %14 : vector<32x128xf32>
      %c0_14 = arith.constant 0 : index
      %c0_15 = arith.constant 0 : index
      %16 = vector.load %arg6[%c0_14, %c0_15] : memref<32x128xf32, #tpu.memory_space<vmem>>, vector<32x128xf32>
      tpu.vector_store %arg6[%c0_14, %c0_15], %15 {strides = array<i32>} : memref<32x128xf32, #tpu.memory_space<vmem>>, vector<32x128xf32>,
    } else {
    }
    return
  }
  func.func @transform_0(%arg0: i32, %arg1: i32, %arg2: i32) -> (i32, i32) {
    %c0_i32 = arith.constant 0 : i32
    return %arg0, %arg2 : i32, i32
  }
  func.func @transform_1(%arg0: i32, %arg1: i32, %arg2: i32) -> (i32, i32) {
    %c0_i32 = arith.constant 0 : i32
    return %arg2, %arg1 : i32, i32
  }
  func.func @transform_2(%arg0: i32, %arg1: i32, %arg2: i32) -> (i32, i32) {
    %c0_i32 = arith.constant 0 : i32
    %c0_i32_0 = arith.constant 0 : i32
    return %c0_i32, %arg1 : i32, i32
  }
  func.func @transform_3(%arg0: i32, %arg1: i32, %arg2: i32) -> (i32, i32) {
    %c0_i32 = arith.constant 0 : i32
    return %arg0, %arg1 : i32, i32
  }
}

module attributes {stable_mosaic.version = 11 : i64} {
  func.func @_encoder_layer_kernel(%arg0: i32, %arg1: memref<1x24x128xf32, #tpu.memory_space<vmem>>, %arg2: memref<1x128xf32, #tpu.memory_space<vmem>>, %arg3: memref<1x128xf32, #tpu.memory_space<vmem>>, %arg4: memref<128x1536xbf16, #tpu.memory_space<vmem>>, %arg5: memref<1x1536xf32, #tpu.memory_space<vmem>>, %arg6: memref<512x128xbf16, #tpu.memory_space<vmem>>, %arg7: memref<1x128xf32, #tpu.memory_space<vmem>>, %arg8: memref<1x128xf32, #tpu.memory_space<vmem>>, %arg9: memref<1x128xf32, #tpu.memory_space<vmem>>, %arg10: memref<128x128xbf16, #tpu.memory_space<vmem>>, %arg11: memref<1x128xf32, #tpu.memory_space<vmem>>, %arg12: memref<128x128xbf16, #tpu.memory_space<vmem>>, %arg13: memref<1x128xf32, #tpu.memory_space<vmem>>, %arg14: memref<1x24x128xf32, #tpu.memory_space<vmem>>) attributes {dimension_semantics = [#tpu.dimension_semantics<parallel>], iteration_bounds = array<i64: 2>, scalar_prefetch = 0 : i64, scratch_operands = 0 : i64, tpu.core_type = #tpu.core_type<tc>, window_params = [{transform_indices = @transform_0, window_bounds = array<i64: 1, 24, 128>}, {pipeline_mode = #tpu.pipeline_mode<synchronous>, transform_indices = @transform_1, window_bounds = array<i64: 1, 128>}, {pipeline_mode = #tpu.pipeline_mode<synchronous>, transform_indices = @transform_2, window_bounds = array<i64: 1, 128>}, {pipeline_mode = #tpu.pipeline_mode<synchronous>, transform_indices = @transform_3, window_bounds = array<i64: 128, 1536>}, {pipeline_mode = #tpu.pipeline_mode<synchronous>, transform_indices = @transform_4, window_bounds = array<i64: 1, 1536>}, {pipeline_mode = #tpu.pipeline_mode<synchronous>, transform_indices = @transform_5, window_bounds = array<i64: 512, 128>}, {pipeline_mode = #tpu.pipeline_mode<synchronous>, transform_indices = @transform_6, window_bounds = array<i64: 1, 128>}, {pipeline_mode = #tpu.pipeline_mode<synchronous>, transform_indices = @transform_7, window_bounds = array<i64: 1, 128>}, {pipeline_mode = #tpu.pipeline_mode<synchronous>, transform_indices = @transform_8, window_bounds = array<i64: 1, 128>}, {pipeline_mode = #tpu.pipeline_mode<synchronous>, transform_indices = @transform_9, window_bounds = array<i64: 128, 128>}, {pipeline_mode = #tpu.pipeline_mode<synchronous>, transform_indices = @transform_10, window_bounds = array<i64: 1, 128>}, {pipeline_mode = #tpu.pipeline_mode<synchronous>, transform_indices = @transform_11, window_bounds = array<i64: 128, 128>}, {pipeline_mode = #tpu.pipeline_mode<synchronous>, transform_indices = @transform_12, window_bounds = array<i64: 1, 128>}, {transform_indices = @transform_13, window_bounds = array<i64: 1, 24, 128>}]} {
    %c0 = arith.constant 0 : index
    %c0_0 = arith.constant 0 : index
    %c0_1 = arith.constant 0 : index
    %0 = vector.load %arg1[%c0, %c0_0, %c0_1] : memref<1x24x128xf32, #tpu.memory_space<vmem>>, vector<1x24x128xf32>
    %1 = vector.shape_cast %0 : vector<1x24x128xf32> to vector<24x128xf32>
    %c0_2 = arith.constant 0 : index
    %c0_3 = arith.constant 0 : index
    %2 = vector.load %arg2[%c0_2, %c0_3] : memref<1x128xf32, #tpu.memory_space<vmem>>, vector<1x128xf32>
    %c0_4 = arith.constant 0 : index
    %c0_5 = arith.constant 0 : index
    %3 = vector.load %arg3[%c0_4, %c0_5] : memref<1x128xf32, #tpu.memory_space<vmem>>, vector<1x128xf32>
    %cst = arith.constant dense<0.000000e+00> : vector<24xf32>
    %4 = vector.multi_reduction <add>, %1, %cst [1] : vector<24x128xf32> to vector<24xf32>
    %5 = vector.shape_cast %4 : vector<24xf32> to vector<24x1xf32>
    %cst_6 = arith.constant 3.125000e-02 : f32
    %6 = vector.broadcast %cst_6 : f32 to vector<24x1xf32>
    %7 = arith.mulf %5, %6 : vector<24x1xf32>
    %8 = arith.mulf %1, %1 : vector<24x128xf32>
    %cst_7 = arith.constant dense<0.000000e+00> : vector<24xf32>
    %9 = vector.multi_reduction <add>, %8, %cst_7 [1] : vector<24x128xf32> to vector<24xf32>
    %10 = vector.shape_cast %9 : vector<24xf32> to vector<24x1xf32>
    %cst_8 = arith.constant 3.125000e-02 : f32
    %11 = vector.broadcast %cst_8 : f32 to vector<24x1xf32>
    %12 = arith.mulf %10, %11 : vector<24x1xf32>
    %13 = arith.mulf %7, %7 : vector<24x1xf32>
    %14 = arith.subf %12, %13 : vector<24x1xf32>
    %15 = vector.broadcast %7 : vector<24x1xf32> to vector<24x128xf32>
    %16 = arith.subf %1, %15 : vector<24x128xf32>
    %cst_9 = arith.constant 9.99999974E-6 : f32
    %17 = vector.broadcast %cst_9 : f32 to vector<24x1xf32>
    %18 = arith.addf %14, %17 : vector<24x1xf32>
    %19 = math.rsqrt %18 : vector<24x1xf32>
    %20 = vector.broadcast %19 : vector<24x1xf32> to vector<24x128xf32>
    %21 = arith.mulf %16, %20 : vector<24x128xf32>
    %22 = vector.broadcast %2 : vector<1x128xf32> to vector<24x128xf32>
    %23 = arith.mulf %21, %22 : vector<24x128xf32>
    %24 = vector.broadcast %3 : vector<1x128xf32> to vector<24x128xf32>
    %25 = arith.addf %23, %24 : vector<24x128xf32>
    %26 = arith.truncf %25 : vector<24x128xf32> to vector<24x128xbf16>
    %c0_10 = arith.constant 0 : index
    %c0_11 = arith.constant 0 : index
    %27 = vector.load %arg4[%c0_10, %c0_11] : memref<128x1536xbf16, #tpu.memory_space<vmem>>, vector<128x1536xbf16>
    %cst_12 = arith.constant dense<0.000000e+00> : vector<24x1536xf32>
    %28 = tpu.matmul %26, %27, %cst_12 {dimension_numbers = #tpu.dot_dimension_numbers<[1], [0], [0], [1], [0, 0, 1, 1], [], []>} : vector<24x128xbf16>, vector<128x1536xbf16>, vector<24x1536xf32> -> vector<24x1536xf32>
    %c0_13 = arith.constant 0 : index
    %c0_14 = arith.constant 0 : index
    %29 = vector.load %arg5[%c0_13, %c0_14] : memref<1x1536xf32, #tpu.memory_space<vmem>>, vector<1x1536xf32>
    %30 = vector.broadcast %29 : vector<1x1536xf32> to vector<24x1536xf32>
    %31 = arith.addf %28, %30 : vector<24x1536xf32>
    %32 = tpu.iota {dimensions = array<i32: 1>} : vector<1x24xi32>
    %c17_i32 = arith.constant 17 : i32
    %33 = vector.broadcast %c17_i32 : i32 to vector<1x24xi32>
    %34 = arith.cmpi slt, %32, %33 : vector<1x24xi32>
    %cst_15 = arith.constant 0.000000e+00 : f32
    %35 = vector.broadcast %cst_15 : f32 to vector<24x128xf32>
    %36 = vector.extract_strided_slice %31 {offsets = [0, 0], sizes = [24, 128], strides = [1, 1]} : vector<24x1536xf32> to vector<24x128xf32>
    %37 = vector.extract_strided_slice %31 {offsets = [0, 512], sizes = [24, 128], strides = [1, 1]} : vector<24x1536xf32> to vector<24x128xf32>
    %38 = vector.extract_strided_slice %31 {offsets = [0, 1024], sizes = [24, 128], strides = [1, 1]} : vector<24x1536xf32> to vector<24x128xf32>
    %39 = arith.truncf %36 : vector<24x128xf32> to vector<24x128xbf16>
    %40 = arith.truncf %37 : vector<24x128xf32> to vector<24x128xbf16>
    %cst_16 = arith.constant dense<0.000000e+00> : vector<24x24xf32>
    %41 = tpu.matmul %39, %40, %cst_16 {dimension_numbers = #tpu.dot_dimension_numbers<[1], [1], [0], [0], [0, 0, 1, 0], [], []>} : vector<24x128xbf16>, vector<24x128xbf16>, vector<24x24xf32> -> vector<24x24xf32>
    %cst_17 = arith.constant -1.000000e+30 : f32
    %42 = vector.shape_cast %34 : vector<1x24xi1> to vector<1x24xi1>
    %43 = vector.broadcast %42 : vector<1x24xi1> to vector<24x24xi1>
    %44 = vector.broadcast %cst_17 : f32 to vector<24x24xf32>
    %45 = arith.select %43, %41, %44 : vector<24x24xi1>, vector<24x24xf32>
    %cst_18 = arith.constant dense<0xFF800000> : vector<24xf32>
    %46 = vector.multi_reduction <maximumf>, %45, %cst_18 [1] : vector<24x24xf32> to vector<24xf32>
    %47 = vector.shape_cast %46 : vector<24xf32> to vector<24x1xf32>
    %48 = vector.broadcast %47 : vector<24x1xf32> to vector<24x24xf32>
    %49 = arith.subf %45, %48 : vector<24x24xf32>
    %50 = math.exp %49 : vector<24x24xf32>
    %cst_19 = arith.constant dense<0.000000e+00> : vector<24xf32>
    %51 = vector.multi_reduction <add>, %50, %cst_19 [1] : vector<24x24xf32> to vector<24xf32>
    %52 = vector.shape_cast %51 : vector<24xf32> to vector<24x1xf32>
    %53 = tpu.reciprocal %52 {approx = true} : vector<24x1xf32> -> vector<24x1xf32>
    %54 = vector.broadcast %53 : vector<24x1xf32> to vector<24x24xf32>
    %55 = arith.mulf %50, %54 : vector<24x24xf32>
    %56 = arith.truncf %55 : vector<24x24xf32> to vector<24x24xbf16>
    %57 = arith.truncf %38 : vector<24x128xf32> to vector<24x128xbf16>
    %cst_20 = arith.constant dense<0.000000e+00> : vector<24x128xf32>
    %58 = tpu.matmul %56, %57, %cst_20 {dimension_numbers = #tpu.dot_dimension_numbers<[1], [0], [0], [1], [0, 0, 1, 1], [], []>} : vector<24x24xbf16>, vector<24x128xbf16>, vector<24x128xf32> -> vector<24x128xf32>
    %59 = arith.truncf %58 : vector<24x128xf32> to vector<24x128xbf16>
    %c0_21 = arith.constant 0 : index
    %c0_22 = arith.constant 0 : index
    %60 = vector.load %arg6[%c0_21, %c0_22] : memref<512x128xbf16, #tpu.memory_space<vmem>>, vector<128x128xbf16>
    %cst_23 = arith.constant dense<0.000000e+00> : vector<24x128xf32>
    %61 = tpu.matmul %59, %60, %cst_23 {dimension_numbers = #tpu.dot_dimension_numbers<[1], [0], [0], [1], [0, 0, 1, 1], [], []>} : vector<24x128xbf16>, vector<128x128xbf16>, vector<24x128xf32> -> vector<24x128xf32>
    %62 = arith.addf %35, %61 : vector<24x128xf32>
    %63 = vector.extract_strided_slice %31 {offsets = [0, 128], sizes = [24, 128], strides = [1, 1]} : vector<24x1536xf32> to vector<24x128xf32>
    %64 = vector.extract_strided_slice %31 {offsets = [0, 640], sizes = [24, 128], strides = [1, 1]} : vector<24x1536xf32> to vector<24x128xf32>
    %65 = vector.extract_strided_slice %31 {offsets = [0, 1152], sizes = [24, 128], strides = [1, 1]} : vector<24x1536xf32> to vector<24x128xf32>
    %66 = arith.truncf %63 : vector<24x128xf32> to vector<24x128xbf16>
    %67 = arith.truncf %64 : vector<24x128xf32> to vector<24x128xbf16>
    %cst_24 = arith.constant dense<0.000000e+00> : vector<24x24xf32>
    %68 = tpu.matmul %66, %67, %cst_24 {dimension_numbers = #tpu.dot_dimension_numbers<[1], [1], [0], [0], [0, 0, 1, 0], [], []>} : vector<24x128xbf16>, vector<24x128xbf16>, vector<24x24xf32> -> vector<24x24xf32>
    %cst_25 = arith.constant -1.000000e+30 : f32
    %69 = vector.shape_cast %34 : vector<1x24xi1> to vector<1x24xi1>
    %70 = vector.broadcast %69 : vector<1x24xi1> to vector<24x24xi1>
    %71 = vector.broadcast %cst_25 : f32 to vector<24x24xf32>
    %72 = arith.select %70, %68, %71 : vector<24x24xi1>, vector<24x24xf32>
    %cst_26 = arith.constant dense<0xFF800000> : vector<24xf32>
    %73 = vector.multi_reduction <maximumf>, %72, %cst_26 [1] : vector<24x24xf32> to vector<24xf32>
    %74 = vector.shape_cast %73 : vector<24xf32> to vector<24x1xf32>
    %75 = vector.broadcast %74 : vector<24x1xf32> to vector<24x24xf32>
    %76 = arith.subf %72, %75 : vector<24x24xf32>
    %77 = math.exp %76 : vector<24x24xf32>
    %cst_27 = arith.constant dense<0.000000e+00> : vector<24xf32>
    %78 = vector.multi_reduction <add>, %77, %cst_27 [1] : vector<24x24xf32> to vector<24xf32>
    %79 = vector.shape_cast %78 : vector<24xf32> to vector<24x1xf32>
    %80 = tpu.reciprocal %79 {approx = true} : vector<24x1xf32> -> vector<24x1xf32>
    %81 = vector.broadcast %80 : vector<24x1xf32> to vector<24x24xf32>
    %82 = arith.mulf %77, %81 : vector<24x24xf32>
    %83 = arith.truncf %82 : vector<24x24xf32> to vector<24x24xbf16>
    %84 = arith.truncf %65 : vector<24x128xf32> to vector<24x128xbf16>
    %cst_28 = arith.constant dense<0.000000e+00> : vector<24x128xf32>
    %85 = tpu.matmul %83, %84, %cst_28 {dimension_numbers = #tpu.dot_dimension_numbers<[1], [0], [0], [1], [0, 0, 1, 1], [], []>} : vector<24x24xbf16>, vector<24x128xbf16>, vector<24x128xf32> -> vector<24x128xf32>
    %86 = arith.truncf %85 : vector<24x128xf32> to vector<24x128xbf16>
    %c128 = arith.constant 128 : index
    %c0_29 = arith.constant 0 : index
    %87 = vector.load %arg6[%c128, %c0_29] : memref<512x128xbf16, #tpu.memory_space<vmem>>, vector<128x128xbf16>
    %cst_30 = arith.constant dense<0.000000e+00> : vector<24x128xf32>
    %88 = tpu.matmul %86, %87, %cst_30 {dimension_numbers = #tpu.dot_dimension_numbers<[1], [0], [0], [1], [0, 0, 1, 1], [], []>} : vector<24x128xbf16>, vector<128x128xbf16>, vector<24x128xf32> -> vector<24x128xf32>
    %89 = arith.addf %62, %88 : vector<24x128xf32>
    %90 = vector.extract_strided_slice %31 {offsets = [0, 256], sizes = [24, 128], strides = [1, 1]} : vector<24x1536xf32> to vector<24x128xf32>
    %91 = vector.extract_strided_slice %31 {offsets = [0, 768], sizes = [24, 128], strides = [1, 1]} : vector<24x1536xf32> to vector<24x128xf32>
    %92 = vector.extract_strided_slice %31 {offsets = [0, 1280], sizes = [24, 128], strides = [1, 1]} : vector<24x1536xf32> to vector<24x128xf32>
    %93 = arith.truncf %90 : vector<24x128xf32> to vector<24x128xbf16>
    %94 = arith.truncf %91 : vector<24x128xf32> to vector<24x128xbf16>
    %cst_31 = arith.constant dense<0.000000e+00> : vector<24x24xf32>
    %95 = tpu.matmul %93, %94, %cst_31 {dimension_numbers = #tpu.dot_dimension_numbers<[1], [1], [0], [0], [0, 0, 1, 0], [], []>} : vector<24x128xbf16>, vector<24x128xbf16>, vector<24x24xf32> -> vector<24x24xf32>
    %cst_32 = arith.constant -1.000000e+30 : f32
    %96 = vector.shape_cast %34 : vector<1x24xi1> to vector<1x24xi1>
    %97 = vector.broadcast %96 : vector<1x24xi1> to vector<24x24xi1>
    %98 = vector.broadcast %cst_32 : f32 to vector<24x24xf32>
    %99 = arith.select %97, %95, %98 : vector<24x24xi1>, vector<24x24xf32>
    %cst_33 = arith.constant dense<0xFF800000> : vector<24xf32>
    %100 = vector.multi_reduction <maximumf>, %99, %cst_33 [1] : vector<24x24xf32> to vector<24xf32>
    %101 = vector.shape_cast %100 : vector<24xf32> to vector<24x1xf32>
    %102 = vector.broadcast %101 : vector<24x1xf32> to vector<24x24xf32>
    %103 = arith.subf %99, %102 : vector<24x24xf32>
    %104 = math.exp %103 : vector<24x24xf32>
    %cst_34 = arith.constant dense<0.000000e+00> : vector<24xf32>
    %105 = vector.multi_reduction <add>, %104, %cst_34 [1] : vector<24x24xf32> to vector<24xf32>
    %106 = vector.shape_cast %105 : vector<24xf32> to vector<24x1xf32>
    %107 = tpu.reciprocal %106 {approx = true} : vector<24x1xf32> -> vector<24x1xf32>
    %108 = vector.broadcast %107 : vector<24x1xf32> to vector<24x24xf32>
    %109 = arith.mulf %104, %108 : vector<24x24xf32>
    %110 = arith.truncf %109 : vector<24x24xf32> to vector<24x24xbf16>
    %111 = arith.truncf %92 : vector<24x128xf32> to vector<24x128xbf16>
    %cst_35 = arith.constant dense<0.000000e+00> : vector<24x128xf32>
    %112 = tpu.matmul %110, %111, %cst_35 {dimension_numbers = #tpu.dot_dimension_numbers<[1], [0], [0], [1], [0, 0, 1, 1], [], []>} : vector<24x24xbf16>, vector<24x128xbf16>, vector<24x128xf32> -> vector<24x128xf32>
    %113 = arith.truncf %112 : vector<24x128xf32> to vector<24x128xbf16>
    %c256 = arith.constant 256 : index
    %c0_36 = arith.constant 0 : index
    %114 = vector.load %arg6[%c256, %c0_36] : memref<512x128xbf16, #tpu.memory_space<vmem>>, vector<128x128xbf16>
    %cst_37 = arith.constant dense<0.000000e+00> : vector<24x128xf32>
    %115 = tpu.matmul %113, %114, %cst_37 {dimension_numbers = #tpu.dot_dimension_numbers<[1], [0], [0], [1], [0, 0, 1, 1], [], []>} : vector<24x128xbf16>, vector<128x128xbf16>, vector<24x128xf32> -> vector<24x128xf32>
    %116 = arith.addf %89, %115 : vector<24x128xf32>
    %117 = vector.extract_strided_slice %31 {offsets = [0, 384], sizes = [24, 128], strides = [1, 1]} : vector<24x1536xf32> to vector<24x128xf32>
    %118 = vector.extract_strided_slice %31 {offsets = [0, 896], sizes = [24, 128], strides = [1, 1]} : vector<24x1536xf32> to vector<24x128xf32>
    %119 = vector.extract_strided_slice %31 {offsets = [0, 1408], sizes = [24, 128], strides = [1, 1]} : vector<24x1536xf32> to vector<24x128xf32>
    %120 = arith.truncf %117 : vector<24x128xf32> to vector<24x128xbf16>
    %121 = arith.truncf %118 : vector<24x128xf32> to vector<24x128xbf16>
    %cst_38 = arith.constant dense<0.000000e+00> : vector<24x24xf32>
    %122 = tpu.matmul %120, %121, %cst_38 {dimension_numbers = #tpu.dot_dimension_numbers<[1], [1], [0], [0], [0, 0, 1, 0], [], []>} : vector<24x128xbf16>, vector<24x128xbf16>, vector<24x24xf32> -> vector<24x24xf32>
    %cst_39 = arith.constant -1.000000e+30 : f32
    %123 = vector.shape_cast %34 : vector<1x24xi1> to vector<1x24xi1>
    %124 = vector.broadcast %123 : vector<1x24xi1> to vector<24x24xi1>
    %125 = vector.broadcast %cst_39 : f32 to vector<24x24xf32>
    %126 = arith.select %124, %122, %125 : vector<24x24xi1>, vector<24x24xf32>
    %cst_40 = arith.constant dense<0xFF800000> : vector<24xf32>
    %127 = vector.multi_reduction <maximumf>, %126, %cst_40 [1] : vector<24x24xf32> to vector<24xf32>
    %128 = vector.shape_cast %127 : vector<24xf32> to vector<24x1xf32>
    %129 = vector.broadcast %128 : vector<24x1xf32> to vector<24x24xf32>
    %130 = arith.subf %126, %129 : vector<24x24xf32>
    %131 = math.exp %130 : vector<24x24xf32>
    %cst_41 = arith.constant dense<0.000000e+00> : vector<24xf32>
    %132 = vector.multi_reduction <add>, %131, %cst_41 [1] : vector<24x24xf32> to vector<24xf32>
    %133 = vector.shape_cast %132 : vector<24xf32> to vector<24x1xf32>
    %134 = tpu.reciprocal %133 {approx = true} : vector<24x1xf32> -> vector<24x1xf32>
    %135 = vector.broadcast %134 : vector<24x1xf32> to vector<24x24xf32>
    %136 = arith.mulf %131, %135 : vector<24x24xf32>
    %137 = arith.truncf %136 : vector<24x24xf32> to vector<24x24xbf16>
    %138 = arith.truncf %119 : vector<24x128xf32> to vector<24x128xbf16>
    %cst_42 = arith.constant dense<0.000000e+00> : vector<24x128xf32>
    %139 = tpu.matmul %137, %138, %cst_42 {dimension_numbers = #tpu.dot_dimension_numbers<[1], [0], [0], [1], [0, 0, 1, 1], [], []>} : vector<24x24xbf16>, vector<24x128xbf16>, vector<24x128xf32> -> vector<24x128xf32>
    %140 = arith.truncf %139 : vector<24x128xf32> to vector<24x128xbf16>
    %c384 = arith.constant 384 : index
    %c0_43 = arith.constant 0 : index
    %141 = vector.load %arg6[%c384, %c0_43] : memref<512x128xbf16, #tpu.memory_space<vmem>>, vector<128x128xbf16>
    %cst_44 = arith.constant dense<0.000000e+00> : vector<24x128xf32>
    %142 = tpu.matmul %140, %141, %cst_44 {dimension_numbers = #tpu.dot_dimension_numbers<[1], [0], [0], [1], [0, 0, 1, 1], [], []>} : vector<24x128xbf16>, vector<128x128xbf16>, vector<24x128xf32> -> vector<24x128xf32>
    %143 = arith.addf %116, %142 : vector<24x128xf32>
    %144 = arith.addf %1, %143 : vector<24x128xf32>
    %c0_45 = arith.constant 0 : index
    %c0_46 = arith.constant 0 : index
    %145 = vector.load %arg7[%c0_45, %c0_46] : memref<1x128xf32, #tpu.memory_space<vmem>>, vector<1x128xf32>
    %146 = vector.broadcast %145 : vector<1x128xf32> to vector<24x128xf32>
    %147 = arith.addf %144, %146 : vector<24x128xf32>
    %c0_47 = arith.constant 0 : index
    %c0_48 = arith.constant 0 : index
    %148 = vector.load %arg8[%c0_47, %c0_48] : memref<1x128xf32, #tpu.memory_space<vmem>>, vector<1x128xf32>
    %c0_49 = arith.constant 0 : index
    %c0_50 = arith.constant 0 : index
    %149 = vector.load %arg9[%c0_49, %c0_50] : memref<1x128xf32, #tpu.memory_space<vmem>>, vector<1x128xf32>
    %cst_51 = arith.constant dense<0.000000e+00> : vector<24xf32>
    %150 = vector.multi_reduction <add>, %147, %cst_51 [1] : vector<24x128xf32> to vector<24xf32>
    %151 = vector.shape_cast %150 : vector<24xf32> to vector<24x1xf32>
    %cst_52 = arith.constant 3.125000e-02 : f32
    %152 = vector.broadcast %cst_52 : f32 to vector<24x1xf32>
    %153 = arith.mulf %151, %152 : vector<24x1xf32>
    %154 = arith.mulf %147, %147 : vector<24x128xf32>
    %cst_53 = arith.constant dense<0.000000e+00> : vector<24xf32>
    %155 = vector.multi_reduction <add>, %154, %cst_53 [1] : vector<24x128xf32> to vector<24xf32>
    %156 = vector.shape_cast %155 : vector<24xf32> to vector<24x1xf32>
    %cst_54 = arith.constant 3.125000e-02 : f32
    %157 = vector.broadcast %cst_54 : f32 to vector<24x1xf32>
    %158 = arith.mulf %156, %157 : vector<24x1xf32>
    %159 = arith.mulf %153, %153 : vector<24x1xf32>
    %160 = arith.subf %158, %159 : vector<24x1xf32>
    %161 = vector.broadcast %153 : vector<24x1xf32> to vector<24x128xf32>
    %162 = arith.subf %147, %161 : vector<24x128xf32>
    %cst_55 = arith.constant 9.99999974E-6 : f32
    %163 = vector.broadcast %cst_55 : f32 to vector<24x1xf32>
    %164 = arith.addf %160, %163 : vector<24x1xf32>
    %165 = math.rsqrt %164 : vector<24x1xf32>
    %166 = vector.broadcast %165 : vector<24x1xf32> to vector<24x128xf32>
    %167 = arith.mulf %162, %166 : vector<24x128xf32>
    %168 = vector.broadcast %148 : vector<1x128xf32> to vector<24x128xf32>
    %169 = arith.mulf %167, %168 : vector<24x128xf32>
    %170 = vector.broadcast %149 : vector<1x128xf32> to vector<24x128xf32>
    %171 = arith.addf %169, %170 : vector<24x128xf32>
    %172 = arith.truncf %171 : vector<24x128xf32> to vector<24x128xbf16>
    %c0_56 = arith.constant 0 : index
    %c0_57 = arith.constant 0 : index
    %173 = vector.load %arg10[%c0_56, %c0_57] : memref<128x128xbf16, #tpu.memory_space<vmem>>, vector<128x128xbf16>
    %cst_58 = arith.constant dense<0.000000e+00> : vector<24x128xf32>
    %174 = tpu.matmul %172, %173, %cst_58 {dimension_numbers = #tpu.dot_dimension_numbers<[1], [0], [0], [1], [0, 0, 1, 1], [], []>} : vector<24x128xbf16>, vector<128x128xbf16>, vector<24x128xf32> -> vector<24x128xf32>
    %c0_59 = arith.constant 0 : index
    %c0_60 = arith.constant 0 : index
    %175 = vector.load %arg11[%c0_59, %c0_60] : memref<1x128xf32, #tpu.memory_space<vmem>>, vector<1x128xf32>
    %176 = vector.broadcast %175 : vector<1x128xf32> to vector<24x128xf32>
    %177 = arith.addf %174, %176 : vector<24x128xf32>
    %178 = arith.mulf %177, %177 : vector<24x128xf32>
    %179 = arith.mulf %177, %178 : vector<24x128xf32>
    %cst_61 = arith.constant 4.471500e-02 : f32
    %180 = vector.broadcast %cst_61 : f32 to vector<24x128xf32>
    %181 = arith.mulf %180, %179 : vector<24x128xf32>
    %182 = arith.addf %177, %181 : vector<24x128xf32>
    %cst_62 = arith.constant 0.797884583 : f32
    %183 = vector.broadcast %cst_62 : f32 to vector<24x128xf32>
    %184 = arith.mulf %183, %182 : vector<24x128xf32>
    %185 = math.tanh %184 : vector<24x128xf32>
    %cst_63 = arith.constant 1.000000e+00 : f32
    %186 = vector.broadcast %cst_63 : f32 to vector<24x128xf32>
    %187 = arith.addf %186, %185 : vector<24x128xf32>
    %cst_64 = arith.constant 5.000000e-01 : f32
    %188 = vector.broadcast %cst_64 : f32 to vector<24x128xf32>
    %189 = arith.mulf %188, %187 : vector<24x128xf32>
    %190 = arith.mulf %177, %189 : vector<24x128xf32>
    %191 = arith.truncf %190 : vector<24x128xf32> to vector<24x128xbf16>
    %c0_65 = arith.constant 0 : index
    %c0_66 = arith.constant 0 : index
    %192 = vector.load %arg12[%c0_65, %c0_66] : memref<128x128xbf16, #tpu.memory_space<vmem>>, vector<128x128xbf16>
    %cst_67 = arith.constant dense<0.000000e+00> : vector<24x128xf32>
    %193 = tpu.matmul %191, %192, %cst_67 {dimension_numbers = #tpu.dot_dimension_numbers<[1], [0], [0], [1], [0, 0, 1, 1], [], []>} : vector<24x128xbf16>, vector<128x128xbf16>, vector<24x128xf32> -> vector<24x128xf32>
    %c0_68 = arith.constant 0 : index
    %c0_69 = arith.constant 0 : index
    %194 = vector.load %arg13[%c0_68, %c0_69] : memref<1x128xf32, #tpu.memory_space<vmem>>, vector<1x128xf32>
    %195 = vector.broadcast %194 : vector<1x128xf32> to vector<24x128xf32>
    %196 = arith.addf %193, %195 : vector<24x128xf32>
    %197 = arith.addf %147, %196 : vector<24x128xf32>
    %c0_70 = arith.constant 0 : index
    %c0_71 = arith.constant 0 : index
    %c0_72 = arith.constant 0 : index
    %198 = vector.load %arg14[%c0_70, %c0_71, %c0_72] : memref<1x24x128xf32, #tpu.memory_space<vmem>>, vector<1x24x128xf32>
    %199 = vector.shape_cast %198 : vector<1x24x128xf32> to vector<24x128xf32>
    %200 = vector.shape_cast %197 : vector<24x128xf32> to vector<1x24x128xf32>
    tpu.vector_store %arg14[%c0_70, %c0_71, %c0_72], %200 {strides = array<i32>} : memref<1x24x128xf32, #tpu.memory_space<vmem>>, vector<1x24x128xf32>,
    return
  }
  func.func @transform_0(%arg0: i32) -> (i32, i32, i32) {
    %c0_i32 = arith.constant 0 : i32
    %c0_i32_0 = arith.constant 0 : i32
    %c0_i32_1 = arith.constant 0 : i32
    return %arg0, %c0_i32, %c0_i32_0 : i32, i32, i32
  }
  func.func @transform_1(%arg0: i32) -> (i32, i32) {
    %c0_i32 = arith.constant 0 : i32
    %c0_i32_0 = arith.constant 0 : i32
    %c0_i32_1 = arith.constant 0 : i32
    return %c0_i32, %c0_i32_0 : i32, i32
  }
  func.func @transform_2(%arg0: i32) -> (i32, i32) {
    %c0_i32 = arith.constant 0 : i32
    %c0_i32_0 = arith.constant 0 : i32
    %c0_i32_1 = arith.constant 0 : i32
    return %c0_i32, %c0_i32_0 : i32, i32
  }
  func.func @transform_3(%arg0: i32) -> (i32, i32) {
    %c0_i32 = arith.constant 0 : i32
    %c0_i32_0 = arith.constant 0 : i32
    %c0_i32_1 = arith.constant 0 : i32
    return %c0_i32, %c0_i32_0 : i32, i32
  }
  func.func @transform_4(%arg0: i32) -> (i32, i32) {
    %c0_i32 = arith.constant 0 : i32
    %c0_i32_0 = arith.constant 0 : i32
    %c0_i32_1 = arith.constant 0 : i32
    return %c0_i32, %c0_i32_0 : i32, i32
  }
  func.func @transform_5(%arg0: i32) -> (i32, i32) {
    %c0_i32 = arith.constant 0 : i32
    %c0_i32_0 = arith.constant 0 : i32
    %c0_i32_1 = arith.constant 0 : i32
    return %c0_i32, %c0_i32_0 : i32, i32
  }
  func.func @transform_6(%arg0: i32) -> (i32, i32) {
    %c0_i32 = arith.constant 0 : i32
    %c0_i32_0 = arith.constant 0 : i32
    %c0_i32_1 = arith.constant 0 : i32
    return %c0_i32, %c0_i32_0 : i32, i32
  }
  func.func @transform_7(%arg0: i32) -> (i32, i32) {
    %c0_i32 = arith.constant 0 : i32
    %c0_i32_0 = arith.constant 0 : i32
    %c0_i32_1 = arith.constant 0 : i32
    return %c0_i32, %c0_i32_0 : i32, i32
  }
  func.func @transform_8(%arg0: i32) -> (i32, i32) {
    %c0_i32 = arith.constant 0 : i32
    %c0_i32_0 = arith.constant 0 : i32
    %c0_i32_1 = arith.constant 0 : i32
    return %c0_i32, %c0_i32_0 : i32, i32
  }
  func.func @transform_9(%arg0: i32) -> (i32, i32) {
    %c0_i32 = arith.constant 0 : i32
    %c0_i32_0 = arith.constant 0 : i32
    %c0_i32_1 = arith.constant 0 : i32
    return %c0_i32, %c0_i32_0 : i32, i32
  }
  func.func @transform_10(%arg0: i32) -> (i32, i32) {
    %c0_i32 = arith.constant 0 : i32
    %c0_i32_0 = arith.constant 0 : i32
    %c0_i32_1 = arith.constant 0 : i32
    return %c0_i32, %c0_i32_0 : i32, i32
  }
  func.func @transform_11(%arg0: i32) -> (i32, i32) {
    %c0_i32 = arith.constant 0 : i32
    %c0_i32_0 = arith.constant 0 : i32
    %c0_i32_1 = arith.constant 0 : i32
    return %c0_i32, %c0_i32_0 : i32, i32
  }
  func.func @transform_12(%arg0: i32) -> (i32, i32) {
    %c0_i32 = arith.constant 0 : i32
    %c0_i32_0 = arith.constant 0 : i32
    %c0_i32_1 = arith.constant 0 : i32
    return %c0_i32, %c0_i32_0 : i32, i32
  }
  func.func @transform_13(%arg0: i32) -> (i32, i32, i32) {
    %c0_i32 = arith.constant 0 : i32
    %c0_i32_0 = arith.constant 0 : i32
    %c0_i32_1 = arith.constant 0 : i32
    return %arg0, %c0_i32, %c0_i32_0 : i32, i32, i32
  }
}

module attributes {stable_mosaic.version = 11 : i64} {
  func.func @_encoder_layer_kernel(%arg0: i32, %arg1: memref<1x24x128xf32, #tpu.memory_space<vmem>>, %arg2: memref<1x128xf32, #tpu.memory_space<vmem>>, %arg3: memref<1x128xf32, #tpu.memory_space<vmem>>, %arg4: memref<128x1536xbf16, #tpu.memory_space<vmem>>, %arg5: memref<1x1536xf32, #tpu.memory_space<vmem>>, %arg6: memref<512x128xbf16, #tpu.memory_space<vmem>>, %arg7: memref<1x128xf32, #tpu.memory_space<vmem>>, %arg8: memref<1x128xf32, #tpu.memory_space<vmem>>, %arg9: memref<1x128xf32, #tpu.memory_space<vmem>>, %arg10: memref<128x128xbf16, #tpu.memory_space<vmem>>, %arg11: memref<1x128xf32, #tpu.memory_space<vmem>>, %arg12: memref<128x128xbf16, #tpu.memory_space<vmem>>, %arg13: memref<1x128xf32, #tpu.memory_space<vmem>>, %arg14: memref<1x24x128xf32, #tpu.memory_space<vmem>>) attributes {dimension_semantics = [#tpu.dimension_semantics<parallel>], iteration_bounds = array<i64: 2>, scalar_prefetch = 0 : i64, scratch_operands = 0 : i64, tpu.core_type = #tpu.core_type<tc>, window_params = [{transform_indices = @transform_0, window_bounds = array<i64: 1, 24, 128>}, {pipeline_mode = #tpu.pipeline_mode<synchronous>, transform_indices = @transform_1, window_bounds = array<i64: 1, 128>}, {pipeline_mode = #tpu.pipeline_mode<synchronous>, transform_indices = @transform_2, window_bounds = array<i64: 1, 128>}, {pipeline_mode = #tpu.pipeline_mode<synchronous>, transform_indices = @transform_3, window_bounds = array<i64: 128, 1536>}, {pipeline_mode = #tpu.pipeline_mode<synchronous>, transform_indices = @transform_4, window_bounds = array<i64: 1, 1536>}, {pipeline_mode = #tpu.pipeline_mode<synchronous>, transform_indices = @transform_5, window_bounds = array<i64: 512, 128>}, {pipeline_mode = #tpu.pipeline_mode<synchronous>, transform_indices = @transform_6, window_bounds = array<i64: 1, 128>}, {pipeline_mode = #tpu.pipeline_mode<synchronous>, transform_indices = @transform_7, window_bounds = array<i64: 1, 128>}, {pipeline_mode = #tpu.pipeline_mode<synchronous>, transform_indices = @transform_8, window_bounds = array<i64: 1, 128>}, {pipeline_mode = #tpu.pipeline_mode<synchronous>, transform_indices = @transform_9, window_bounds = array<i64: 128, 128>}, {pipeline_mode = #tpu.pipeline_mode<synchronous>, transform_indices = @transform_10, window_bounds = array<i64: 1, 128>}, {pipeline_mode = #tpu.pipeline_mode<synchronous>, transform_indices = @transform_11, window_bounds = array<i64: 128, 128>}, {pipeline_mode = #tpu.pipeline_mode<synchronous>, transform_indices = @transform_12, window_bounds = array<i64: 1, 128>}, {transform_indices = @transform_13, window_bounds = array<i64: 1, 24, 128>}]} {
    %c0 = arith.constant 0 : index
    %c0_0 = arith.constant 0 : index
    %c0_1 = arith.constant 0 : index
    %0 = vector.load %arg1[%c0, %c0_0, %c0_1] : memref<1x24x128xf32, #tpu.memory_space<vmem>>, vector<1x24x128xf32>
    %1 = vector.shape_cast %0 : vector<1x24x128xf32> to vector<24x128xf32>
    %c0_2 = arith.constant 0 : index
    %c0_3 = arith.constant 0 : index
    %2 = vector.load %arg2[%c0_2, %c0_3] : memref<1x128xf32, #tpu.memory_space<vmem>>, vector<1x128xf32>
    %c0_4 = arith.constant 0 : index
    %c0_5 = arith.constant 0 : index
    %3 = vector.load %arg3[%c0_4, %c0_5] : memref<1x128xf32, #tpu.memory_space<vmem>>, vector<1x128xf32>
    %cst = arith.constant dense<0.000000e+00> : vector<24xf32>
    %4 = vector.multi_reduction <add>, %1, %cst [1] : vector<24x128xf32> to vector<24xf32>
    %5 = vector.shape_cast %4 : vector<24xf32> to vector<24x1xf32>
    %cst_6 = arith.constant 3.125000e-02 : f32
    %6 = vector.broadcast %cst_6 : f32 to vector<24x1xf32>
    %7 = arith.mulf %5, %6 : vector<24x1xf32>
    %8 = arith.mulf %1, %1 : vector<24x128xf32>
    %cst_7 = arith.constant dense<0.000000e+00> : vector<24xf32>
    %9 = vector.multi_reduction <add>, %8, %cst_7 [1] : vector<24x128xf32> to vector<24xf32>
    %10 = vector.shape_cast %9 : vector<24xf32> to vector<24x1xf32>
    %cst_8 = arith.constant 3.125000e-02 : f32
    %11 = vector.broadcast %cst_8 : f32 to vector<24x1xf32>
    %12 = arith.mulf %10, %11 : vector<24x1xf32>
    %13 = arith.mulf %7, %7 : vector<24x1xf32>
    %14 = arith.subf %12, %13 : vector<24x1xf32>
    %15 = vector.broadcast %7 : vector<24x1xf32> to vector<24x128xf32>
    %16 = arith.subf %1, %15 : vector<24x128xf32>
    %cst_9 = arith.constant 9.99999974E-6 : f32
    %17 = vector.broadcast %cst_9 : f32 to vector<24x1xf32>
    %18 = arith.addf %14, %17 : vector<24x1xf32>
    %19 = math.rsqrt %18 : vector<24x1xf32>
    %20 = vector.broadcast %19 : vector<24x1xf32> to vector<24x128xf32>
    %21 = arith.mulf %16, %20 : vector<24x128xf32>
    %22 = vector.broadcast %2 : vector<1x128xf32> to vector<24x128xf32>
    %23 = arith.mulf %21, %22 : vector<24x128xf32>
    %24 = vector.broadcast %3 : vector<1x128xf32> to vector<24x128xf32>
    %25 = arith.addf %23, %24 : vector<24x128xf32>
    %26 = arith.truncf %25 : vector<24x128xf32> to vector<24x128xbf16>
    %c0_10 = arith.constant 0 : index
    %c0_11 = arith.constant 0 : index
    %27 = vector.load %arg4[%c0_10, %c0_11] : memref<128x1536xbf16, #tpu.memory_space<vmem>>, vector<128x1536xbf16>
    %cst_12 = arith.constant dense<0.000000e+00> : vector<24x1536xf32>
    %28 = tpu.matmul %26, %27, %cst_12 {dimension_numbers = #tpu.dot_dimension_numbers<[1], [0], [0], [1], [0, 0, 1, 1], [], []>} : vector<24x128xbf16>, vector<128x1536xbf16>, vector<24x1536xf32> -> vector<24x1536xf32>
    %c0_13 = arith.constant 0 : index
    %c0_14 = arith.constant 0 : index
    %29 = vector.load %arg5[%c0_13, %c0_14] : memref<1x1536xf32, #tpu.memory_space<vmem>>, vector<1x1536xf32>
    %30 = vector.broadcast %29 : vector<1x1536xf32> to vector<24x1536xf32>
    %31 = arith.addf %28, %30 : vector<24x1536xf32>
    %32 = tpu.iota {dimensions = array<i32: 1>} : vector<1x24xi32>
    %c17_i32 = arith.constant 17 : i32
    %33 = vector.broadcast %c17_i32 : i32 to vector<1x24xi32>
    %34 = arith.cmpi slt, %32, %33 : vector<1x24xi32>
    %cst_15 = arith.constant 0.000000e+00 : f32
    %35 = vector.broadcast %cst_15 : f32 to vector<24x128xf32>
    %36 = vector.extract_strided_slice %31 {offsets = [0, 0], sizes = [24, 128], strides = [1, 1]} : vector<24x1536xf32> to vector<24x128xf32>
    %37 = vector.extract_strided_slice %31 {offsets = [0, 512], sizes = [24, 128], strides = [1, 1]} : vector<24x1536xf32> to vector<24x128xf32>
    %38 = vector.extract_strided_slice %31 {offsets = [0, 1024], sizes = [24, 128], strides = [1, 1]} : vector<24x1536xf32> to vector<24x128xf32>
    %39 = arith.truncf %36 : vector<24x128xf32> to vector<24x128xbf16>
    %40 = arith.truncf %37 : vector<24x128xf32> to vector<24x128xbf16>
    %cst_16 = arith.constant dense<0.000000e+00> : vector<24x24xf32>
    %41 = tpu.matmul %39, %40, %cst_16 {dimension_numbers = #tpu.dot_dimension_numbers<[1], [1], [0], [0], [0, 0, 1, 0], [], []>} : vector<24x128xbf16>, vector<24x128xbf16>, vector<24x24xf32> -> vector<24x24xf32>
    %cst_17 = arith.constant -1.000000e+30 : f32
    %42 = vector.shape_cast %34 : vector<1x24xi1> to vector<1x24xi1>
    %43 = vector.broadcast %42 : vector<1x24xi1> to vector<24x24xi1>
    %44 = vector.broadcast %cst_17 : f32 to vector<24x24xf32>
    %45 = arith.select %43, %41, %44 : vector<24x24xi1>, vector<24x24xf32>
    %cst_18 = arith.constant dense<0xFF800000> : vector<24xf32>
    %46 = vector.multi_reduction <maximumf>, %45, %cst_18 [1] : vector<24x24xf32> to vector<24xf32>
    %47 = vector.shape_cast %46 : vector<24xf32> to vector<24x1xf32>
    %48 = vector.broadcast %47 : vector<24x1xf32> to vector<24x24xf32>
    %49 = arith.subf %45, %48 : vector<24x24xf32>
    %50 = math.exp %49 : vector<24x24xf32>
    %cst_19 = arith.constant dense<0.000000e+00> : vector<24xf32>
    %51 = vector.multi_reduction <add>, %50, %cst_19 [1] : vector<24x24xf32> to vector<24xf32>
    %52 = vector.shape_cast %51 : vector<24xf32> to vector<24x1xf32>
    %53 = tpu.reciprocal %52 {approx = true} : vector<24x1xf32> -> vector<24x1xf32>
    %54 = vector.broadcast %53 : vector<24x1xf32> to vector<24x24xf32>
    %55 = arith.mulf %50, %54 : vector<24x24xf32>
    %56 = arith.truncf %55 : vector<24x24xf32> to vector<24x24xbf16>
    %57 = arith.truncf %38 : vector<24x128xf32> to vector<24x128xbf16>
    %cst_20 = arith.constant dense<0.000000e+00> : vector<24x128xf32>
    %58 = tpu.matmul %56, %57, %cst_20 {dimension_numbers = #tpu.dot_dimension_numbers<[1], [0], [0], [1], [0, 0, 1, 1], [], []>} : vector<24x24xbf16>, vector<24x128xbf16>, vector<24x128xf32> -> vector<24x128xf32>
    %59 = arith.truncf %58 : vector<24x128xf32> to vector<24x128xbf16>
    %c0_21 = arith.constant 0 : index
    %c0_22 = arith.constant 0 : index
    %60 = vector.load %arg6[%c0_21, %c0_22] : memref<512x128xbf16, #tpu.memory_space<vmem>>, vector<128x128xbf16>
    %cst_23 = arith.constant dense<0.000000e+00> : vector<24x128xf32>
    %61 = tpu.matmul %59, %60, %cst_23 {dimension_numbers = #tpu.dot_dimension_numbers<[1], [0], [0], [1], [0, 0, 1, 1], [], []>} : vector<24x128xbf16>, vector<128x128xbf16>, vector<24x128xf32> -> vector<24x128xf32>
    %62 = arith.addf %35, %61 : vector<24x128xf32>
    %63 = vector.extract_strided_slice %31 {offsets = [0, 128], sizes = [24, 128], strides = [1, 1]} : vector<24x1536xf32> to vector<24x128xf32>
    %64 = vector.extract_strided_slice %31 {offsets = [0, 640], sizes = [24, 128], strides = [1, 1]} : vector<24x1536xf32> to vector<24x128xf32>
    %65 = vector.extract_strided_slice %31 {offsets = [0, 1152], sizes = [24, 128], strides = [1, 1]} : vector<24x1536xf32> to vector<24x128xf32>
    %66 = arith.truncf %63 : vector<24x128xf32> to vector<24x128xbf16>
    %67 = arith.truncf %64 : vector<24x128xf32> to vector<24x128xbf16>
    %cst_24 = arith.constant dense<0.000000e+00> : vector<24x24xf32>
    %68 = tpu.matmul %66, %67, %cst_24 {dimension_numbers = #tpu.dot_dimension_numbers<[1], [1], [0], [0], [0, 0, 1, 0], [], []>} : vector<24x128xbf16>, vector<24x128xbf16>, vector<24x24xf32> -> vector<24x24xf32>
    %cst_25 = arith.constant -1.000000e+30 : f32
    %69 = vector.shape_cast %34 : vector<1x24xi1> to vector<1x24xi1>
    %70 = vector.broadcast %69 : vector<1x24xi1> to vector<24x24xi1>
    %71 = vector.broadcast %cst_25 : f32 to vector<24x24xf32>
    %72 = arith.select %70, %68, %71 : vector<24x24xi1>, vector<24x24xf32>
    %cst_26 = arith.constant dense<0xFF800000> : vector<24xf32>
    %73 = vector.multi_reduction <maximumf>, %72, %cst_26 [1] : vector<24x24xf32> to vector<24xf32>
    %74 = vector.shape_cast %73 : vector<24xf32> to vector<24x1xf32>
    %75 = vector.broadcast %74 : vector<24x1xf32> to vector<24x24xf32>
    %76 = arith.subf %72, %75 : vector<24x24xf32>
    %77 = math.exp %76 : vector<24x24xf32>
    %cst_27 = arith.constant dense<0.000000e+00> : vector<24xf32>
    %78 = vector.multi_reduction <add>, %77, %cst_27 [1] : vector<24x24xf32> to vector<24xf32>
    %79 = vector.shape_cast %78 : vector<24xf32> to vector<24x1xf32>
    %80 = tpu.reciprocal %79 {approx = true} : vector<24x1xf32> -> vector<24x1xf32>
    %81 = vector.broadcast %80 : vector<24x1xf32> to vector<24x24xf32>
    %82 = arith.mulf %77, %81 : vector<24x24xf32>
    %83 = arith.truncf %82 : vector<24x24xf32> to vector<24x24xbf16>
    %84 = arith.truncf %65 : vector<24x128xf32> to vector<24x128xbf16>
    %cst_28 = arith.constant dense<0.000000e+00> : vector<24x128xf32>
    %85 = tpu.matmul %83, %84, %cst_28 {dimension_numbers = #tpu.dot_dimension_numbers<[1], [0], [0], [1], [0, 0, 1, 1], [], []>} : vector<24x24xbf16>, vector<24x128xbf16>, vector<24x128xf32> -> vector<24x128xf32>
    %86 = arith.truncf %85 : vector<24x128xf32> to vector<24x128xbf16>
    %c128 = arith.constant 128 : index
    %c0_29 = arith.constant 0 : index
    %87 = vector.load %arg6[%c128, %c0_29] : memref<512x128xbf16, #tpu.memory_space<vmem>>, vector<128x128xbf16>
    %cst_30 = arith.constant dense<0.000000e+00> : vector<24x128xf32>
    %88 = tpu.matmul %86, %87, %cst_30 {dimension_numbers = #tpu.dot_dimension_numbers<[1], [0], [0], [1], [0, 0, 1, 1], [], []>} : vector<24x128xbf16>, vector<128x128xbf16>, vector<24x128xf32> -> vector<24x128xf32>
    %89 = arith.addf %62, %88 : vector<24x128xf32>
    %90 = vector.extract_strided_slice %31 {offsets = [0, 256], sizes = [24, 128], strides = [1, 1]} : vector<24x1536xf32> to vector<24x128xf32>
    %91 = vector.extract_strided_slice %31 {offsets = [0, 768], sizes = [24, 128], strides = [1, 1]} : vector<24x1536xf32> to vector<24x128xf32>
    %92 = vector.extract_strided_slice %31 {offsets = [0, 1280], sizes = [24, 128], strides = [1, 1]} : vector<24x1536xf32> to vector<24x128xf32>
    %93 = arith.truncf %90 : vector<24x128xf32> to vector<24x128xbf16>
    %94 = arith.truncf %91 : vector<24x128xf32> to vector<24x128xbf16>
    %cst_31 = arith.constant dense<0.000000e+00> : vector<24x24xf32>
    %95 = tpu.matmul %93, %94, %cst_31 {dimension_numbers = #tpu.dot_dimension_numbers<[1], [1], [0], [0], [0, 0, 1, 0], [], []>} : vector<24x128xbf16>, vector<24x128xbf16>, vector<24x24xf32> -> vector<24x24xf32>
    %cst_32 = arith.constant -1.000000e+30 : f32
    %96 = vector.shape_cast %34 : vector<1x24xi1> to vector<1x24xi1>
    %97 = vector.broadcast %96 : vector<1x24xi1> to vector<24x24xi1>
    %98 = vector.broadcast %cst_32 : f32 to vector<24x24xf32>
    %99 = arith.select %97, %95, %98 : vector<24x24xi1>, vector<24x24xf32>
    %cst_33 = arith.constant dense<0xFF800000> : vector<24xf32>
    %100 = vector.multi_reduction <maximumf>, %99, %cst_33 [1] : vector<24x24xf32> to vector<24xf32>
    %101 = vector.shape_cast %100 : vector<24xf32> to vector<24x1xf32>
    %102 = vector.broadcast %101 : vector<24x1xf32> to vector<24x24xf32>
    %103 = arith.subf %99, %102 : vector<24x24xf32>
    %104 = math.exp %103 : vector<24x24xf32>
    %cst_34 = arith.constant dense<0.000000e+00> : vector<24xf32>
    %105 = vector.multi_reduction <add>, %104, %cst_34 [1] : vector<24x24xf32> to vector<24xf32>
    %106 = vector.shape_cast %105 : vector<24xf32> to vector<24x1xf32>
    %107 = tpu.reciprocal %106 {approx = true} : vector<24x1xf32> -> vector<24x1xf32>
    %108 = vector.broadcast %107 : vector<24x1xf32> to vector<24x24xf32>
    %109 = arith.mulf %104, %108 : vector<24x24xf32>
    %110 = arith.truncf %109 : vector<24x24xf32> to vector<24x24xbf16>
    %111 = arith.truncf %92 : vector<24x128xf32> to vector<24x128xbf16>
    %cst_35 = arith.constant dense<0.000000e+00> : vector<24x128xf32>
    %112 = tpu.matmul %110, %111, %cst_35 {dimension_numbers = #tpu.dot_dimension_numbers<[1], [0], [0], [1], [0, 0, 1, 1], [], []>} : vector<24x24xbf16>, vector<24x128xbf16>, vector<24x128xf32> -> vector<24x128xf32>
    %113 = arith.truncf %112 : vector<24x128xf32> to vector<24x128xbf16>
    %c256 = arith.constant 256 : index
    %c0_36 = arith.constant 0 : index
    %114 = vector.load %arg6[%c256, %c0_36] : memref<512x128xbf16, #tpu.memory_space<vmem>>, vector<128x128xbf16>
    %cst_37 = arith.constant dense<0.000000e+00> : vector<24x128xf32>
    %115 = tpu.matmul %113, %114, %cst_37 {dimension_numbers = #tpu.dot_dimension_numbers<[1], [0], [0], [1], [0, 0, 1, 1], [], []>} : vector<24x128xbf16>, vector<128x128xbf16>, vector<24x128xf32> -> vector<24x128xf32>
    %116 = arith.addf %89, %115 : vector<24x128xf32>
    %117 = vector.extract_strided_slice %31 {offsets = [0, 384], sizes = [24, 128], strides = [1, 1]} : vector<24x1536xf32> to vector<24x128xf32>
    %118 = vector.extract_strided_slice %31 {offsets = [0, 896], sizes = [24, 128], strides = [1, 1]} : vector<24x1536xf32> to vector<24x128xf32>
    %119 = vector.extract_strided_slice %31 {offsets = [0, 1408], sizes = [24, 128], strides = [1, 1]} : vector<24x1536xf32> to vector<24x128xf32>
    %120 = arith.truncf %117 : vector<24x128xf32> to vector<24x128xbf16>
    %121 = arith.truncf %118 : vector<24x128xf32> to vector<24x128xbf16>
    %cst_38 = arith.constant dense<0.000000e+00> : vector<24x24xf32>
    %122 = tpu.matmul %120, %121, %cst_38 {dimension_numbers = #tpu.dot_dimension_numbers<[1], [1], [0], [0], [0, 0, 1, 0], [], []>} : vector<24x128xbf16>, vector<24x128xbf16>, vector<24x24xf32> -> vector<24x24xf32>
    %cst_39 = arith.constant -1.000000e+30 : f32
    %123 = vector.shape_cast %34 : vector<1x24xi1> to vector<1x24xi1>
    %124 = vector.broadcast %123 : vector<1x24xi1> to vector<24x24xi1>
    %125 = vector.broadcast %cst_39 : f32 to vector<24x24xf32>
    %126 = arith.select %124, %122, %125 : vector<24x24xi1>, vector<24x24xf32>
    %cst_40 = arith.constant dense<0xFF800000> : vector<24xf32>
    %127 = vector.multi_reduction <maximumf>, %126, %cst_40 [1] : vector<24x24xf32> to vector<24xf32>
    %128 = vector.shape_cast %127 : vector<24xf32> to vector<24x1xf32>
    %129 = vector.broadcast %128 : vector<24x1xf32> to vector<24x24xf32>
    %130 = arith.subf %126, %129 : vector<24x24xf32>
    %131 = math.exp %130 : vector<24x24xf32>
    %cst_41 = arith.constant dense<0.000000e+00> : vector<24xf32>
    %132 = vector.multi_reduction <add>, %131, %cst_41 [1] : vector<24x24xf32> to vector<24xf32>
    %133 = vector.shape_cast %132 : vector<24xf32> to vector<24x1xf32>
    %134 = tpu.reciprocal %133 {approx = true} : vector<24x1xf32> -> vector<24x1xf32>
    %135 = vector.broadcast %134 : vector<24x1xf32> to vector<24x24xf32>
    %136 = arith.mulf %131, %135 : vector<24x24xf32>
    %137 = arith.truncf %136 : vector<24x24xf32> to vector<24x24xbf16>
    %138 = arith.truncf %119 : vector<24x128xf32> to vector<24x128xbf16>
    %cst_42 = arith.constant dense<0.000000e+00> : vector<24x128xf32>
    %139 = tpu.matmul %137, %138, %cst_42 {dimension_numbers = #tpu.dot_dimension_numbers<[1], [0], [0], [1], [0, 0, 1, 1], [], []>} : vector<24x24xbf16>, vector<24x128xbf16>, vector<24x128xf32> -> vector<24x128xf32>
    %140 = arith.truncf %139 : vector<24x128xf32> to vector<24x128xbf16>
    %c384 = arith.constant 384 : index
    %c0_43 = arith.constant 0 : index
    %141 = vector.load %arg6[%c384, %c0_43] : memref<512x128xbf16, #tpu.memory_space<vmem>>, vector<128x128xbf16>
    %cst_44 = arith.constant dense<0.000000e+00> : vector<24x128xf32>
    %142 = tpu.matmul %140, %141, %cst_44 {dimension_numbers = #tpu.dot_dimension_numbers<[1], [0], [0], [1], [0, 0, 1, 1], [], []>} : vector<24x128xbf16>, vector<128x128xbf16>, vector<24x128xf32> -> vector<24x128xf32>
    %143 = arith.addf %116, %142 : vector<24x128xf32>
    %144 = arith.addf %1, %143 : vector<24x128xf32>
    %c0_45 = arith.constant 0 : index
    %c0_46 = arith.constant 0 : index
    %145 = vector.load %arg7[%c0_45, %c0_46] : memref<1x128xf32, #tpu.memory_space<vmem>>, vector<1x128xf32>
    %146 = vector.broadcast %145 : vector<1x128xf32> to vector<24x128xf32>
    %147 = arith.addf %144, %146 : vector<24x128xf32>
    %c0_47 = arith.constant 0 : index
    %c0_48 = arith.constant 0 : index
    %148 = vector.load %arg8[%c0_47, %c0_48] : memref<1x128xf32, #tpu.memory_space<vmem>>, vector<1x128xf32>
    %c0_49 = arith.constant 0 : index
    %c0_50 = arith.constant 0 : index
    %149 = vector.load %arg9[%c0_49, %c0_50] : memref<1x128xf32, #tpu.memory_space<vmem>>, vector<1x128xf32>
    %cst_51 = arith.constant dense<0.000000e+00> : vector<24xf32>
    %150 = vector.multi_reduction <add>, %147, %cst_51 [1] : vector<24x128xf32> to vector<24xf32>
    %151 = vector.shape_cast %150 : vector<24xf32> to vector<24x1xf32>
    %cst_52 = arith.constant 3.125000e-02 : f32
    %152 = vector.broadcast %cst_52 : f32 to vector<24x1xf32>
    %153 = arith.mulf %151, %152 : vector<24x1xf32>
    %154 = arith.mulf %147, %147 : vector<24x128xf32>
    %cst_53 = arith.constant dense<0.000000e+00> : vector<24xf32>
    %155 = vector.multi_reduction <add>, %154, %cst_53 [1] : vector<24x128xf32> to vector<24xf32>
    %156 = vector.shape_cast %155 : vector<24xf32> to vector<24x1xf32>
    %cst_54 = arith.constant 3.125000e-02 : f32
    %157 = vector.broadcast %cst_54 : f32 to vector<24x1xf32>
    %158 = arith.mulf %156, %157 : vector<24x1xf32>
    %159 = arith.mulf %153, %153 : vector<24x1xf32>
    %160 = arith.subf %158, %159 : vector<24x1xf32>
    %161 = vector.broadcast %153 : vector<24x1xf32> to vector<24x128xf32>
    %162 = arith.subf %147, %161 : vector<24x128xf32>
    %cst_55 = arith.constant 9.99999974E-6 : f32
    %163 = vector.broadcast %cst_55 : f32 to vector<24x1xf32>
    %164 = arith.addf %160, %163 : vector<24x1xf32>
    %165 = math.rsqrt %164 : vector<24x1xf32>
    %166 = vector.broadcast %165 : vector<24x1xf32> to vector<24x128xf32>
    %167 = arith.mulf %162, %166 : vector<24x128xf32>
    %168 = vector.broadcast %148 : vector<1x128xf32> to vector<24x128xf32>
    %169 = arith.mulf %167, %168 : vector<24x128xf32>
    %170 = vector.broadcast %149 : vector<1x128xf32> to vector<24x128xf32>
    %171 = arith.addf %169, %170 : vector<24x128xf32>
    %172 = arith.truncf %171 : vector<24x128xf32> to vector<24x128xbf16>
    %c0_56 = arith.constant 0 : index
    %c0_57 = arith.constant 0 : index
    %173 = vector.load %arg10[%c0_56, %c0_57] : memref<128x128xbf16, #tpu.memory_space<vmem>>, vector<128x128xbf16>
    %cst_58 = arith.constant dense<0.000000e+00> : vector<24x128xf32>
    %174 = tpu.matmul %172, %173, %cst_58 {dimension_numbers = #tpu.dot_dimension_numbers<[1], [0], [0], [1], [0, 0, 1, 1], [], []>} : vector<24x128xbf16>, vector<128x128xbf16>, vector<24x128xf32> -> vector<24x128xf32>
    %c0_59 = arith.constant 0 : index
    %c0_60 = arith.constant 0 : index
    %175 = vector.load %arg11[%c0_59, %c0_60] : memref<1x128xf32, #tpu.memory_space<vmem>>, vector<1x128xf32>
    %176 = vector.broadcast %175 : vector<1x128xf32> to vector<24x128xf32>
    %177 = arith.addf %174, %176 : vector<24x128xf32>
    %178 = arith.mulf %177, %177 : vector<24x128xf32>
    %179 = arith.mulf %177, %178 : vector<24x128xf32>
    %cst_61 = arith.constant 4.471500e-02 : f32
    %180 = vector.broadcast %cst_61 : f32 to vector<24x128xf32>
    %181 = arith.mulf %180, %179 : vector<24x128xf32>
    %182 = arith.addf %177, %181 : vector<24x128xf32>
    %cst_62 = arith.constant 0.797884583 : f32
    %183 = vector.broadcast %cst_62 : f32 to vector<24x128xf32>
    %184 = arith.mulf %183, %182 : vector<24x128xf32>
    %185 = math.tanh %184 : vector<24x128xf32>
    %cst_63 = arith.constant 1.000000e+00 : f32
    %186 = vector.broadcast %cst_63 : f32 to vector<24x128xf32>
    %187 = arith.addf %186, %185 : vector<24x128xf32>
    %cst_64 = arith.constant 5.000000e-01 : f32
    %188 = vector.broadcast %cst_64 : f32 to vector<24x128xf32>
    %189 = arith.mulf %188, %187 : vector<24x128xf32>
    %190 = arith.mulf %177, %189 : vector<24x128xf32>
    %191 = arith.truncf %190 : vector<24x128xf32> to vector<24x128xbf16>
    %c0_65 = arith.constant 0 : index
    %c0_66 = arith.constant 0 : index
    %192 = vector.load %arg12[%c0_65, %c0_66] : memref<128x128xbf16, #tpu.memory_space<vmem>>, vector<128x128xbf16>
    %cst_67 = arith.constant dense<0.000000e+00> : vector<24x128xf32>
    %193 = tpu.matmul %191, %192, %cst_67 {dimension_numbers = #tpu.dot_dimension_numbers<[1], [0], [0], [1], [0, 0, 1, 1], [], []>} : vector<24x128xbf16>, vector<128x128xbf16>, vector<24x128xf32> -> vector<24x128xf32>
    %c0_68 = arith.constant 0 : index
    %c0_69 = arith.constant 0 : index
    %194 = vector.load %arg13[%c0_68, %c0_69] : memref<1x128xf32, #tpu.memory_space<vmem>>, vector<1x128xf32>
    %195 = vector.broadcast %194 : vector<1x128xf32> to vector<24x128xf32>
    %196 = arith.addf %193, %195 : vector<24x128xf32>
    %197 = arith.addf %147, %196 : vector<24x128xf32>
    %c0_70 = arith.constant 0 : index
    %c0_71 = arith.constant 0 : index
    %c0_72 = arith.constant 0 : index
    %198 = vector.load %arg14[%c0_70, %c0_71, %c0_72] : memref<1x24x128xf32, #tpu.memory_space<vmem>>, vector<1x24x128xf32>
    %199 = vector.shape_cast %198 : vector<1x24x128xf32> to vector<24x128xf32>
    %200 = vector.shape_cast %197 : vector<24x128xf32> to vector<1x24x128xf32>
    tpu.vector_store %arg14[%c0_70, %c0_71, %c0_72], %200 {strides = array<i32>} : memref<1x24x128xf32, #tpu.memory_space<vmem>>, vector<1x24x128xf32>,
    return
  }
  func.func @transform_0(%arg0: i32) -> (i32, i32, i32) {
    %c0_i32 = arith.constant 0 : i32
    %c0_i32_0 = arith.constant 0 : i32
    %c0_i32_1 = arith.constant 0 : i32
    return %arg0, %c0_i32, %c0_i32_0 : i32, i32, i32
  }
  func.func @transform_1(%arg0: i32) -> (i32, i32) {
    %c0_i32 = arith.constant 0 : i32
    %c0_i32_0 = arith.constant 0 : i32
    %c0_i32_1 = arith.constant 0 : i32
    return %c0_i32, %c0_i32_0 : i32, i32
  }
  func.func @transform_2(%arg0: i32) -> (i32, i32) {
    %c0_i32 = arith.constant 0 : i32
    %c0_i32_0 = arith.constant 0 : i32
    %c0_i32_1 = arith.constant 0 : i32
    return %c0_i32, %c0_i32_0 : i32, i32
  }
  func.func @transform_3(%arg0: i32) -> (i32, i32) {
    %c0_i32 = arith.constant 0 : i32
    %c0_i32_0 = arith.constant 0 : i32
    %c0_i32_1 = arith.constant 0 : i32
    return %c0_i32, %c0_i32_0 : i32, i32
  }
  func.func @transform_4(%arg0: i32) -> (i32, i32) {
    %c0_i32 = arith.constant 0 : i32
    %c0_i32_0 = arith.constant 0 : i32
    %c0_i32_1 = arith.constant 0 : i32
    return %c0_i32, %c0_i32_0 : i32, i32
  }
  func.func @transform_5(%arg0: i32) -> (i32, i32) {
    %c0_i32 = arith.constant 0 : i32
    %c0_i32_0 = arith.constant 0 : i32
    %c0_i32_1 = arith.constant 0 : i32
    return %c0_i32, %c0_i32_0 : i32, i32
  }
  func.func @transform_6(%arg0: i32) -> (i32, i32) {
    %c0_i32 = arith.constant 0 : i32
    %c0_i32_0 = arith.constant 0 : i32
    %c0_i32_1 = arith.constant 0 : i32
    return %c0_i32, %c0_i32_0 : i32, i32
  }
  func.func @transform_7(%arg0: i32) -> (i32, i32) {
    %c0_i32 = arith.constant 0 : i32
    %c0_i32_0 = arith.constant 0 : i32
    %c0_i32_1 = arith.constant 0 : i32
    return %c0_i32, %c0_i32_0 : i32, i32
  }
  func.func @transform_8(%arg0: i32) -> (i32, i32) {
    %c0_i32 = arith.constant 0 : i32
    %c0_i32_0 = arith.constant 0 : i32
    %c0_i32_1 = arith.constant 0 : i32
    return %c0_i32, %c0_i32_0 : i32, i32
  }
  func.func @transform_9(%arg0: i32) -> (i32, i32) {
    %c0_i32 = arith.constant 0 : i32
    %c0_i32_0 = arith.constant 0 : i32
    %c0_i32_1 = arith.constant 0 : i32
    return %c0_i32, %c0_i32_0 : i32, i32
  }
  func.func @transform_10(%arg0: i32) -> (i32, i32) {
    %c0_i32 = arith.constant 0 : i32
    %c0_i32_0 = arith.constant 0 : i32
    %c0_i32_1 = arith.constant 0 : i32
    return %c0_i32, %c0_i32_0 : i32, i32
  }
  func.func @transform_11(%arg0: i32) -> (i32, i32) {
    %c0_i32 = arith.constant 0 : i32
    %c0_i32_0 = arith.constant 0 : i32
    %c0_i32_1 = arith.constant 0 : i32
    return %c0_i32, %c0_i32_0 : i32, i32
  }
  func.func @transform_12(%arg0: i32) -> (i32, i32) {
    %c0_i32 = arith.constant 0 : i32
    %c0_i32_0 = arith.constant 0 : i32
    %c0_i32_1 = arith.constant 0 : i32
    return %c0_i32, %c0_i32_0 : i32, i32
  }
  func.func @transform_13(%arg0: i32) -> (i32, i32, i32) {
    %c0_i32 = arith.constant 0 : i32
    %c0_i32_0 = arith.constant 0 : i32
    %c0_i32_1 = arith.constant 0 : i32
    return %arg0, %c0_i32, %c0_i32_0 : i32, i32, i32
  }
}

module attributes {stable_mosaic.version = 11 : i64} {
  func.func @_matmul_bias_kernel(%arg0: i32, %arg1: i32, %arg2: i32, %arg3: memref<8x128xbf16, #tpu.memory_space<vmem>>, %arg4: memref<128x128xbf16, #tpu.memory_space<vmem>>, %arg5: memref<1x128xf32, #tpu.memory_space<vmem>>, %arg6: memref<8x128xf32, #tpu.memory_space<vmem>>, %arg7: memref<8x128xf32, #tpu.memory_space<vmem>>) attributes {dimension_semantics = [#tpu.dimension_semantics<parallel>, #tpu.dimension_semantics<parallel>, #tpu.dimension_semantics<arbitrary>], iteration_bounds = array<i64: 1, 1, 1>, scalar_prefetch = 0 : i64, scratch_operands = 1 : i64, tpu.core_type = #tpu.core_type<tc>, window_params = [{transform_indices = @transform_0, window_bounds = array<i64: 8, 128>}, {transform_indices = @transform_1, window_bounds = array<i64: 128, 128>}, {transform_indices = @transform_2, window_bounds = array<i64: 1, 128>}, {transform_indices = @transform_3, window_bounds = array<i64: 8, 128>}]} {
    %c0_i32 = arith.constant 0 : i32
    %0 = arith.cmpi eq, %arg2, %c0_i32 : i32
    %1 = arith.extui %0 : i1 to i32
    %c0_i32_0 = arith.constant 0 : i32
    %2 = arith.cmpi ne, %1, %c0_i32_0 : i32
    scf.if %2 {
      %cst_10 = arith.constant 0.000000e+00 : f32
      %12 = vector.broadcast %cst_10 : f32 to vector<8x128xf32>
      %c0_11 = arith.constant 0 : index
      %c0_12 = arith.constant 0 : index
      %13 = vector.load %arg7[%c0_11, %c0_12] : memref<8x128xf32, #tpu.memory_space<vmem>>, vector<8x128xf32>
      tpu.vector_store %arg7[%c0_11, %c0_12], %12 {strides = array<i32>} : memref<8x128xf32, #tpu.memory_space<vmem>>, vector<8x128xf32>,
    } else {
    }
    %c0 = arith.constant 0 : index
    %c0_1 = arith.constant 0 : index
    %3 = vector.load %arg7[%c0, %c0_1] : memref<8x128xf32, #tpu.memory_space<vmem>>, vector<8x128xf32>
    %c0_2 = arith.constant 0 : index
    %c0_3 = arith.constant 0 : index
    %4 = vector.load %arg3[%c0_2, %c0_3] : memref<8x128xbf16, #tpu.memory_space<vmem>>, vector<8x128xbf16>
    %c0_4 = arith.constant 0 : index
    %c0_5 = arith.constant 0 : index
    %5 = vector.load %arg4[%c0_4, %c0_5] : memref<128x128xbf16, #tpu.memory_space<vmem>>, vector<128x128xbf16>
    %cst = arith.constant dense<0.000000e+00> : vector<8x128xf32>
    %6 = tpu.matmul %4, %5, %cst {dimension_numbers = #tpu.dot_dimension_numbers<[1], [0], [0], [1], [0, 0, 1, 1], [], []>} : vector<8x128xbf16>, vector<128x128xbf16>, vector<8x128xf32> -> vector<8x128xf32>
    %7 = arith.addf %3, %6 : vector<8x128xf32>
    %c0_6 = arith.constant 0 : index
    %c0_7 = arith.constant 0 : index
    %8 = vector.load %arg7[%c0_6, %c0_7] : memref<8x128xf32, #tpu.memory_space<vmem>>, vector<8x128xf32>
    tpu.vector_store %arg7[%c0_6, %c0_7], %7 {strides = array<i32>} : memref<8x128xf32, #tpu.memory_space<vmem>>, vector<8x128xf32>,
    %c0_i32_8 = arith.constant 0 : i32
    %9 = arith.cmpi eq, %arg2, %c0_i32_8 : i32
    %10 = arith.extui %9 : i1 to i32
    %c0_i32_9 = arith.constant 0 : i32
    %11 = arith.cmpi ne, %10, %c0_i32_9 : i32
    scf.if %11 {
      %c0_10 = arith.constant 0 : index
      %c0_11 = arith.constant 0 : index
      %12 = vector.load %arg7[%c0_10, %c0_11] : memref<8x128xf32, #tpu.memory_space<vmem>>, vector<8x128xf32>
      %c0_12 = arith.constant 0 : index
      %c0_13 = arith.constant 0 : index
      %13 = vector.load %arg5[%c0_12, %c0_13] : memref<1x128xf32, #tpu.memory_space<vmem>>, vector<1x128xf32>
      %14 = vector.broadcast %13 : vector<1x128xf32> to vector<8x128xf32>
      %15 = arith.addf %12, %14 : vector<8x128xf32>
      %c0_14 = arith.constant 0 : index
      %c0_15 = arith.constant 0 : index
      %16 = vector.load %arg6[%c0_14, %c0_15] : memref<8x128xf32, #tpu.memory_space<vmem>>, vector<8x128xf32>
      tpu.vector_store %arg6[%c0_14, %c0_15], %15 {strides = array<i32>} : memref<8x128xf32, #tpu.memory_space<vmem>>, vector<8x128xf32>,
    } else {
    }
    return
  }
  func.func @transform_0(%arg0: i32, %arg1: i32, %arg2: i32) -> (i32, i32) {
    %c0_i32 = arith.constant 0 : i32
    return %arg0, %arg2 : i32, i32
  }
  func.func @transform_1(%arg0: i32, %arg1: i32, %arg2: i32) -> (i32, i32) {
    %c0_i32 = arith.constant 0 : i32
    return %arg2, %arg1 : i32, i32
  }
  func.func @transform_2(%arg0: i32, %arg1: i32, %arg2: i32) -> (i32, i32) {
    %c0_i32 = arith.constant 0 : i32
    %c0_i32_0 = arith.constant 0 : i32
    return %c0_i32, %arg1 : i32, i32
  }
  func.func @transform_3(%arg0: i32, %arg1: i32, %arg2: i32) -> (i32, i32) {
    %c0_i32 = arith.constant 0 : i32
    return %arg0, %arg1 : i32, i32
  }
}

</mosaic_0001>

<bundles_post_ra>
// kernel: _lambda_.4
= control target key start
LH: loop header
LB: loop body
LE: loop exit
PB: predicated region body
PF: predicated region fallthrough
CT: control target
= control target key end

     0   :  { %s280_s1 = inlined_call_operand.vmem [shape: bf16[128,128], index: 1, kind: input, shape index: {}]   ;;  %s281_s2 = inlined_call_operand.vmem [shape: f32[1,128], index: 2, kind: input, shape index: {}]   ;;  %s282_s0 = inlined_call_operand.vmem [shape: bf16[32,128], index: 0, kind: input, shape index: {}]   ;;  %s283_s3 = inlined_call_operand.vmem [shape: f32[32,128], index: 3, kind: output, shape index: {}]  }
   0x1   :  { %v205_v0 = vld [vmem:[%s280_s1 + $0x38] sm:$0xff]  ;;  %v204_v1 = vld [vmem:[%s280_s1 + $0x30] sm:$0xff]  ;;  %v203_v2 = vld [vmem:[%s280_s1 + $0x28] sm:$0xff] }
   0x2   :  { %106 = vmatpush.bf16.msra.mxu0 %v205_v0  ;;  %206 = vmatpush.bf16.msra.mxu1 %v205_v0  ;;  %v202_v3 = vld [vmem:[%s280_s1 + $0x20] sm:$0xff]  ;;  %v201_v4 = vld [vmem:[%s280_s1 + $0x18] sm:$0xff]  ;;  %v200_v5 = vld [vmem:[%s280_s1 + $0x10] sm:$0xff] }
   0x3   :  { %v199_v6 = vld [vmem:[%s280_s1 + $0x8] sm:$0xff]  ;;  %v198_v7 = vld [vmem:[%s280_s1] sm:$0xff] }
   0x4   :  { %v196_v8 = vld [vmem:[%s282_s0] sm:$0xff]  ;;  %v197_v9 = vld [vmem:[%s282_s0 + $0x8] sm:$0xff] }
   0x5   :  { %v214_v10 = vld [vmem:[%s281_s2] ss:$0 sm:$0xff] }
   0x6   :  { %107 = vmatpush.bf16.msra.mxu0 %v204_v1  ;;  %207 = vmatpush.bf16.msra.mxu1 %v204_v1 }
   0xa   :  { %108 = vmatpush.bf16.msra.mxu0 %v203_v2  ;;  %208 = vmatpush.bf16.msra.mxu1 %v203_v2 }
   0xe   :  { %109 = vmatpush.bf16.msra.mxu0 %v202_v3  ;;  %209 = vmatpush.bf16.msra.mxu1 %v202_v3 }
  0x12   :  { %110 = vmatpush.bf16.msra.mxu0 %v201_v4  ;;  %210 = vmatpush.bf16.msra.mxu1 %v201_v4 }
  0x16   :  { %111 = vmatpush.bf16.msra.mxu0 %v200_v5  ;;  %211 = vmatpush.bf16.msra.mxu1 %v200_v5 }
  0x1a   :  { %112 = vmatpush.bf16.msra.mxu0 %v199_v6  ;;  %212 = vmatpush.bf16.msra.mxu1 %v199_v6 }
  0x1e   :  { %113 = vmatpush.bf16.msra.mxu0 %v198_v7  ;;  %213 = vmatpush.bf16.msra.mxu1 %v198_v7 }
  0x21   :  { %114 = vmatmul.bf16.vlgmr.msra.gmra.mxu0 %v196_v8  ;;  %119 = vmatmul.bf16.vlgmr.msra.gmra.mxu1 %v197_v9 }
  0x9e   :  { %v115_v11 = vpop.f32.mrf.mxu0  ;;  %v120_v12 = vpop.f32.mrf.mxu1 }
  0x9f   :  { %v144_v13 = vadd.f32 %v214_v10, %v115_v11  ;;  %v146_v14 = vadd.f32 %v214_v10, %v120_v12 }
  0xa1   :  { %148 = vst [vmem:[%s283_s3] sm:$0xff] %v144_v13 }
  0xa2   :  { %150 = vst [vmem:[%s283_s3 + $0x10] sm:$0xff] %v146_v14 }
  0xa6   :  { %v117_v15 = vpop.f32.mrf.mxu0  ;;  %v122_v16 = vpop.f32.mrf.mxu1 }
  0xa7   :  { %v145_v17 = vadd.f32 %v214_v10, %v117_v15  ;;  %v147_v18 = vadd.f32 %v214_v10, %v122_v16 }
  0xa9   :  { %149 = vst [vmem:[%s283_s3 + $0x8] sm:$0xff] %v145_v17 }
  0xaa   :  { %151 = vst [vmem:[%s283_s3 + $0x18] sm:$0xff] %v147_v18 }

// kernel: _lambda_.7
= control target key start
LH: loop header
LB: loop body
LE: loop exit
PB: predicated region body
PF: predicated region fallthrough
CT: control target
= control target key end

     0   :  { %8 = vsyncpa [#allocation4], 0  ;;  %s201_s15 = smov [#allocation3]   ;;  %s202_s17 = smov 64   ;;  %s236_s0 = inlined_call_operand.vmem [shape: bf16[8,128], index: 0, kind: input, shape index: {}]   ;;  %s237_s1 = inlined_call_operand.hbm [shape: bf16[128,128], index: 1, kind: input, shape index: {}]   ;;  %s238_s2 = inlined_call_operand.vmem [shape: f32[1,128], index: 2, kind: input, shape index: {}]   ;;  %s239_s3 = inlined_call_operand.vmem [shape: f32[8,128], index: 3, kind: output, shape index: {}]  }
   0x1   :  { %s15_s14 = sshll.u32 %s237_s1, 4  ;;  %s17_s16 = sshll.u32 %s201_s15, 4  ;;  %s16_s14 = int_to_ptr.hbm [resolvable:$true] %s15_s14  ;;  %s18_s16 = int_to_ptr.vmem [resolvable:$true] %s17_s16 }
   0x2   :  { %s203_s18 = smov 4  }
   0x3   :  { %23 = dma.hbm_to_vmem [thread:$0]  %s16_s14, 1024, %s18_s16, [#allocation4], %s202_s17, %s202_s17, %s203_s18  }
   0x4   :  { %199 = dma.done.wait [#allocation4], 1024  }
   0x5   :  { %200 = vsyncadd [#allocation4], 4294966272  ;;  %v170_v0 = vld [vmem:[#allocation3 + $0x38] sm:$0xff]  ;;  %v169_v1 = vld [vmem:[#allocation3 + $0x30] sm:$0xff] }
   0x6   :  { %101 = vmatpush.bf16.msra.mxu0 %v170_v0  ;;  %v168_v2 = vld [vmem:[#allocation3 + $0x28] sm:$0xff]  ;;  %v167_v3 = vld [vmem:[#allocation3 + $0x20] sm:$0xff]  ;;  %v166_v4 = vld [vmem:[#allocation3 + $0x18] sm:$0xff] }
   0x7   :  { %v165_v5 = vld [vmem:[#allocation3 + $0x10] sm:$0xff]  ;;  %v164_v6 = vld [vmem:[#allocation3 + $0x8] sm:$0xff]  ;;  %v163_v7 = vld [vmem:[#allocation3] sm:$0xff] }
   0x8   :  { %v36_v8 = vld [vmem:[%s236_s0] sm:$0xf] }
   0x9   :  { %v174_v9 = vld [vmem:[%s238_s2] ss:$0 sm:$0xff] }
   0xa   :  { %102 = vmatpush.bf16.msra.mxu0 %v169_v1 }
   0xe   :  { %103 = vmatpush.bf16.msra.mxu0 %v168_v2 }
  0x12   :  { %104 = vmatpush.bf16.msra.mxu0 %v167_v3 }
  0x16   :  { %105 = vmatpush.bf16.msra.mxu0 %v166_v4 }
  0x1a   :  { %106 = vmatpush.bf16.msra.mxu0 %v165_v5 }
  0x1e   :  { %107 = vmatpush.bf16.msra.mxu0 %v164_v6 }
  0x22   :  { %108 = vmatpush.bf16.msra.mxu0 %v163_v7 }
  0x25   :  { %109 = vmatmul.bf16.vlgmr.msra.gmra.mxu0 %v36_v8 }
  0xa2   :  { %v110_v10 = vpop.f32.mrf.mxu0 }
  0xa3   :  { %v124_v11 = vadd.f32 %v174_v9, %v110_v10 }
  0xa5   :  { %125 = vst [vmem:[%s239_s3] sm:$0xff] %v124_v11 }
  0xaa   :  { %v112_v12 = vpop.f32.mrf.mxu0 }
  0xab   :  { %130 = vsyncpa [#allocation4], 1 }

// kernel: _lambda_.6
= control target key start
LH: loop header
LB: loop body
LE: loop exit
PB: predicated region body
PF: predicated region fallthrough
CT: control target
= control target key end

     0   :  { %s4001_s0 = inlined_call_operand.vmem [shape: f32[2,24,128], index: 0, kind: input, shape index: {}]   ;;  %s4002_s1 = inlined_call_operand.vmem [shape: f32[1,128], index: 1, kind: input, shape index: {}]   ;;  %s4003_s2 = inlined_call_operand.vmem [shape: f32[1,128], index: 2, kind: input, shape index: {}]   ;;  %s4004_s3 = inlined_call_operand.hbm [shape: bf16[128,1536], index: 3, kind: input, shape index: {}]   ;;  %s4005_s4 = inlined_call_operand.vmem [shape: f32[1,1536], index: 4, kind: input, shape index: {}]   ;;  %s4006_s5 = inlined_call_operand.hbm [shape: bf16[512,128], index: 5, kind: input, shape index: {}]   ;;  %s4007_s6 = inlined_call_operand.vmem [shape: f32[1,128], index: 6, kind: input, shape index: {}]   ;;  %s4008_s7 = inlined_call_operand.vmem [shape: f32[1,128], index: 7, kind: input, shape index: {}]   ;;  %s4009_s8 = inlined_call_operand.vmem [shape: f32[1,128], index: 8, kind: input, shape index: {}]   ;;  %s4010_s9 = inlined_call_operand.vmem [shape: bf16[128,128], index: 9, kind: input, shape index: {}]   ;;  %s4011_s10 = inlined_call_operand.vmem [shape: f32[1,128], index: 10, kind: input, shape index: {}]   ;;  %s4012_s11 = inlined_call_operand.hbm [shape: bf16[128,128], index: 11, kind: input, shape index: {}]   ;;  %s4013_s12 = inlined_call_operand.vmem [shape: f32[1,128], index: 12, kind: input, shape index: {}]   ;;  %s4014_s13 = inlined_call_operand.vmem [shape: f32[2,24,128], index: 13, kind: output, shape index: {}]  }
   0x1   :  { %4015 = sst [smem:[#allocation9_spill]] %s4004_s3 }
   0x2   :  { %18 = vsyncpa [#allocation3], 0 }
   0x3   :  { %19 = vsyncpa [#allocation5], 0  ;;  %s3549_s25 = smov 0  }
   0x4 LB: > { %s368_s28 = sshll.u32 %s4006_s5, 4  ;;  %s3558_s29 = sadd.s32 4294967295, %s3470_s25   ;;  %s3470_s25 = sphi %s3549_s25, %s25_s25   ;;  %s369_s28 = int_to_ptr.hbm [resolvable:$true] %s368_s28 }
   0x5   : > { %p2489_p0 = scmp.ge.s32.totalorder %s3470_s25, 1  ;;  %p334_p1 = scmp.lt.s32.totalorder %s3470_s25, 3 }
   0x6   : > { %p3269_p2 = scmp.eq.s32.totalorder %s3558_s29, 0  ;;  %s3472_s14 = smov [#allocation4]  }
   0x7   : > { %p3563_p3 = pnand %p2489_p0, %p334_p1  ;;  %s370_s15 = sshll.u32 %s3472_s14, 4  ;;  %s371_s15 = int_to_ptr.vmem [resolvable:$true] %s370_s15 }
   0x8   : > { %s4017_s3 = sld [smem:[#allocation9_spill]]  ;;  %s3473_s20 = smov [#allocation2]  }
   0x9   : > { %p3259_p4 = pneg %p3563_p3  ;;  %s353_s21 = sshll.u32 %s3473_s20, 4  ;;  %s354_s21 = int_to_ptr.vmem [resolvable:$true] %s353_s21 }
   0xa   : > { %s3474_s22 = smov 64   ;;  %s3475_s23 = smov 4  }
   0xb   : > { %p3574_p5 = pnand %p3269_p2, %p3259_p4  ;;  %s397_s27 = sshll.u32 %s4012_s11, 4  ;;  %s398_s27 = int_to_ptr.hbm [resolvable:$true] %s397_s27 }
   0xc   : > { %s3476_s14 = smov 768   ;;  %s3477_s16 = smov 48  }
   0xd   : > { %3265 = dma.hbm_to_vmem [thread:$0]  (!%p3574_p5), %s369_s28, 4096, %s371_s15, [#allocation5], %s3474_s22, %s3474_s22, %s3475_s23  }
   0xe   : > { %s351_s18 = sshll.u32 %s4017_s3, 4  ;;  %s3478_s17 = smov [#allocation6]   ;;  %s352_s18 = int_to_ptr.hbm [resolvable:$true] %s351_s18 }
   0xf   : > { %3262 = dma.hbm_to_vmem [thread:$0]  (!%p3574_p5), %s352_s18, 12288, %s354_s21, [#allocation3], %s3476_s14, %s3476_s14, %s3477_s16  }
  0x10   : > { %s399_s3 = sshll.u32 %s3478_s17, 4  ;;  %426 = sbr.rel (%p3563_p3) target bundleno = 2066 (0x812), region = 72  ;;  %s400_s3 = int_to_ptr.vmem [resolvable:$true] %s399_s3 }
  0x11   : > { %3268 = dma.hbm_to_vmem [thread:$0]  (!%p3574_p5), %s398_s27, 1024, %s400_s3, [#allocation5], %s3474_s22, %s3474_s22, %s3475_s23  }
  0x15   : > { %3461 = dma.done.wait (%p3269_p2), [#allocation3], 12288  }
  0x16   : > { %3463 = vsyncadd (%p3269_p2), [#allocation3], 4294955008 }
  0x17   : > { %3465 = dma.done.wait (%p3269_p2), [#allocation5], 5120  }
  0x18   : > { %3467 = vsyncadd (%p3269_p2), [#allocation5], 4294962176  ;;  %p481_p6 = scmp.lt.s32.totalorder %s3558_s29, 1  ;;  %v2838_v6 = vld [vmem:[#allocation2 + $0x2a0] sm:$0xf]  ;;  %vm1471_vm9 = vcmask 1043456  }
  0x19   : > { %v3176_v7 = vld [vmem:[#allocation2 + $0x2cc] sm:$0xf0]  ;;  %v3170_v8 = vld [vmem:[#allocation2 + $0x2a4] sm:$0xf]  ;;  %v2840_v10 = vld [vmem:[#allocation2 + $0x2d0] sm:$0xf0] }
  0x1a   : > { %s4026_s29 = smov (!%p481_p6, %s3558_s29), 1  ;;  %v2839_v9 = vor.u32 %v3176_v7, %v2838_v6  ;;  %v2846_v11 = vld [vmem:[#allocation2 + $0x2a8] sm:$0xf]  ;;  %v3177_v12 = vld [vmem:[#allocation2 + $0x2d4] sm:$0xf0]  ;;  %v2843_v13 = vor.u32 %v3170_v8, %v2840_v10  ;;  %vm1427_vm11 = vcmask 195584  }
  0x1b   : > { %s3246_s3 = smul.u32 24, %s4026_s29  ;;  %v2847_v14 = vor.u32 %v3177_v12, %v2846_v11  ;;  %v3171_v15 = vld [vmem:[#allocation2 + $0x2ac] sm:$0xf]  ;;  %v2848_v16 = vld [vmem:[#allocation2 + $0x2d8] sm:$0xf0] }
  0x1c   : > { %1181 = vmatpush.bf16.msra.mxu0 %v2839_v9  ;;  %v2851_v17 = vor.u32 %v3171_v15, %v2848_v16  ;;  %1199 = vmatpush.bf16.msra.mxu1 %v2843_v13  ;;  %v2790_v18 = vld [vmem:[#allocation2 + $0x240] sm:$0xf]  ;;  %v3164_v19 = vld [vmem:[#allocation2 + $0x26c] sm:$0xf0]  ;;  %v3158_v20 = vld [vmem:[#allocation2 + $0x244] sm:$0xf] }
  0x1d   : > { %s3607_s15 = scalar_lea.vmem %s4001_s0, %s3246_s3  ;;  %1217 = vmatpush.bf16.msra.mxu2 %v2847_v14  ;;  %v2791_v21 = vor.u32 %v3164_v19, %v2790_v18  ;;  %v2792_v22 = vld [vmem:[#allocation2 + $0x270] sm:$0xf0]  ;;  %v2798_v23 = vld [vmem:[#allocation2 + $0x248] sm:$0xf]  ;;  %v3165_v24 = vld [vmem:[#allocation2 + $0x274] sm:$0xf0]  ;;  %s490_s24 = scalar_lea.vmem %s4014_s13, %s3246_s3 }
  0x1e   : > { %v3610_v0 = vld [vmem:[%s3607_s15 + $0x10] sm:$0xff]  ;;  %v3613_v1 = vld [vmem:[%s3607_s15] sm:$0xff]  ;;  %v3620_v3 = vld [vmem:[%s3607_s15 + $0x8] sm:$0xff]  ;;  %1235 = vmatpush.bf16.msra.mxu3 %v2851_v17  ;;  %v2795_v25 = vor.u32 %v3158_v20, %v2792_v22  ;;  %v2799_v26 = vor.u32 %v3165_v24, %v2798_v23 }
  0x1f   : > { %501 = vadd.xlane.f32.xlu2 %v3610_v0  ;;  %497 = vadd.xlane.f32.xlu0 %v3613_v1  ;;  %v506_v2 = vmul.f32 %v3613_v1, %v3613_v1  ;;  %v508_v4 = vmul.f32 %v3610_v0, %v3610_v0  ;;  %v507_v5 = vmul.f32 %v3620_v3, %v3620_v3  ;;  %v3159_v27 = vld [vmem:[#allocation2 + $0x24c] sm:$0xf]  ;;  %v2800_v28 = vld [vmem:[#allocation2 + $0x278] sm:$0xf0]  ;;  %v2742_v30 = vld [vmem:[#allocation2 + $0x1e0] sm:$0xf] }
  0x20   : > { %1182 = vmatpush.bf16.msra.mxu0 %v2791_v21  ;;  %v2803_v29 = vor.u32 %v3159_v27, %v2800_v28  ;;  %1200 = vmatpush.bf16.msra.mxu1 %v2795_v25  ;;  %v3152_v31 = vld [vmem:[#allocation2 + $0x20c] sm:$0xf0]  ;;  %v3146_v32 = vld [vmem:[#allocation2 + $0x1e4] sm:$0xf]  ;;  %v2744_v34 = vld [vmem:[#allocation2 + $0x210] sm:$0xf0] }
  0x21   : > { %509 = vadd.xlane.f32.xlu1 %v506_v2  ;;  %1218 = vmatpush.bf16.msra.mxu2 %v2799_v26  ;;  %v2743_v33 = vor.u32 %v3152_v31, %v2742_v30  ;;  %v2750_v35 = vld [vmem:[#allocation2 + $0x1e8] sm:$0xf]  ;;  %v3153_v36 = vld [vmem:[#allocation2 + $0x214] sm:$0xf0]  ;;  %v2747_v37 = vor.u32 %v3146_v32, %v2744_v34  ;;  %v3147_v39 = vld [vmem:[#allocation2 + $0x1ec] sm:$0xf] }
  0x22   : > { %1236 = vmatpush.bf16.msra.mxu3 %v2803_v29  ;;  %v2751_v38 = vor.u32 %v3153_v36, %v2750_v35  ;;  %v2752_v40 = vld [vmem:[#allocation2 + $0x218] sm:$0xf0]  ;;  %v2694_v42 = vld [vmem:[#allocation2 + $0x180] sm:$0xf]  ;;  %v3140_v43 = vld [vmem:[#allocation2 + $0x1ac] sm:$0xf0] }
  0x23   : > { %v2755_v41 = vor.u32 %v3147_v39, %v2752_v40  ;;  %v3134_v44 = vld [vmem:[#allocation2 + $0x184] sm:$0xf]  ;;  %v2695_v45 = vor.u32 %v3140_v43, %v2694_v42  ;;  %v2696_v46 = vld [vmem:[#allocation2 + $0x1b0] sm:$0xf0]  ;;  %v2702_v47 = vld [vmem:[#allocation2 + $0x188] sm:$0xf] }
  0x24   : > { %1183 = vmatpush.bf16.msra.mxu0 %v2743_v33  ;;  %1201 = vmatpush.bf16.msra.mxu1 %v2747_v37  ;;  %v3141_v48 = vld [vmem:[#allocation2 + $0x1b4] sm:$0xf0]  ;;  %v2699_v49 = vor.u32 %v3134_v44, %v2696_v46  ;;  %v3135_v51 = vld [vmem:[#allocation2 + $0x18c] sm:$0xf]  ;;  %v2704_v52 = vld [vmem:[#allocation2 + $0x1b8] sm:$0xf0] }
  0x25   : > { %1219 = vmatpush.bf16.msra.mxu2 %v2751_v38  ;;  %v2703_v50 = vor.u32 %v3141_v48, %v2702_v47  ;;  %v2707_v53 = vor.u32 %v3135_v51, %v2704_v52  ;;  %v2646_v54 = vld [vmem:[#allocation2 + $0x120] sm:$0xf]  ;;  %v3128_v55 = vld [vmem:[#allocation2 + $0x14c] sm:$0xf0]  ;;  %v3122_v56 = vld [vmem:[#allocation2 + $0x124] sm:$0xf] }
  0x26   : > { %1237 = vmatpush.bf16.msra.mxu3 %v2755_v41  ;;  %v2647_v57 = vor.u32 %v3128_v55, %v2646_v54  ;;  %v2648_v58 = vld [vmem:[#allocation2 + $0x150] sm:$0xf0]  ;;  %v2654_v59 = vld [vmem:[#allocation2 + $0x128] sm:$0xf]  ;;  %v3129_v60 = vld [vmem:[#allocation2 + $0x154] sm:$0xf0] }
  0x27   : > { %513 = vadd.xlane.f32.xlu2 %v508_v4  ;;  %499 = vadd.xlane.f32.xlu0 %v3620_v3  ;;  %v2651_v61 = vor.u32 %v3122_v56, %v2648_v58  ;;  %v2655_v62 = vor.u32 %v3129_v60, %v2654_v59  ;;  %v3123_v63 = vld [vmem:[#allocation2 + $0x12c] sm:$0xf]  ;;  %v2656_v2 = vld [vmem:[#allocation2 + $0x158] sm:$0xf0]  ;;  %v3116_v6 = vld [vmem:[#allocation2 + $0xec] sm:$0xf0] }
  0x28   : > { %1184 = vmatpush.bf16.msra.mxu0 %v2695_v45  ;;  %1202 = vmatpush.bf16.msra.mxu1 %v2699_v49  ;;  %v2659_v4 = vor.u32 %v3123_v63, %v2656_v2  ;;  %v3110_v7 = vld [vmem:[#allocation2 + $0xc4] sm:$0xf]  ;;  %v2600_v9 = vld [vmem:[#allocation2 + $0xf0] sm:$0xf0]  ;;  %v2606_v10 = vld [vmem:[#allocation2 + $0xc8] sm:$0xf] }
  0x29   : > { %511 = vadd.xlane.f32.xlu1 %v507_v5  ;;  %1220 = vmatpush.bf16.msra.mxu2 %v2703_v50  ;;  %v2598_v5 = vld [vmem:[#allocation2 + $0xc0] sm:$0xf]  ;;  %v3117_v11 = vld [vmem:[#allocation2 + $0xf4] sm:$0xf0]  ;;  %v2603_v14 = vor.u32 %v3110_v7, %v2600_v9  ;;  %v3111_v16 = vld [vmem:[#allocation2 + $0xcc] sm:$0xf] }
  0x2a   : > { %1238 = vmatpush.bf16.msra.mxu3 %v2707_v53  ;;  %v2599_v8 = vor.u32 %v3116_v6, %v2598_v5  ;;  %v2607_v15 = vor.u32 %v3117_v11, %v2606_v10  ;;  %v2608_v17 = vld [vmem:[#allocation2 + $0xf8] sm:$0xf0]  ;;  %v2550_v22 = vld [vmem:[#allocation2 + $0x60] sm:$0xf]  ;;  %v3104_v23 = vld [vmem:[#allocation2 + $0x8c] sm:$0xf0] }
  0x2b   : > { %v2611_v20 = vor.u32 %v3111_v16, %v2608_v17  ;;  %v3098_v24 = vld [vmem:[#allocation2 + $0x64] sm:$0xf]  ;;  %v2552_v26 = vld [vmem:[#allocation2 + $0x90] sm:$0xf0]  ;;  %v2558_v27 = vld [vmem:[#allocation2 + $0x68] sm:$0xf]  ;;  %v2551_v30 = vor.u32 %v3104_v23, %v2550_v22 }
  0x2c   : > { %1185 = vmatpush.bf16.msra.mxu0 %v2647_v57  ;;  %1203 = vmatpush.bf16.msra.mxu1 %v2651_v61  ;;  %v3105_v28 = vld [vmem:[#allocation2 + $0x94] sm:$0xf0]  ;;  %v2555_v31 = vor.u32 %v3098_v24, %v2552_v26  ;;  %v3099_v33 = vld [vmem:[#allocation2 + $0x6c] sm:$0xf]  ;;  %v2560_v34 = vld [vmem:[#allocation2 + $0x98] sm:$0xf0] }
  0x2d   : > { %1221 = vmatpush.bf16.msra.mxu2 %v2655_v62  ;;  %v2559_v32 = vor.u32 %v3105_v28, %v2558_v27  ;;  %v2563_v35 = vor.u32 %v3099_v33, %v2560_v34  ;;  %v2502_v37 = vld [vmem:[#allocation2] sm:$0xf]  ;;  %v3092_v38 = vld [vmem:[#allocation2 + $0x2c] sm:$0xf0]  ;;  %v3086_v39 = vld [vmem:[#allocation2 + $0x4] sm:$0xf] }
  0x2e   : > { %1239 = vmatpush.bf16.msra.mxu3 %v2659_v4  ;;  %v2503_v41 = vor.u32 %v3092_v38, %v2502_v37  ;;  %v2504_v42 = vld [vmem:[#allocation2 + $0x30] sm:$0xf0]  ;;  %v2510_v43 = vld [vmem:[#allocation2 + $0x8] sm:$0xf]  ;;  %v3093_v44 = vld [vmem:[#allocation2 + $0x34] sm:$0xf0] }
  0x2f   : > { %v2507_v48 = vor.u32 %v3086_v39, %v2504_v42  ;;  %v2511_v49 = vor.u32 %v3093_v44, %v2510_v43  ;;  %v3087_v50 = vld [vmem:[#allocation2 + $0xc] sm:$0xf]  ;;  %v2512_v51 = vld [vmem:[#allocation2 + $0x38] sm:$0xf0]  ;;  %v2854_v56 = vld [vmem:[#allocation2 + $0x2b0] sm:$0xf] }
  0x30   : > { %1186 = vmatpush.bf16.msra.mxu0 %v2599_v8  ;;  %1204 = vmatpush.bf16.msra.mxu1 %v2603_v14  ;;  %v2515_v54 = vor.u32 %v3087_v50, %v2512_v51  ;;  %v3178_v57 = vld [vmem:[#allocation2 + $0x2dc] sm:$0xf0]  ;;  %v3172_v58 = vld [vmem:[#allocation2 + $0x2b4] sm:$0xf]  ;;  %v2856_v62 = vld [vmem:[#allocation2 + $0x2e0] sm:$0xf0] }
  0x31   : > { %1222 = vmatpush.bf16.msra.mxu2 %v2607_v15  ;;  %v2862_v63 = vld [vmem:[#allocation2 + $0x2b8] sm:$0xf]  ;;  %v2855_v2 = vor.u32 %v3178_v57, %v2854_v56  ;;  %v2859_v4 = vor.u32 %v3172_v58, %v2856_v62  ;;  %v3179_v5 = vld [vmem:[#allocation2 + $0x2e4] sm:$0xf0]  ;;  %v3173_v6 = vld [vmem:[#allocation2 + $0x2bc] sm:$0xf] }
  0x32   : > { %1240 = vmatpush.bf16.msra.mxu3 %v2611_v20  ;;  %v2864_v7 = vld [vmem:[#allocation2 + $0x2e8] sm:$0xf0]  ;;  %v2863_v10 = vor.u32 %v3179_v5, %v2862_v63  ;;  %v3160_v15 = vld [vmem:[#allocation2 + $0x254] sm:$0xf]  ;;  %v2808_v16 = vld [vmem:[#allocation2 + $0x280] sm:$0xf0] }
  0x33   : > { %v2867_v11 = vor.u32 %v3173_v6, %v2864_v7  ;;  %v2814_v17 = vld [vmem:[#allocation2 + $0x258] sm:$0xf]  ;;  %v3167_v22 = vld [vmem:[#allocation2 + $0x284] sm:$0xf0]  ;;  %v3161_v23 = vld [vmem:[#allocation2 + $0x25c] sm:$0xf] }
  0x34   : > { %1187 = vmatpush.bf16.msra.mxu0 %v2551_v30  ;;  %1205 = vmatpush.bf16.msra.mxu1 %v2555_v31  ;;  %v2816_v26 = vld [vmem:[#allocation2 + $0x288] sm:$0xf0]  ;;  %v2758_v27 = vld [vmem:[#allocation2 + $0x1f0] sm:$0xf]  ;;  %v3154_v28 = vld [vmem:[#allocation2 + $0x21c] sm:$0xf0] }
  0x35   : > { %1223 = vmatpush.bf16.msra.mxu2 %v2559_v32  ;;  %v3148_v30 = vld [vmem:[#allocation2 + $0x1f4] sm:$0xf]  ;;  %v2760_v31 = vld [vmem:[#allocation2 + $0x220] sm:$0xf0]  ;;  %v2766_v32 = vld [vmem:[#allocation2 + $0x1f8] sm:$0xf]  ;;  %v2819_v33 = vor.u32 %v3161_v23, %v2816_v26  ;;  %v2759_v34 = vor.u32 %v3154_v28, %v2758_v27 }
  0x36   : > { %1241 = vmatpush.bf16.msra.mxu3 %v2563_v35  ;;  %v2763_v35 = vor.u32 %v3148_v30, %v2760_v31  ;;  %v3149_v37 = vld [vmem:[#allocation2 + $0x1fc] sm:$0xf]  ;;  %v3142_v42 = vld [vmem:[#allocation2 + $0x1bc] sm:$0xf0]  ;;  %v3136_v44 = vld [vmem:[#allocation2 + $0x194] sm:$0xf] }
  0x37   : > { %v3143_v50 = vld [vmem:[#allocation2 + $0x1c4] sm:$0xf0]  ;;  %v3137_v51 = vld [vmem:[#allocation2 + $0x19c] sm:$0xf]  ;;  %v2720_v56 = vld [vmem:[#allocation2 + $0x1c8] sm:$0xf0] }
  0x38   : > { %1188 = vmatpush.bf16.msra.mxu0 %v2503_v41  ;;  %1206 = vmatpush.bf16.msra.mxu1 %v2507_v48  ;;  %v2710_v41 = vld [vmem:[#allocation2 + $0x190] sm:$0xf]  ;;  %v2723_v62 = vor.u32 %v3137_v51, %v2720_v56  ;;  %v3130_v7 = vld [vmem:[#allocation2 + $0x15c] sm:$0xf0]  ;;  %v2672_v23 = vld [vmem:[#allocation2 + $0x168] sm:$0xf0] }
  0x39   : > { %1224 = vmatpush.bf16.msra.mxu2 %v2511_v49  ;;  %v2662_v6 = vld [vmem:[#allocation2 + $0x130] sm:$0xf]  ;;  %v3118_v26 = vld [vmem:[#allocation2 + $0xfc] sm:$0xf0]  ;;  %v3107_v51 = vld [vmem:[#allocation2 + $0xa4] sm:$0xf0] }
  0x3a   : > { %1242 = vmatpush.bf16.msra.mxu3 %v2515_v54  ;;  %v2711_v54 = vor.u32 %v3142_v42, %v2710_v41  ;;  %v2880_v28 = vld [vmem:[#allocation2 + $0x2f8] sm:$0xf0] }
  0x3c   : > { %1253 = vmatpush.bf16.msrb.mxu0 %v2855_v2  ;;  %1271 = vmatpush.bf16.msrb.mxu1 %v2859_v4 }
  0x3d   : > { %1289 = vmatpush.bf16.msrb.mxu2 %v2863_v10  ;;  %v3124_v10 = vld [vmem:[#allocation2 + $0x134] sm:$0xf] }
  0x3e   : > { %1307 = vmatpush.bf16.msrb.mxu3 %v2867_v11  ;;  %v2664_v11 = vld [vmem:[#allocation2 + $0x160] sm:$0xf0] }
  0x42   : > { %1308 = vmatpush.bf16.msrb.mxu3 %v2819_v33  ;;  %v3119_v33 = vld [vmem:[#allocation2 + $0x104] sm:$0xf0] }
  0x92   : > { %v502_v12 = vpop.xlane.xlu2 %501  ;;  %v498_v13 = vpop.xlane.xlu0 %497 }
  0x93   : > { %v3627_v18 = vmul.f32 0.03125, %v502_v12  ;;  %v3629_v19 = vmul.f32 0.03125, %v498_v13  ;;  %v2806_v12 = vld [vmem:[#allocation2 + $0x250] sm:$0xf]  ;;  %v3166_v13 = vld [vmem:[#allocation2 + $0x27c] sm:$0xf0] }
  0x94   : > { %v510_v21 = vpop.xlane.xlu1 %509  ;;  %v2807_v14 = vor.u32 %v3166_v13, %v2806_v12  ;;  %v2670_v12 = vld [vmem:[#allocation2 + $0x138] sm:$0xf] }
  0x95   : > { %v518_v25 = vmul.f32 %v3629_v19, %v3629_v19  ;;  %v515_v29 = vmul.f32 0.03125, %v510_v21  ;;  %v520_v40 = vmul.f32 %v3627_v18, %v3627_v18  ;;  %v2811_v21 = vor.u32 %v3160_v15, %v2808_v16  ;;  %v3131_v15 = vld [vmem:[#allocation2 + $0x164] sm:$0xf0]  ;;  %v3125_v16 = vld [vmem:[#allocation2 + $0x13c] sm:$0xf] }
  0x96   : > { %1254 = vmatpush.bf16.msrb.mxu0 %v2807_v14  ;;  %v2667_v14 = vor.u32 %v3124_v10, %v2664_v11  ;;  %v3133_v11 = vld [vmem:[#allocation2 + $0x174] sm:$0xf0] }
  0x97   : > { %v521_v36 = vsub.f32 %v515_v29, %v518_v25  ;;  %v2815_v25 = vor.u32 %v3167_v22, %v2814_v17  ;;  %1272 = vmatpush.bf16.msrb.mxu1 %v2811_v21  ;;  %v524_v17 = vsub.f32 %v3613_v1, %v3629_v19  ;;  %v3681_v21 = vld [vmem:[%s4002_s1] ss:$0 sm:$0xff]  ;;  %v2671_v22 = vor.u32 %v3131_v15, %v2670_v12  ;;  %v3112_v19 = vld [vmem:[#allocation2 + $0xd4] sm:$0xf] }
  0x98   : > { %v2675_v1 = vor.u32 %v3125_v16, %v2672_v23  ;;  %v2870_v15 = vld [vmem:[#allocation2 + $0x2c0] sm:$0xf]  ;;  %v3180_v16 = vld [vmem:[#allocation2 + $0x2ec] sm:$0xf0]  ;;  %v2872_v23 = vld [vmem:[#allocation2 + $0x2f0] sm:$0xf0] }
  0x99   : > { %v3635_v45 = vadd.f32 1e-05, %v521_v36  ;;  %v3155_v36 = vld [vmem:[#allocation2 + $0x224] sm:$0xf0]  ;;  %1290 = vmatpush.bf16.msrb.mxu2 %v2815_v25  ;;  %v2614_v25 = vld [vmem:[#allocation2 + $0xd0] sm:$0xf] }
  0x9a   : > { %v514_v46 = vpop.xlane.xlu2 %513  ;;  %v500_v47 = vpop.xlane.xlu0 %499  ;;  %v2767_v39 = vor.u32 %v3155_v36, %v2766_v32  ;;  %1255 = vmatpush.bf16.msrb.mxu0 %v2759_v34  ;;  %v2622_v32 = vld [vmem:[#allocation2 + $0xd8] sm:$0xf]  ;;  %v3113_v34 = vld [vmem:[#allocation2 + $0xdc] sm:$0xf] }
  0x9b   : > { %v517_v52 = vmul.f32 0.03125, %v514_v46  ;;  %v3637_v53 = vmul.f32 0.03125, %v500_v47  ;;  %3297 = vrsqrt.f32 %v3635_v45  ;;  %v2712_v46 = vld [vmem:[#allocation2 + $0x1c0] sm:$0xf0]  ;;  %v2718_v47 = vld [vmem:[#allocation2 + $0x198] sm:$0xf]  ;;  %1273 = vmatpush.bf16.msrb.mxu1 %v2763_v35  ;;  %vm536_vm1 = vweird.f32 %v3635_v45 }
  0x9c   : > { %v512_v55 = vpop.xlane.xlu1 %511  ;;  %v2623_v36 = vor.u32 %v3119_v33, %v2622_v32  ;;  %v2830_v32 = vld [vmem:[#allocation2 + $0x268] sm:$0xf]  ;;  %v3169_v33 = vld [vmem:[#allocation2 + $0x294] sm:$0xf0] }
  0x9d   : > { %v523_v59 = vsub.f32 %v517_v52, %v520_v40  ;;  %v519_v60 = vmul.f32 %v3637_v53, %v3637_v53  ;;  %v516_v61 = vmul.f32 0.03125, %v512_v55  ;;  %v2768_v40 = vld [vmem:[#allocation2 + $0x228] sm:$0xf0]  ;;  %v2715_v55 = vor.u32 %v3136_v44, %v2712_v46  ;;  %1291 = vmatpush.bf16.msrb.mxu2 %v2767_v39  ;;  %v3106_v39 = vld [vmem:[#allocation2 + $0x9c] sm:$0xf0] }
  0x9e   : > { %v2771_v43 = vor.u32 %v3149_v37, %v2768_v40  ;;  %1256 = vmatpush.bf16.msrb.mxu0 %v2711_v54  ;;  %v2624_v37 = vld [vmem:[#allocation2 + $0x108] sm:$0xf0]  ;;  %v3695_v40 = vld [vmem:[%s4003_s2] ss:$0 sm:$0xff]  ;;  %v525_v41 = vsub.f32 %v3620_v3, %v3637_v53  ;;  %v2568_v44 = vld [vmem:[#allocation2 + $0xa0] sm:$0xf0] }
  0x9f   : > { %v3642_v8 = vadd.f32 1e-05, %v523_v59  ;;  %v522_v9 = vsub.f32 %v516_v61, %v519_v60  ;;  %v2719_v59 = vor.u32 %v3143_v50, %v2718_v47  ;;  %1274 = vmatpush.bf16.msrb.mxu1 %v2715_v55  ;;  %v2627_v42 = vor.u32 %v3113_v34, %v2624_v37  ;;  %v2574_v46 = vld [vmem:[#allocation2 + $0x78] sm:$0xf]  ;;  %v2576_v54 = vld [vmem:[#allocation2 + $0xa8] sm:$0xf0] }
  0xa0   : > { %1309 = vmatpush.bf16.msrb.mxu3 %v2771_v43  ;;  %v3100_v43 = vld [vmem:[#allocation2 + $0x74] sm:$0xf]  ;;  %v2575_v3 = vor.u32 %v3107_v51, %v2574_v46  ;;  %v2518_v53 = vld [vmem:[#allocation2 + $0x10] sm:$0xf]  ;;  %v3163_v34 = vld [vmem:[#allocation2 + $0x26c] sm:$0xf] }
  0xa1   : > { %3299 = vrsqrt.f32 %v3642_v8  ;;  %v3645_v20 = vadd.f32 1e-05, %v522_v9  ;;  %v3647_v24 = vpop.eup %3297  ;;  %1292 = vmatpush.bf16.msrb.mxu2 %v2719_v59  ;;  %v2663_v9 = vor.u32 %v3130_v7, %v2662_v6  ;;  %v2571_v50 = vor.u32 %v3100_v43, %v2568_v44  ;;  %v3088_v59 = vld [vmem:[#allocation2 + $0x14] sm:$0xf]  ;;  %v3089_v6 = vld [vmem:[#allocation2 + $0x1c] sm:$0xf] }
  0xa2   : > { %v531_v29 = vmul.f32 %v3647_v24, %v3635_v45  ;;  %vm537_vm0 = vweird.f32 %v3647_v24  ;;  %vm556_vm6 = vweird.f32 %v3642_v8  ;;  %v2528_v7 = vld [vmem:[#allocation2 + $0x48] sm:$0xf0]  ;;  %v2774_v37 = vld [vmem:[#allocation2 + $0x200] sm:$0xf]  ;;  %v2782_v43 = vld [vmem:[#allocation2 + $0x208] sm:$0xf] }
  0xa3   : > { %3301 = vrsqrt.f32 %v3645_v20  ;;  %vm3665_vm2 = vmor %vm536_vm1, %vm537_vm0  ;;  %vm546_vm4 = vweird.f32 %v3645_v20  ;;  %1257 = vmatpush.bf16.msrb.mxu0 %v2663_v9  ;;  %1275 = vmatpush.bf16.msrb.mxu1 %v2667_v14  ;;  %v3157_v46 = vld [vmem:[#allocation2 + $0x234] sm:$0xf0] }
  0xa4   : > { %v532_v38 = vmul.f32 %v3647_v24, %v531_v29  ;;  %1310 = vmatpush.bf16.msrb.mxu3 %v2723_v62  ;;  %v2616_v29 = vld [vmem:[#allocation2 + $0x100] sm:$0xf0]  ;;  %v2526_v62 = vld [vmem:[#allocation2 + $0x18] sm:$0xf] }
  0xa5   : > { %1293 = vmatpush.bf16.msrb.mxu2 %v2671_v22  ;;  %v2619_v31 = vor.u32 %v3112_v19, %v2616_v29  ;;  %v2871_v22 = vor.u32 %v3180_v16, %v2870_v15  ;;  %v3162_v29 = vld [vmem:[#allocation2 + $0x264] sm:$0xf]  ;;  %v2630_v15 = vld [vmem:[#allocation2 + $0xe0] sm:$0xf] }
  0xa6   : > { %v533_v49 = vmul.f32 0.5, %v532_v38  ;;  %v2566_v38 = vld [vmem:[#allocation2 + $0x70] sm:$0xf] }
  0xa7   : > { %v3653_v48 = vpop.eup %3299  ;;  %1276 = vmatpush.bf16.msrb.mxu1 %v2619_v31 }
  0xa8   : > { %v551_v52 = vmul.f32 %v3653_v48, %v3642_v8  ;;  %v534_v58 = vsub.f32 1.5, %v533_v49  ;;  %1311 = vmatpush.bf16.msrb.mxu3 %v2675_v1  ;;  %v2567_v49 = vor.u32 %v3106_v39, %v2566_v38  ;;  %vm557_vm7 = vweird.f32 %v3653_v48  ;;  %v2822_v1 = vld [vmem:[#allocation2 + $0x260] sm:$0xf]  ;;  %v3156_v38 = vld [vmem:[#allocation2 + $0x22c] sm:$0xf0] }
  0xa9   : > { %v3657_v57 = vpop.eup %3301  ;;  %1294 = vmatpush.bf16.msrb.mxu2 %v2623_v36  ;;  %vm3711_vm8 = vmor %vm556_vm6, %vm557_vm7  ;;  %v526_v8 = vsub.f32 %v3610_v0, %v3627_v18  ;;  %v3168_v18 = vld [vmem:[#allocation2 + $0x28c] sm:$0xf0]  ;;  %v2832_v36 = vld [vmem:[#allocation2 + $0x298] sm:$0xf0] }
  0xaa   : > { %v552_v60 = vmul.f32 %v3653_v48, %v551_v52  ;;  %v541_v61 = vmul.f32 %v3657_v57, %v3645_v20  ;;  %v535_v63 = vmul.f32 %v3647_v24, %v534_v58  ;;  %vm547_vm3 = vweird.f32 %v3657_v57  ;;  %v3101_v52 = vld [vmem:[#allocation2 + $0x7c] sm:$0xf]  ;;  %v3094_v58 = vld [vmem:[#allocation2 + $0x3c] sm:$0xf0] }
  0xab   : > { %vm3687_vm5 = vmor %vm546_vm4, %vm547_vm3  ;;  %v2615_v20 = vor.u32 %v3118_v26, %v2614_v25  ;;  %1277 = vmatpush.bf16.msrb.mxu1 %v2571_v50  ;;  %v2519_v2 = vor.u32 %v3094_v58, %v2518_v53  ;;  %v2878_v25 = vld [vmem:[#allocation2 + $0x2c8] sm:$0xf]  ;;  %v3181_v26 = vld [vmem:[#allocation2 + $0x2f4] sm:$0xf0]  ;;  %v2835_v39 = vor.u32 %v3163_v34, %v2832_v36  ;;  %v2775_v50 = vor.u32 %v3156_v38, %v2774_v37 }
  0xac   : > { %v3669_v4 = vmul.f32 0.5, %v552_v60  ;;  %v542_v5 = vmul.f32 %v3657_v57, %v541_v61  ;;  %v539_v45 = vsel %vm3665_vm2, %v3647_v24, %v535_v63  ;;  %1312 = vmatpush.bf16.msrb.mxu3 %v2627_v42  ;;  %v2579_v60 = vor.u32 %v3101_v52, %v2576_v54  ;;  %v2520_v61 = vld [vmem:[#allocation2 + $0x40] sm:$0xf0]  ;;  %v2776_v42 = vld [vmem:[#allocation2 + $0x230] sm:$0xf0] }
  0xad   : > { %v560_v30 = vmul.f32 %v539_v45, %v524_v17  ;;  %1258 = vmatpush.bf16.msrb.mxu0 %v2615_v20  ;;  %1295 = vmatpush.bf16.msrb.mxu2 %v2575_v3  ;;  %v3174_v17 = vld [vmem:[#allocation2 + $0x2c4] sm:$0xf]  ;;  %v2823_v20 = vor.u32 %v3168_v18, %v2822_v1  ;;  %v2726_v52 = vld [vmem:[#allocation2 + $0x1a0] sm:$0xf]  ;;  %v2783_v54 = vor.u32 %v3157_v46, %v2782_v43  ;;  %v2728_v53 = vld [vmem:[#allocation2 + $0x1d0] sm:$0xf0] }
  0xae   : > { %v543_v13 = vmul.f32 0.5, %v542_v5  ;;  %v554_v24 = vsub.f32 1.5, %v3669_v4  ;;  %v2523_v4 = vor.u32 %v3088_v59, %v2520_v61  ;;  %v3095_v5 = vld [vmem:[#allocation2 + $0x44] sm:$0xf0]  ;;  %v3138_v3 = vld [vmem:[#allocation2 + $0x1a4] sm:$0xf] }
  0xaf   : > { %v566_v55 = vmul.f32 %v3681_v21, %v560_v30  ;;  %v2527_v45 = vor.u32 %v3095_v5, %v2526_v62  ;;  %v2824_v30 = vld [vmem:[#allocation2 + $0x290] sm:$0xf0]  ;;  %v2734_v59 = vld [vmem:[#allocation2 + $0x1a8] sm:$0xf]  ;;  %v3145_v61 = vld [vmem:[#allocation2 + $0x1d4] sm:$0xf0] }
  0xb0   : > { %v544_v27 = vsub.f32 1.5, %v543_v13  ;;  %v555_v63 = vmul.f32 %v3653_v48, %v554_v24  ;;  %1313 = vmatpush.bf16.msrb.mxu3 %v2579_v60  ;;  %v2531_v13 = vor.u32 %v3089_v6, %v2528_v7  ;;  %1278 = vmatpush.bf16.msrb.mxu1 %v2523_v4  ;;  %v2879_v24 = vor.u32 %v3181_v26, %v2878_v25  ;;  %v2736_v62 = vld [vmem:[#allocation2 + $0x1d8] sm:$0xf0]  ;;  %v2678_v5 = vld [vmem:[#allocation2 + $0x140] sm:$0xf] }
  0xb1   : > { %1259 = vmatpush.bf16.msrb.mxu0 %v2567_v49  ;;  %v572_v9 = vadd.f32 %v3695_v40, %v566_v55  ;;  %1296 = vmatpush.bf16.msrb.mxu2 %v2527_v45  ;;  %v2827_v31 = vor.u32 %v3162_v29, %v2824_v30  ;;  %v2784_v49 = vld [vmem:[#allocation2 + $0x238] sm:$0xf0]  ;;  %v2731_v60 = vor.u32 %v3138_v3, %v2728_v53  ;;  %v3132_v6 = vld [vmem:[#allocation2 + $0x16c] sm:$0xf0]  ;;  %v3126_v7 = vld [vmem:[#allocation2 + $0x144] sm:$0xf] }
  0xb2   : > { %v545_v35 = vmul.f32 %v3657_v57, %v544_v27  ;;  %v559_v14 = vsel %vm3711_vm8, %v3653_v48, %v555_v63  ;;  %v2875_v48 = vor.u32 %v3174_v17, %v2872_v23  ;;  %v3175_v27 = vld [vmem:[#allocation2 + $0x2cc] sm:$0xf]  ;;  %v2632_v23 = vld [vmem:[#allocation2 + $0x110] sm:$0xf0]  ;;  %v2582_v1 = vld [vmem:[#allocation2 + $0x80] sm:$0xf] }
  0xb3   : > { %v562_v19 = vmul.f32 %v559_v14, %v526_v8  ;;  %v2883_v0 = vor.u32 %v3175_v27, %v2880_v28  ;;  %v2688_v14 = vld [vmem:[#allocation2 + $0x178] sm:$0xf0]  ;;  %v3120_v8 = vld [vmem:[#allocation2 + $0x10c] sm:$0xf0]  ;;  %v3115_v27 = vld [vmem:[#allocation2 + $0xec] sm:$0xf] }
  0xb4   : > { %v549_v47 = vsel %vm3687_vm5, %v3657_v57, %v545_v35  ;;  %1314 = vmatpush.bf16.msrb.mxu3 %v2531_v13  ;;  %v2831_v35 = vor.u32 %v3169_v33, %v2830_v32  ;;  %v3127_v13 = vld [vmem:[#allocation2 + $0x14c] sm:$0xf]  ;;  %v2631_v25 = vor.u32 %v3120_v8, %v2630_v15  ;;  %v2640_v28 = vld [vmem:[#allocation2 + $0x118] sm:$0xf0]  ;;  %v2584_v18 = vld [vmem:[#allocation2 + $0xb0] sm:$0xf0] }
  0xb5   : > { %v561_v56 = vmul.f32 %v549_v47, %v525_v41  ;;  %1260 = vmatpush.bf16.msrb.mxu0 %v2519_v2  ;;  %v3150_v41 = vld [vmem:[#allocation2 + $0x204] sm:$0xf]  ;;  %v568_v44 = vmul.f32 %v3681_v21, %v562_v19  ;;  %v3151_v47 = vld [vmem:[#allocation2 + $0x20c] sm:$0xf]  ;;  %v2735_v2 = vor.u32 %v3145_v61, %v2734_v59  ;;  %v2691_v17 = vor.u32 %v3127_v13, %v2688_v14  ;;  %v3108_v19 = vld [vmem:[#allocation2 + $0xac] sm:$0xf0] }
  0xb6   : > { %v2779_v51 = vor.u32 %v3150_v41, %v2776_v42  ;;  %v2787_v55 = vor.u32 %v3151_v47, %v2784_v49  ;;  %v2643_v30 = vor.u32 %v3115_v27, %v2640_v28  ;;  %v2583_v32 = vor.u32 %v3108_v19, %v2582_v1  ;;  %v3103_v34 = vld [vmem:[#allocation2 + $0x8c] sm:$0xf]  ;;  %v2534_v36 = vld [vmem:[#allocation2 + $0x20] sm:$0xf]  ;;  %v3096_v37 = vld [vmem:[#allocation2 + $0x4c] sm:$0xf0] }
  0xb7   : > { %v567_v57 = vmul.f32 %v3681_v21, %v561_v56  ;;  %v3144_v56 = vld [vmem:[#allocation2 + $0x1cc] sm:$0xf0]  ;;  %v574_v58 = vadd.f32 %v3695_v40, %v568_v44  ;;  %v3090_v38 = vld [vmem:[#allocation2 + $0x24] sm:$0xf]  ;;  %v2542_v43 = vld [vmem:[#allocation2 + $0x28] sm:$0xf]  ;;  %v2535_v44 = vor.u32 %v3096_v37, %v2534_v36 }
  0xb8   : > { %v2727_v21 = vor.u32 %v3144_v56, %v2726_v52  ;;  %v3097_v47 = vld [vmem:[#allocation2 + $0x54] sm:$0xf0]  ;;  %v3091_v49 = vld [vmem:[#allocation2 + $0x2c] sm:$0xf] }
  0xb9   : > { %v573_v10 = vadd.f32 %v3695_v40, %v567_v57  ;;  %v3139_v57 = vld [vmem:[#allocation2 + $0x1ac] sm:$0xf]  ;;  %v3728_v63 = vpack.c.bf16 %v574_v58, %v574_v58  ;;  %v2679_v40 = vor.u32 %v3132_v6, %v2678_v5 }
  0xba   : > { %v2739_v4 = vor.u32 %v3139_v57, %v2736_v62 }
  0xbb   : > { %v3715_v12 = vpack.c.bf16 %v573_v10, %v572_v9  ;;  %v2680_v9 = vld [vmem:[#allocation2 + $0x170] sm:$0xf0]  ;;  %v2686_v10 = vld [vmem:[#allocation2 + $0x148] sm:$0xf] }
  0xbc   : > { %v2683_v45 = vor.u32 %v3126_v7, %v2680_v9  ;;  %v2687_v16 = vor.u32 %v3133_v11, %v2686_v10  ;;  %v3769_v11 = vld [vmem:[%s4005_s4] sm:$0xff] }
  0xbd   : > { %1189 = vmatmul.bf16.vlgmr.msra.gmra.mxu0 %v3715_v12  ;;  %1207 = vmatmul.bf16.vlgmr.msra.gmra.mxu1 %v3715_v12  ;;  %v681_v13 = vperm.slane %v3769_v11, 4  ;;  %v682_v14 = vperm.slane %v3769_v11, 5  ;;  %v683_v28 = vperm.slane %v3769_v11, 6  ;;  %v678_v36 = vperm.slane %v3769_v11, 1 }
  0xbe   : > { %1225 = vmatmul.bf16.vlgmr.msra.gmra.mxu2 %v3715_v12  ;;  %1243 = vmatmul.bf16.vlgmr.msra.gmra.mxu3 %v3715_v12 }
  0xbf   : > { %1325 = vmatpush.bf16.msra.mxu0 %v2871_v22  ;;  %1343 = vmatpush.bf16.msra.mxu1 %v2875_v48  ;;  %v3114_v22 = vld [vmem:[#allocation2 + $0xe4] sm:$0xf]  ;;  %v2638_v48 = vld [vmem:[#allocation2 + $0xe8] sm:$0xf] }
  0xc0   : > { %1361 = vmatpush.bf16.msra.mxu2 %v2879_v24  ;;  %1379 = vmatpush.bf16.msra.mxu3 %v2883_v0  ;;  %v2635_v26 = vor.u32 %v3114_v22, %v2632_v23  ;;  %v3121_v24 = vld [vmem:[#allocation2 + $0x114] sm:$0xf0]  ;;  %v3102_v0 = vld [vmem:[#allocation2 + $0x84] sm:$0xf] }
  0xc1   : > { %v2639_v29 = vor.u32 %v3121_v24, %v2638_v48  ;;  %v2587_v33 = vor.u32 %v3102_v0, %v2584_v18 }
  0xc3   : > { %1326 = vmatpush.bf16.msra.mxu0 %v2823_v20  ;;  %1344 = vmatpush.bf16.msra.mxu1 %v2827_v31  ;;  %v2590_v20 = vld [vmem:[#allocation2 + $0x88] sm:$0xf]  ;;  %v3109_v31 = vld [vmem:[#allocation2 + $0xb4] sm:$0xf0] }
  0xc4   : > { %1362 = vmatpush.bf16.msra.mxu2 %v2831_v35  ;;  %1380 = vmatpush.bf16.msra.mxu3 %v2835_v39  ;;  %v2592_v35 = vld [vmem:[#allocation2 + $0xb8] sm:$0xf0]  ;;  %v2536_v39 = vld [vmem:[#allocation2 + $0x50] sm:$0xf0]  ;;  %v2591_v41 = vor.u32 %v3109_v31, %v2590_v20 }
  0xc5   : > { %v2595_v42 = vor.u32 %v3103_v34, %v2592_v35  ;;  %v2539_v46 = vor.u32 %v3090_v38, %v2536_v39  ;;  %v677_v35 = vperm.slane %v3769_v11, 0 }
  0xc7   : > { %1327 = vmatpush.bf16.msra.mxu0 %v2775_v50  ;;  %1345 = vmatpush.bf16.msra.mxu1 %v2779_v51  ;;  %v2544_v50 = vld [vmem:[#allocation2 + $0x58] sm:$0xf0]  ;;  %v2543_v51 = vor.u32 %v3097_v47, %v2542_v43 }
  0xc8   : > { %1363 = vmatpush.bf16.msra.mxu2 %v2783_v54  ;;  %1381 = vmatpush.bf16.msra.mxu3 %v2787_v55  ;;  %v2547_v52 = vor.u32 %v3091_v49, %v2544_v50 }
  0xcb   : > { %1328 = vmatpush.bf16.msra.mxu0 %v2727_v21  ;;  %1346 = vmatpush.bf16.msra.mxu1 %v2731_v60 }
  0xcc   : > { %1364 = vmatpush.bf16.msra.mxu2 %v2735_v2  ;;  %1382 = vmatpush.bf16.msra.mxu3 %v2739_v4 }
  0xcd   : > { %1194 = vmatmul.bf16.gmra.mxu0 %v3728_v63  ;;  %1212 = vmatmul.bf16.gmra.mxu1 %v3728_v63 }
  0xce   : > { %1230 = vmatmul.bf16.gmra.mxu2 %v3728_v63  ;;  %1248 = vmatmul.bf16.gmra.mxu3 %v3728_v63 }
  0xcf   : > { %1329 = vmatpush.bf16.msra.mxu0 %v2679_v40  ;;  %1347 = vmatpush.bf16.msra.mxu1 %v2683_v45  ;;  %v3772_v45 = vperm.slane %v3769_v11, 7 }
  0xd0   : > { %1365 = vmatpush.bf16.msra.mxu2 %v2687_v16  ;;  %1383 = vmatpush.bf16.msra.mxu3 %v2691_v17 }
  0xd3   : > { %1330 = vmatpush.bf16.msra.mxu0 %v2631_v25  ;;  %1348 = vmatpush.bf16.msra.mxu1 %v2635_v26 }
  0xd4   : > { %1366 = vmatpush.bf16.msra.mxu2 %v2639_v29  ;;  %1384 = vmatpush.bf16.msra.mxu3 %v2643_v30 }
  0xd7   : > { %1331 = vmatpush.bf16.msra.mxu0 %v2583_v32  ;;  %1349 = vmatpush.bf16.msra.mxu1 %v2587_v33 }
  0xd8   : > { %1367 = vmatpush.bf16.msra.mxu2 %v2591_v41  ;;  %1385 = vmatpush.bf16.msra.mxu3 %v2595_v42 }
  0xdb   : > { %1332 = vmatpush.bf16.msra.mxu0 %v2535_v44  ;;  %1350 = vmatpush.bf16.msra.mxu1 %v2539_v46 }
  0xdc   : > { %1368 = vmatpush.bf16.msra.mxu2 %v2543_v51  ;;  %1386 = vmatpush.bf16.msra.mxu3 %v2547_v52 }
  0xdd   : > { %1261 = vmatmul.bf16.vlgmr.msrb.gmra.mxu0 %v3715_v12  ;;  %1279 = vmatmul.bf16.vlgmr.msrb.gmra.mxu1 %v3715_v12 }
  0xde   : > { %1297 = vmatmul.bf16.vlgmr.msrb.gmra.mxu2 %v3715_v12  ;;  %1315 = vmatmul.bf16.vlgmr.msrb.gmra.mxu3 %v3715_v12 }
  0xed   : > { %1266 = vmatmul.bf16.gmra.mxu0 %v3728_v63  ;;  %1284 = vmatmul.bf16.gmra.mxu1 %v3728_v63 }
  0xee   : > { %1302 = vmatmul.bf16.gmra.mxu2 %v3728_v63  ;;  %1320 = vmatmul.bf16.gmra.mxu3 %v3728_v63 }
  0xfd   : > { %1333 = vmatmul.bf16.vlgmr.msra.gmra.mxu0 %v3715_v12  ;;  %1351 = vmatmul.bf16.vlgmr.msra.gmra.mxu1 %v3715_v12 }
  0xfe   : > { %1369 = vmatmul.bf16.vlgmr.msra.gmra.mxu2 %v3715_v12  ;;  %1387 = vmatmul.bf16.vlgmr.msra.gmra.mxu3 %v3715_v12 }
 0x10d   : > { %1338 = vmatmul.bf16.gmra.mxu0 %v3728_v63  ;;  %1356 = vmatmul.bf16.gmra.mxu1 %v3728_v63 }
 0x10e   : > { %1374 = vmatmul.bf16.gmra.mxu2 %v3728_v63  ;;  %1392 = vmatmul.bf16.gmra.mxu3 %v3728_v63 }
 0x13a   : > { %v1190_v54 = vpop.f32.mrf.mxu0  ;;  %v1208_v55 = vpop.f32.mrf.mxu1 }
 0x13b   : > { %v1191_v43 = vadd.f32 %v1190_v54, %v677_v35  ;;  %v1209_v44 = vadd.f32 %v1208_v55, %v678_v36 }
 0x141   : > { %v3750_v56 = vpop.f32.mrf.mxu2  ;;  %v3752_v3 = vpop.f32.mrf.mxu3 }
 0x142   : > { %v1192_v53 = vpop.f32.mrf.mxu0  ;;  %v1210_v58 = vpop.f32.mrf.mxu1 }
 0x143   : > { %v1193_v38 = vadd.f32 %v1192_v53, %v677_v35  ;;  %v1211_v39 = vadd.f32 %v1210_v58, %v678_v36 }
 0x145   : > { %v1400_v50 = vpack.c.bf16 %v1193_v38, %v1191_v43  ;;  %v1511_v51 = vpack.c.bf16 %v1211_v39, %v1209_v44 }
 0x149   : > { %v3754_v59 = vpop.f32.mrf.mxu2  ;;  %v3756_v21 = vpop.f32.mrf.mxu3 }
 0x14a   : > { %v3758_v12 = vpop.f32.mrf.mxu0  ;;  %v3760_v60 = vpop.f32.mrf.mxu1 }
 0x151   : > { %v3762_v61 = vpop.f32.mrf.mxu2  ;;  %v3764_v57 = vpop.f32.mrf.mxu3 }
 0x152   : > { %v1197_v62 = vpop.f32.mrf.mxu0  ;;  %v1215_v63 = vpop.f32.mrf.mxu1 }
 0x153   : > { %v674_v62 = vld [vmem:[%s4005_s4 + $0x8] sm:$0xf] }
 0x154   : > { %v687_v53 = vperm.slane %v674_v62, 2 }
 0x159   : > { %v1233_v2 = vpop.f32.mrf.mxu2  ;;  %v1251_v4 = vpop.f32.mrf.mxu3 }
 0x15a   : > { %v1262_v5 = vpop.f32.mrf.mxu0  ;;  %v1280_v6 = vpop.f32.mrf.mxu1 }
 0x15b   : > { %v1263_v31 = vadd.f32 %v1262_v5, %v681_v13  ;;  %v1281_v32 = vadd.f32 %v1280_v6, %v682_v14  ;;  %v1196_v5 = vadd.f32 %v3758_v12, %v677_v35  ;;  %v1214_v6 = vadd.f32 %v3760_v60, %v678_v36 }
 0x161   : > { %v1298_v7 = vpop.f32.mrf.mxu2  ;;  %v1316_v40 = vpop.f32.mrf.mxu3 }
 0x162   : > { %v1264_v9 = vpop.f32.mrf.mxu0  ;;  %v1282_v10 = vpop.f32.mrf.mxu1  ;;  %v3777_v17 = vadd.f32 %v1316_v40, %v3772_v45  ;;  %v1299_v52 = vadd.f32 %v1298_v7, %v683_v28  ;;  %v685_v7 = vperm.slane %v674_v62, 0  ;;  %v686_v40 = vperm.slane %v674_v62, 1 }
 0x163   : > { %v1265_v1 = vadd.f32 %v1264_v9, %v681_v13  ;;  %v1283_v19 = vadd.f32 %v1282_v10, %v682_v14 }
 0x165   : > { %v1402_v33 = vpack.c.bf16 %v1265_v1, %v1263_v31  ;;  %v1513_v34 = vpack.c.bf16 %v1283_v19, %v1281_v32 }
 0x169   : > { %v1300_v15 = vpop.f32.mrf.mxu2  ;;  %v1318_v16 = vpop.f32.mrf.mxu3 }
 0x16a   : > { %v3780_v8 = vadd.f32 %v1318_v16, %v3772_v45  ;;  %v1267_v22 = vpop.f32.mrf.mxu0  ;;  %v1285_v23 = vpop.f32.mrf.mxu1  ;;  %v1301_v46 = vadd.f32 %v1300_v15, %v683_v28 }
 0x16b   : > { %v1268_v25 = vadd.f32 %v1267_v22, %v681_v13  ;;  %v1286_v26 = vadd.f32 %v1285_v23, %v682_v14  ;;  %v1401_v23 = vpack.c.bf16 %v1196_v5, %v1196_v5 }
 0x16c   : > { %v1928_v48 = vpack.c.bf16 %v3780_v8, %v3777_v17  ;;  %v1752_v63 = vpack.c.bf16 %v1301_v46, %v1299_v52 }
 0x16d   : > { %v1403_v24 = vpack.c.bf16 %v1268_v25, %v1268_v25  ;;  %v1514_v27 = vpack.c.bf16 %v1286_v26, %v1286_v26  ;;  %v1512_v25 = vpack.c.bf16 %v1214_v6, %v1214_v6 }
 0x16f   : > { %1410 = vmatpush.bf16.xpose.msrb.mxu0 %v1403_v24  ;;  %1521 = vmatpush.bf16.xpose.msrb.mxu2 %v1514_v27 }
 0x171   : > { %v1303_v0 = vpop.f32.mrf.mxu2  ;;  %v3785_v18 = vpop.f32.mrf.mxu3 }
 0x172   : > { %v1304_v29 = vadd.f32 %v1303_v0, %v683_v28  ;;  %v1269_v30 = vpop.f32.mrf.mxu0  ;;  %v1287_v20 = vpop.f32.mrf.mxu1 }
 0x174   : > { %v1753_v37 = vpack.c.bf16 %v1304_v29, %v1304_v29  ;;  %v688_v29 = vperm.slane %v674_v62, 3 }
 0x177   : > { %1411 = vmatpush.bf16.xpose.msrb.mxu0 %v1402_v33  ;;  %1522 = vmatpush.bf16.xpose.msrb.mxu2 %v1513_v34 }
 0x179   : > { %v1305_v41 = vpop.f32.mrf.mxu2  ;;  %v1323_v42 = vpop.f32.mrf.mxu3 }
 0x17a   : > { %v1334_v47 = vpop.f32.mrf.mxu0  ;;  %v1352_v49 = vpop.f32.mrf.mxu1  ;;  %v679_v41 = vperm.slane %v3769_v11, 2 }
 0x17b   : > { %v1335_v19 = vadd.f32 %v1334_v47, %v685_v7  ;;  %v1353_v0 = vadd.f32 %v1352_v49, %v686_v40 }
 0x17c   : > { %v1229_v46 = vadd.f32 %v3754_v59, %v679_v41  ;;  %v1232_v62 = vadd.f32 %v3762_v61, %v679_v41 }
 0x17e   : > { %1412 = vmatmul.bf16.vlgmr.msrb.gmra.mxu0 %v1400_v50  ;;  %1523 = vmatmul.bf16.vlgmr.msrb.gmra.mxu2 %v1511_v51  ;;  %v1227_v51 = vadd.f32 %v3750_v56, %v679_v41  ;;  %v3188_v41 = vld [vmem:[#allocation4 + $0x30] sm:$0xff] }
 0x17f   : > { %1760 = vmatpush.bf16.xpose.msra.mxu2 %v1753_v37 }
 0x180   : > { %v1750_v52 = vpack.c.bf16 %v1229_v46, %v1227_v51 }
 0x181   : > { %v1370_v58 = vpop.f32.mrf.mxu2  ;;  %v1388_v2 = vpop.f32.mrf.mxu3 }
 0x182   : > { %v3792_v4 = vadd.f32 %v1370_v58, %v687_v53  ;;  %v1336_v54 = vpop.f32.mrf.mxu0  ;;  %v1354_v55 = vpop.f32.mrf.mxu1  ;;  %v1389_v44 = vadd.f32 %v1388_v2, %v688_v29 }
 0x183   : > { %v1337_v27 = vadd.f32 %v1336_v54, %v685_v7  ;;  %v1355_v60 = vadd.f32 %v1354_v55, %v686_v40 }
 0x185   : > { %v1463_v31 = vpack.c.bf16 %v1337_v27, %v1335_v19  ;;  %v1571_v32 = vpack.c.bf16 %v1355_v60, %v1353_v0 }
 0x187   : > { %1761 = vmatpush.bf16.xpose.msra.mxu2 %v1752_v63  ;;  %v1751_v63 = vpack.c.bf16 %v1232_v62, %v1232_v62 }
 0x189   : > { %v1372_v9 = vpop.f32.mrf.mxu2  ;;  %v1390_v10 = vpop.f32.mrf.mxu3 }
 0x18a   : > { %v3796_v13 = vadd.f32 %v1372_v9, %v687_v53  ;;  %v1339_v14 = vpop.f32.mrf.mxu0  ;;  %v1357_v15 = vpop.f32.mrf.mxu1  ;;  %v1391_v39 = vadd.f32 %v1390_v10, %v688_v29 }
 0x18b   : > { %v1340_v16 = vadd.f32 %v1339_v14, %v685_v7  ;;  %v1358_v22 = vadd.f32 %v1357_v15, %v686_v40 }
 0x18c   : > { %v1810_v26 = vpack.c.bf16 %v3796_v13, %v3792_v4  ;;  %v1986_v47 = vpack.c.bf16 %v1391_v39, %v1389_v44  ;;  %v3189_v39 = vld [vmem:[#allocation4 + $0x38] sm:$0xff]  ;;  %v3194_v4 = vld [vmem:[#allocation4 + $0x60] sm:$0xff] }
 0x18d   : > { %v1464_v24 = vpack.c.bf16 %v1340_v16, %v1340_v16  ;;  %v1572_v12 = vpack.c.bf16 %v1358_v22, %v1358_v22  ;;  %v3193_v13 = vld [vmem:[#allocation4 + $0x58] sm:$0xff] }
 0x18e   : > { %1417 = vmatmul.bf16.gmra.mxu0 %v1401_v23  ;;  %1528 = vmatmul.bf16.gmra.mxu2 %v1512_v25 }
 0x18f   : > { %v1473_v28 = vsel %vm1471_vm9, %v1464_v24, 0  ;;  %v1580_v1 = vsel %vm1471_vm9, %v1572_v12, 0 }
 0x190   : > { %1481 = vmatpush.bf16.msrb.mxu1 %v1473_v28  ;;  %1588 = vmatpush.bf16.msrb.mxu3 %v1580_v1 }
 0x191   : > { %v1375_v30 = vpop.f32.mrf.mxu2  ;;  %v1393_v20 = vpop.f32.mrf.mxu3 }
 0x192   : > { %v1376_v33 = vadd.f32 %v1375_v30, %v687_v53  ;;  %v1394_v34 = vadd.f32 %v1393_v20, %v688_v29  ;;  %v1341_v35 = vpop.f32.mrf.mxu0  ;;  %v1359_v36 = vpop.f32.mrf.mxu1  ;;  %v1397_v53 = vlaneseq }
 0x194   : > { %v1811_v37 = vpack.c.bf16 %v1376_v33, %v1376_v33  ;;  %v1987_v38 = vpack.c.bf16 %v1394_v34, %v1394_v34  ;;  %1482 = vmatpush.bf16.msrb.mxu1 %v1463_v31  ;;  %1589 = vmatpush.bf16.msrb.mxu3 %v1571_v32  ;;  %v3810_v58 = vand.u32 127, %v1397_v53 }
 0x196   : > { %v3804_v42 = vsel %vm1471_vm9, %v1811_v37, 0  ;;  %v1995_v43 = vsel %vm1471_vm9, %v1987_v38, 0  ;;  %vm1399_vm10 = vcmp.lt.s32.totalorder %v3810_v58, 17 }
 0x197   : > { %2003 = vmatpush.bf16.msrb.mxu2 %v1995_v43 }
 0x198   : > { %1732 = vmatpush.bf16.msra.mxu1 %v3189_v39  ;;  %3230 = vmatpush.bf16.msra.mxu3 %v3189_v39 }
 0x199   : > { %v1377_v49 = vpop.f32.mrf.mxu2  ;;  %v1395_v50 = vpop.f32.mrf.mxu3 }
 0x19b   : > { %2004 = vmatpush.bf16.msrb.mxu2 %v1986_v47  ;;  %v3187_v47 = vld [vmem:[#allocation4 + $0x28] sm:$0xff] }
 0x19c   : > { %1733 = vmatpush.bf16.msra.mxu1 %v3188_v41  ;;  %3231 = vmatpush.bf16.msra.mxu3 %v3188_v41 }
 0x19e   : > { %1762 = vmatmul.bf16.vlgmr.msra.gmra.mxu2 %v1750_v52 }
 0x1a0   : > { %1734 = vmatpush.bf16.msra.mxu1 %v3187_v47  ;;  %3232 = vmatpush.bf16.msra.mxu3 %v3187_v47 }
 0x1ae   : > { %1767 = vmatmul.bf16.gmra.mxu2 %v1751_v63 }
 0x1fb   : > { %v1413_v2 = vpop.f32.mrf.mxu0 }
 0x1fc   : > { %v1424_v59 = vsel %vm1399_vm10, %v1413_v2, -1e+30 }
 0x1fd   : > { %v1428_v54 = vsel %vm1427_vm11, %v1424_v59, -inf }
 0x1fe   : > { %1429 = vmax.xlane.f32.xlu0 %v1428_v54  ;;  %v3185_v54 = vld [vmem:[#allocation4 + $0x18] sm:$0xff] }
 0x201   : > { %v1524_v56 = vpop.f32.mrf.mxu2 }
 0x202   : > { %v3834_v35 = vsel %vm1399_vm10, %v1524_v56, -1e+30  ;;  %v3184_v56 = vld [vmem:[#allocation4 + $0x10] sm:$0xff] }
 0x203   : > { %v1415_v55 = vpop.f32.mrf.mxu0  ;;  %v1536_v37 = vsel %vm1427_vm11, %v3834_v35, -inf }
 0x204   : > { %v1425_v61 = vsel %vm1399_vm10, %v1415_v55, -1e+30  ;;  %v3183_v55 = vld [vmem:[#allocation4 + $0x8] sm:$0xff] }
 0x205   : > { %v1431_v5 = vsel %vm1427_vm11, %v1425_v61, -inf }
 0x206   : > { %1432 = vmax.xlane.f32.xlu1 %v1431_v5 }
 0x209   : > { %v1526_v6 = vpop.f32.mrf.mxu2 }
 0x20a   : > { %v1534_v14 = vsel %vm1399_vm10, %v1526_v6, -1e+30 }
 0x20b   : > { %v1418_v7 = vpop.f32.mrf.mxu0  ;;  %v1539_v16 = vsel %vm1427_vm11, %v1534_v14, -inf }
 0x20c   : > { %v1426_v40 = vsel %vm1399_vm10, %v1418_v7, -1e+30 }
 0x20d   : > { %v1434_v9 = vsel %vm1427_vm11, %v1426_v40, -inf }
 0x20e   : > { %1435 = vmax.xlane.f32.xlu1 %v1434_v9  ;;  %v1322_v9 = vadd.f32 %v3785_v18, %v3772_v45 }
 0x211   : > { %v1529_v10 = vpop.f32.mrf.mxu2 }
 0x212   : > { %v3844_v44 = vsel %vm1399_vm10, %v1529_v10, -1e+30 }
 0x213   : > { %v1420_v15 = vpop.f32.mrf.mxu0  ;;  %v1542_v49 = vsel %vm1427_vm11, %v3844_v44, -inf }
 0x216   : > { %1540 = vmax.xlane.f32.xlu1 %v1539_v16 }
 0x219   : > { %v1531_v22 = vpop.f32.mrf.mxu2 }
 0x21a   : > { %v1929_v22 = vpack.c.bf16 %v1322_v9, %v1322_v9 }
 0x221   : > { %v1763_v23 = vpop.f32.mrf.mxu2 }
 0x222   : > { %v1772_v51 = vsel %vm1399_vm10, %v1763_v23, -1e+30 }
 0x223   : > { %v1775_v52 = vsel %vm1427_vm11, %v1772_v51, -inf }
 0x229   : > { %v3825_v25 = vpop.f32.mrf.mxu2 }
 0x231   : > { %v1768_v24 = vpop.f32.mrf.mxu2 }
 0x232   : > { %v1774_v53 = vsel %vm1399_vm10, %v1768_v24, -1e+30 }
 0x233   : > { %v1781_v2 = vsel %vm1427_vm11, %v1774_v53, -inf }
 0x239   : > { %v1770_v12 = vpop.f32.mrf.mxu2 }
 0x271   : > { %v1430_v27 = vpop.xlane.xlu0 %1429 }
 0x272   : > { %v1437_v60 = vsub.f32 %v1424_v59, %v1430_v27  ;;  %v3186_v59 = vld [vmem:[#allocation4 + $0x20] sm:$0xff] }
 0x273   : > { %1735 = vmatpush.bf16.msra.mxu1 %v3186_v59  ;;  %3233 = vmatpush.bf16.msra.mxu3 %v3186_v59 }
 0x274   : > { %v1440_v28 = vmul.f32 1.442695, %v1437_v60 }
 0x276   : > { %3303 = vpow2.f32 %v1440_v28 }
 0x277   : > { %1736 = vmatpush.bf16.msra.mxu1 %v3185_v54  ;;  %3234 = vmatpush.bf16.msra.mxu3 %v3185_v54 }
 0x279   : > { %v1433_v1 = vpop.xlane.xlu1 %1432 }
 0x27a   : > { %v1438_v19 = vsub.f32 %v1425_v61, %v1433_v1  ;;  %v3182_v61 = vld [vmem:[#allocation4] sm:$0xff] }
 0x27b   : > { %1737 = vmatpush.bf16.msra.mxu1 %v3184_v56  ;;  %3235 = vmatpush.bf16.msra.mxu3 %v3184_v56 }
 0x27c   : > { %v3827_v0 = vpop.eup %3303  ;;  %v1442_v29 = vmul.f32 1.442695, %v1438_v19 }
 0x27d   : > { %v1446_v30 = vsel %vm1427_vm11, %v3827_v0, 0.0 }
 0x27e   : > { %3305 = vpow2.f32 %v1442_v29  ;;  %1447 = vadd.xlane.f32.xlu2 %v1446_v30 }
 0x27f   : > { %1738 = vmatpush.bf16.msra.mxu1 %v3183_v55  ;;  %3236 = vmatpush.bf16.msra.mxu3 %v3183_v55 }
 0x281   : > { %v1436_v20 = vpop.xlane.xlu1 %1435 }
 0x282   : > { %v1439_v31 = vsub.f32 %v1426_v40, %v1436_v20 }
 0x283   : > { %1739 = vmatpush.bf16.msra.mxu1 %v3182_v61  ;;  %3237 = vmatpush.bf16.msra.mxu3 %v3182_v61 }
 0x284   : > { %v3306_v32 = vpop.eup %3305  ;;  %v1444_v33 = vmul.f32 1.442695, %v1439_v31 }
 0x285   : > { %v1449_v34 = vsel %vm1427_vm11, %v3306_v32, 0.0 }
 0x286   : > { %3307 = vpow2.f32 %v1444_v33  ;;  %1450 = vadd.xlane.f32.xlu0 %v1449_v34  ;;  %v680_v33 = vperm.slane %v3769_v11, 3 }
 0x288   : > { %v1247_v34 = vadd.f32 %v3756_v21, %v680_v33  ;;  %v1250_v39 = vadd.f32 %v3764_v57, %v680_v33 }
 0x289   : > { %v1541_v43 = vpop.xlane.xlu1 %1540 }
 0x28a   : > { %v1546_v46 = vsub.f32 %v1534_v14, %v1541_v43  ;;  %v1927_v41 = vpack.c.bf16 %v1250_v39, %v1250_v39  ;;  %v3195_v39 = vld [vmem:[#allocation4 + $0x68] sm:$0xff] }
 0x28c   : > { %v3836_v36 = vpop.eup %3307  ;;  %v1550_v50 = vmul.f32 1.442695, %v1546_v46 }
 0x28d   : > { %v1452_v38 = vsel %vm1427_vm11, %v3836_v36, 0.0 }
 0x28e   : > { %1537 = vmax.xlane.f32.xlu0 %v1536_v37  ;;  %1453 = vadd.xlane.f32.xlu2 %v1452_v38  ;;  %3309 = vpow2.f32 %v1550_v50 }
 0x294   : > { %v3851_v62 = vpop.eup %3309 }
 0x295   : > { %v1557_v63 = vsel %vm1427_vm11, %v3851_v62, 0.0 }
 0x296   : > { %1543 = vmax.xlane.f32.xlu2 %v1542_v49 }
 0x29e   : > { %1776 = vmax.xlane.f32.xlu2 %v1775_v52  ;;  %v1773_v52 = vsel %vm1399_vm10, %v3825_v25, -1e+30 }
 0x2a6   : > { %1558 = vadd.xlane.f32.xlu2 %v1557_v63 }
 0x2ae   : > { %1782 = vmax.xlane.f32.xlu2 %v1781_v2 }
 0x2f1   : > { %v1448_v5 = vpop.xlane.xlu2 %1447 }
 0x2f2   : > { %3311 = vrcp.f32 %v1448_v5 }
 0x2f8   : > { %v3312_v7 = vpop.eup %3311 }
 0x2f9   : > { %v1451_v6 = vpop.xlane.xlu0 %1450  ;;  %v1458_v10 = vmul.f32 %v3312_v7, %v3827_v0 }
 0x2fa   : > { %3313 = vrcp.f32 %v1451_v6 }
 0x300   : > { %v3314_v40 = vpop.eup %3313 }
 0x301   : > { %v1459_v14 = vmul.f32 %v3314_v40, %v3306_v32  ;;  %v1454_v15 = vpop.xlane.xlu2 %1453  ;;  %v1538_v47 = vpop.xlane.xlu0 %1537 }
 0x302   : > { %3315 = vrcp.f32 %v1454_v15  ;;  %v1545_v49 = vsub.f32 %v3834_v35, %v1538_v47  ;;  %v3191_v47 = vld [vmem:[#allocation4 + $0x48] sm:$0xff] }
 0x303   : > { %v1461_v16 = vpack.c.bf16 %v1459_v14, %v1458_v10 }
 0x305   : > { %2884 = vmatmul.msk.bf16.vlgmr.msrb.gmra.mxu1 %vm1427_vm11, %v1461_v16 }
 0x306   : > { %1936 = vmatpush.bf16.xpose.msrb.mxu1 %v1929_v22 }
 0x308   : > { %v3316_v24 = vpop.eup %3315 }
 0x309   : > { %v1544_v23 = vpop.xlane.xlu2 %1543  ;;  %v1460_v12 = vmul.f32 %v3316_v24, %v3836_v36  ;;  %v1245_v36 = vadd.f32 %v3752_v3, %v680_v33 }
 0x30a   : > { %v1547_v11 = vsub.f32 %v3844_v44, %v1544_v23  ;;  %v1778_v44 = vsel %vm1427_vm11, %v1773_v52, -inf }
 0x30b   : > { %v1462_v18 = vpack.c.bf16 %v1460_v12, %v1460_v12  ;;  %v1926_v38 = vpack.c.bf16 %v1247_v34, %v1245_v36 }
 0x30c   : > { %v1552_v57 = vmul.f32 1.442695, %v1547_v11 }
 0x30e   : > { %1937 = vmatpush.bf16.xpose.msrb.mxu1 %v1928_v48 }
 0x311   : > { %v1777_v27 = vpop.xlane.xlu2 %1776 }
 0x312   : > { %v1784_v45 = vsub.f32 %v1772_v51, %v1777_v27  ;;  %v1548_v51 = vmul.f32 1.442695, %v1545_v49 }
 0x314   : > { %v1787_v60 = vmul.f32 1.442695, %v1784_v45 }
 0x315   : > { %2885 = vmatmul.msk.bf16.gmra.mxu1 %vm1427_vm11, %v1462_v18 }
 0x316   : > { %3317 = vpow2.f32 %v1787_v60 }
 0x319   : > { %v3867_v28 = vpop.xlane.xlu2 %1558 }
 0x31c   : > { %v3869_v1 = vpop.eup %3317 }
 0x31d   : > { %v1793_v19 = vsel %vm1427_vm11, %v3869_v1, 0.0 }
 0x31e   : > { %1794 = vadd.xlane.f32.xlu2 %v1793_v19 }
 0x321   : > { %v1783_v0 = vpop.xlane.xlu2 %1782 }
 0x322   : > { %v1786_v17 = vsub.f32 %v1774_v53, %v1783_v0 }
 0x324   : > { %v1791_v8 = vmul.f32 1.442695, %v1786_v17 }
 0x326   : > { %3319 = vpow2.f32 %v1791_v8 }
 0x327   : > { %3321 = vpow2.f32 %v1548_v51 }
 0x328   : > { %3323 = vpow2.f32 %v1552_v57 }
 0x32c   : > { %v3873_v48 = vpop.eup %3319 }
 0x32d   : > { %v1799_v29 = vsel %vm1427_vm11, %v3873_v48, 0.0  ;;  %v3322_v2 = vpop.eup %3321 }
 0x32e   : > { %1800 = vadd.xlane.f32.xlu2 %v1799_v29  ;;  %v3324_v59 = vpop.eup %3323  ;;  %v1554_v56 = vsel %vm1427_vm11, %v3322_v2, 0.0 }
 0x32f   : > { %v1560_v55 = vsel %vm1427_vm11, %v3324_v59, 0.0 }
 0x382   : > { %v1484_v30 = vpop.f32.mrf.mxu1 }
 0x38a   : > { %v1486_v20 = vpop.f32.mrf.mxu1 }
 0x38b   : > { %v1493_v31 = vpack.c.bf16 %v1486_v20, %v1484_v30 }
 0x38d   : > { %1740 = vmatmul.bf16.vlgmr.msra.gmra.mxu1 %v1493_v31 }
 0x391   : > { %v1795_v49 = vpop.xlane.xlu2 %1794 }
 0x392   : > { %v3877_v32 = vpop.f32.mrf.mxu1 }
 0x39a   : > { %v1491_v37 = vpop.f32.mrf.mxu1 }
 0x39b   : > { %v1494_v37 = vpack.c.bf16 %v3877_v32, %v3877_v32 }
 0x39d   : > { %1938 = vmatmul.bf16.vlgmr.msrb.gmra.mxu1 %v1926_v38  ;;  %v3197_v38 = vld [vmem:[#allocation4 + $0x78] sm:$0xff] }
 0x39e   : > { %1666 = vmatpush.bf16.msra.mxu0 %v3197_v38 }
 0x3ad   : > { %1943 = vmatmul.bf16.gmra.mxu1 %v1927_v41 }
 0x40a   : > { %v3883_v43 = vpop.f32.mrf.mxu1 }
 0x412   : > { %v3885_v46 = vpop.f32.mrf.mxu1 }
 0x41a   : > { %v1939_v50 = vpop.f32.mrf.mxu1 }
 0x41b   : > { %v1948_v3 = vsel %vm1399_vm10, %v1939_v50, -1e+30  ;;  %v3190_v50 = vld [vmem:[#allocation4 + $0x40] sm:$0xff] }
 0x41c   : > { %v1951_v21 = vsel %vm1427_vm11, %v1948_v3, -inf }
 0x41d   : > { %1952 = vmax.xlane.f32.xlu0 %v1951_v21 }
 0x422   : > { %v1941_v63 = vpop.f32.mrf.mxu1 }
 0x423   : > { %v1949_v35 = vsel %vm1399_vm10, %v1941_v63, -1e+30 }
 0x424   : > { %v1954_v53 = vsel %vm1427_vm11, %v1949_v35, -inf }
 0x425   : > { %1779 = vmax.xlane.f32.xlu0 %v1778_v44  ;;  %1955 = vmax.xlane.f32.xlu1 %v1954_v53  ;;  %v1801_v53 = vpop.xlane.xlu2 %1800 }
 0x42a   : > { %v1944_v54 = vpop.f32.mrf.mxu1 }
 0x42b   : > { %v1950_v25 = vsel %vm1399_vm10, %v1944_v54, -1e+30 }
 0x42c   : > { %v1957_v5 = vsel %vm1427_vm11, %v1950_v25, -inf }
 0x42d   : > { %1555 = vadd.xlane.f32.xlu1 %v1554_v56  ;;  %1561 = vadd.xlane.f32.xlu0 %v1560_v55 }
 0x432   : > { %v1946_v61 = vpop.f32.mrf.mxu1 }
 0x435   : > { %1958 = vmax.xlane.f32.xlu1 %v1957_v5 }
 0x490   : > { %v1953_v6 = vpop.xlane.xlu0 %1952 }
 0x491   : > { %v1960_v7 = vsub.f32 %v1948_v3, %v1953_v6 }
 0x493   : > { %v1963_v40 = vmul.f32 1.442695, %v1960_v7 }
 0x495   : > { %3325 = vpow2.f32 %v1963_v40  ;;  %v3205_v40 = vld [vmem:[#allocation4 + $0xb8] sm:$0xff] }
 0x498   : > { %v1780_v9 = vpop.xlane.xlu0 %1779  ;;  %v1956_v10 = vpop.xlane.xlu1 %1955 }
 0x499   : > { %v1785_v14 = vsub.f32 %v1773_v52, %v1780_v9  ;;  %v1961_v15 = vsub.f32 %v1949_v35, %v1956_v10  ;;  %v3213_v9 = vld [vmem:[#allocation4 + $0xf8] sm:$0xff] }
 0x49b   : > { %v3904_v16 = vpop.eup %3325  ;;  %v1789_v22 = vmul.f32 1.442695, %v1785_v14  ;;  %v1965_v23 = vmul.f32 1.442695, %v1961_v15  ;;  %v3204_v14 = vld [vmem:[#allocation4 + $0xb0] sm:$0xff] }
 0x49c   : > { %v1969_v58 = vsel %vm1427_vm11, %v3904_v16, 0.0  ;;  %v3212_v15 = vld [vmem:[#allocation4 + $0xf0] sm:$0xff] }
 0x49d   : > { %3327 = vpow2.f32 %v1789_v22  ;;  %1970 = vadd.xlane.f32.xlu0 %v1969_v58  ;;  %v3210_v58 = vld [vmem:[#allocation4 + $0xe0] sm:$0xff] }
 0x49e   : > { %3329 = vpow2.f32 %v1965_v23  ;;  %v3202_v23 = vld [vmem:[#allocation4 + $0xa0] sm:$0xff] }
 0x49f   : > { %3331 = vrcp.f32 %v3867_v28 }
 0x4a0   : > { %v1556_v24 = vpop.xlane.xlu1 %1555  ;;  %v1562_v30 = vpop.xlane.xlu0 %1561 }
 0x4a1   : > { %3333 = vrcp.f32 %v1556_v24  ;;  %v3201_v24 = vld [vmem:[#allocation4 + $0x98] sm:$0xff] }
 0x4a3   : > { %v3328_v12 = vpop.eup %3327 }
 0x4a4   : > { %v3330_v27 = vpop.eup %3329  ;;  %v1796_v45 = vsel %vm1427_vm11, %v3328_v12, 0.0 }
 0x4a5   : > { %1797 = vadd.xlane.f32.xlu0 %v1796_v45  ;;  %v1972_v18 = vsel %vm1427_vm11, %v3330_v27, 0.0  ;;  %v3332_v60 = vpop.eup %3331 }
 0x4a6   : > { %1973 = vadd.xlane.f32.xlu1 %v1972_v18  ;;  %v1567_v17 = vmul.f32 %v3332_v60, %v3851_v62 }
 0x4a7   : > { %v3334_v19 = vpop.eup %3333 }
 0x4a8   : > { %v1959_v0 = vpop.xlane.xlu1 %1958  ;;  %v1566_v8 = vmul.f32 %v3334_v19, %v3322_v2  ;;  %v3200_v19 = vld [vmem:[#allocation4 + $0x90] sm:$0xff] }
 0x4a9   : > { %v1962_v29 = vsub.f32 %v1950_v25, %v1959_v0  ;;  %v3208_v0 = vld [vmem:[#allocation4 + $0xd0] sm:$0xff] }
 0x4aa   : > { %v1569_v20 = vpack.c.bf16 %v1567_v17, %v1566_v8  ;;  %v3199_v17 = vld [vmem:[#allocation4 + $0x88] sm:$0xff] }
 0x4ab   : > { %v1967_v28 = vmul.f32 1.442695, %v1962_v29  ;;  %v3207_v8 = vld [vmem:[#allocation4 + $0xc8] sm:$0xff]  ;;  %v3198_v29 = vld [vmem:[#allocation4 + $0x80] sm:$0xff] }
 0x4ac   : > { %2886 = vmatmul.msk.bf16.vlgmr.msrb.gmra.mxu3 %vm1427_vm11, %v1569_v20 }
 0x4ad   : > { %3335 = vpow2.f32 %v1967_v28  ;;  %1827 = vmatpush.bf16.msrb.mxu3 %v3804_v42  ;;  %v3196_v42 = vld [vmem:[#allocation4 + $0x70] sm:$0xff] }
 0x4ae   : > { %3337 = vrcp.f32 %v1562_v30  ;;  %1667 = vmatpush.bf16.msra.mxu0 %v3196_v42  ;;  %v3206_v30 = vld [vmem:[#allocation4 + $0xc0] sm:$0xff] }
 0x4af   : > { %3339 = vrcp.f32 %v1795_v49 }
 0x4b1   : > { %1828 = vmatpush.bf16.msrb.mxu3 %v1810_v26  ;;  %v3192_v26 = vld [vmem:[#allocation4 + $0x50] sm:$0xff] }
 0x4b2   : > { %1668 = vmatpush.bf16.msra.mxu0 %v3195_v39 }
 0x4b3   : > { %v3336_v31 = vpop.eup %3335 }
 0x4b4   : > { %v3338_v33 = vpop.eup %3337  ;;  %v1975_v34 = vsel %vm1427_vm11, %v3336_v31, 0.0 }
 0x4b5   : > { %1976 = vadd.xlane.f32.xlu1 %v1975_v34  ;;  %v1568_v62 = vmul.f32 %v3338_v33, %v3324_v59  ;;  %v3340_v3 = vpop.eup %3339 }
 0x4b6   : > { %1669 = vmatpush.bf16.msra.mxu0 %v3194_v4  ;;  %v1805_v52 = vmul.f32 %v3340_v3, %v3869_v1 }
 0x4b7   : > { %v1570_v36 = vpack.c.bf16 %v1568_v62, %v1568_v62 }
 0x4ba   : > { %1670 = vmatpush.bf16.msra.mxu0 %v3193_v13 }
 0x4bc   : > { %2887 = vmatmul.msk.bf16.gmra.mxu3 %vm1427_vm11, %v1570_v36 }
 0x4be   : > { %1671 = vmatpush.bf16.msra.mxu0 %v3192_v26 }
 0x4c2   : > { %1672 = vmatpush.bf16.msra.mxu0 %v3191_v47 }
 0x4c6   : > { %1673 = vmatpush.bf16.msra.mxu0 %v3190_v50 }
 0x4ca   : > { %1905 = vmatpush.bf16.msrb.mxu0 %v3205_v40 }
 0x4cc   : > { %1745 = vmatmul.bf16.vlgmr.msra.gmra.mxu3 %v1494_v37 }
 0x4cd   : > { %2081 = vmatpush.bf16.msra.mxu3 %v3213_v9 }
 0x4ce   : > { %1906 = vmatpush.bf16.msrb.mxu0 %v3204_v14 }
 0x4d1   : > { %2082 = vmatpush.bf16.msra.mxu3 %v3212_v15  ;;  %v3221_v15 = vld [vmem:[%s4010_s9 + $0x38] sm:$0xff] }
 0x4d2   : > { %3238 = vmatpush.bf16.msra.mxu2 %v3221_v15 }
 0x510   : > { %v1971_v41 = vpop.xlane.xlu0 %1970 }
 0x511   : > { %3341 = vrcp.f32 %v1971_v41 }
 0x517   : > { %v3342_v21 = vpop.eup %3341 }
 0x518   : > { %v1798_v32 = vpop.xlane.xlu0 %1797  ;;  %v1981_v35 = vmul.f32 %v3342_v21, %v3904_v16  ;;  %v3211_v16 = vld [vmem:[#allocation4 + $0xe8] sm:$0xff]  ;;  %v3292_v21 = vld [vmem:[%s4007_s6] ss:$0 sm:$0xff] }
 0x519   : > { %3343 = vrcp.f32 %v1798_v32  ;;  %v1974_v11 = vpop.xlane.xlu1 %1973  ;;  %2083 = vmatpush.bf16.msra.mxu3 %v3211_v16  ;;  %v3219_v16 = vld [vmem:[%s4010_s9 + $0x28] sm:$0xff] }
 0x51a   : > { %3345 = vrcp.f32 %v1974_v11 }
 0x51b   : > { %3347 = vrcp.f32 %v1801_v53 }
 0x51d   : > { %2084 = vmatpush.bf16.msra.mxu3 %v3210_v58  ;;  %v3216_v58 = vld [vmem:[%s4010_s9 + $0x10] sm:$0xff] }
 0x51f   : > { %v3344_v51 = vpop.eup %3343 }
 0x520   : > { %v3346_v57 = vpop.eup %3345  ;;  %v1806_v63 = vmul.f32 %v3344_v51, %v3328_v12  ;;  %v3209_v12 = vld [vmem:[#allocation4 + $0xd8] sm:$0xff] }
 0x521   : > { %v1982_v44 = vmul.f32 %v3346_v57, %v3330_v27  ;;  %v3348_v56 = vpop.eup %3347  ;;  %2085 = vmatpush.bf16.msra.mxu3 %v3209_v12  ;;  %v3363_v57 = vld [vmem:[%s3607_s15] sm:$0xff] }
 0x522   : > { %v1808_v2 = vpack.c.bf16 %v1806_v63, %v1805_v52  ;;  %v1807_v55 = vmul.f32 %v3348_v56, %v3873_v48  ;;  %v3203_v48 = vld [vmem:[#allocation4 + $0xa8] sm:$0xff] }
 0x523   : > { %v1984_v59 = vpack.c.bf16 %v1982_v44, %v1981_v35  ;;  %1907 = vmatpush.bf16.msrb.mxu0 %v3203_v48  ;;  %v3220_v48 = vld [vmem:[%s4010_s9 + $0x30] sm:$0xff] }
 0x524   : > { %2952 = vmatmul.msk.bf16.vlgmr.msrb.gmra.mxu3 %vm1427_vm11, %v1808_v2  ;;  %v1809_v5 = vpack.c.bf16 %v1807_v55, %v1807_v55  ;;  %3239 = vmatpush.bf16.msra.mxu2 %v3220_v48 }
 0x525   : > { %2986 = vmatmul.msk.bf16.vlgmr.msrb.gmra.mxu2 %vm1427_vm11, %v1984_v59  ;;  %2086 = vmatpush.bf16.msra.mxu3 %v3208_v0 }
 0x527   : > { %1908 = vmatpush.bf16.msrb.mxu0 %v3202_v23  ;;  %v3217_v23 = vld [vmem:[%s4010_s9 + $0x18] sm:$0xff] }
 0x528   : > { %v1977_v54 = vpop.xlane.xlu1 %1976  ;;  %3240 = vmatpush.bf16.msra.mxu2 %v3219_v16 }
 0x529   : > { %3349 = vrcp.f32 %v1977_v54  ;;  %2087 = vmatpush.bf16.msra.mxu3 %v3207_v8  ;;  %v3364_v54 = vld [vmem:[%s3607_s15 + $0x8] sm:$0xff] }
 0x52b   : > { %1909 = vmatpush.bf16.msrb.mxu0 %v3201_v24 }
 0x52d   : > { %2088 = vmatpush.bf16.msra.mxu3 %v3206_v30 }
 0x52f   : > { %v3350_v25 = vpop.eup %3349  ;;  %v1591_v61 = vpop.f32.mrf.mxu3  ;;  %1910 = vmatpush.bf16.msrb.mxu0 %v3200_v19 }
 0x530   : > { %v1983_v1 = vmul.f32 %v3350_v25, %v3336_v31 }
 0x532   : > { %v1985_v6 = vpack.c.bf16 %v1983_v1, %v1983_v1 }
 0x533   : > { %1911 = vmatpush.bf16.msrb.mxu0 %v3199_v17  ;;  %v3214_v17 = vld [vmem:[%s4010_s9] sm:$0xff] }
 0x534   : > { %2953 = vmatmul.msk.bf16.gmra.mxu3 %vm1427_vm11, %v1809_v5 }
 0x535   : > { %2987 = vmatmul.msk.bf16.gmra.mxu2 %vm1427_vm11, %v1985_v6 }
 0x537   : > { %v1593_v7 = vpop.f32.mrf.mxu3  ;;  %1912 = vmatpush.bf16.msrb.mxu0 %v3198_v29 }
 0x538   : > { %v1600_v10 = vpack.c.bf16 %v1593_v7, %v1591_v61  ;;  %v3365_v7 = vld [vmem:[%s3607_s15 + $0x10] sm:$0xff] }
 0x53a   : > { %1674 = vmatmul.bf16.vlgmr.msra.gmra.mxu0 %v1600_v10 }
 0x53b   : > { %2262 = vmatpush.bf16.msra.mxu0 %v3221_v15 }
 0x53f   : > { %v1596_v22 = vpop.f32.mrf.mxu3  ;;  %2263 = vmatpush.bf16.msra.mxu0 %v3220_v48 }
 0x540   : > { %v1601_v45 = vpack.c.bf16 %v1596_v22, %v1596_v22  ;;  %v3218_v22 = vld [vmem:[%s4010_s9 + $0x20] sm:$0xff] }
 0x541   : > { %3241 = vmatpush.bf16.msra.mxu2 %v3218_v22 }
 0x543   : > { %2264 = vmatpush.bf16.msra.mxu0 %v3219_v16 }
 0x545   : > { %3242 = vmatpush.bf16.msra.mxu2 %v3217_v23 }
 0x547   : > { %v1598_v27 = vpop.f32.mrf.mxu3  ;;  %2265 = vmatpush.bf16.msra.mxu0 %v3218_v22 }
 0x549   : > { %3243 = vmatpush.bf16.msra.mxu2 %v3216_v58 }
 0x54a   : > { %1679 = vmatmul.bf16.gmra.mxu0 %v1601_v45 }
 0x54b   : > { %2266 = vmatpush.bf16.msra.mxu0 %v3217_v23 }
 0x54f   : > { %v1746_v18 = vpop.f32.mrf.mxu3  ;;  %2267 = vmatpush.bf16.msra.mxu0 %v3216_v58  ;;  %v3229_v58 = vld [vmem:[#allocation6 + $0x38] sm:$0xff] }
 0x550   : > { %2377 = vmatpush.bf16.msra.mxu1 %v3229_v58 }
 0x557   : > { %v1748_v60 = vpop.f32.mrf.mxu3 }
 0x558   : > { %v3215_v60 = vld [vmem:[%s4010_s9 + $0x8] sm:$0xff] }
 0x559   : > { %2268 = vmatpush.bf16.msra.mxu0 %v3215_v60  ;;  %3244 = vmatpush.bf16.msra.mxu2 %v3215_v60  ;;  %v3223_v60 = vld [vmem:[#allocation6 + $0x8] sm:$0xff] }
 0x55d   : > { %2269 = vmatpush.bf16.msra.mxu0 %v3214_v17  ;;  %3245 = vmatpush.bf16.msra.mxu2 %v3214_v17  ;;  %v3222_v17 = vld [vmem:[#allocation6] sm:$0xff] }
 0x5a7   : > { %v1830_v20 = vpop.f32.mrf.mxu3 }
 0x5a8   : > { %v2006_v28 = vpop.f32.mrf.mxu2 }
 0x5af   : > { %v1832_v31 = vpop.f32.mrf.mxu3 }
 0x5b0   : > { %v1839_v33 = vpack.c.bf16 %v1832_v31, %v1830_v20  ;;  %v2008_v34 = vpop.f32.mrf.mxu2 }
 0x5b1   : > { %v2015_v62 = vpack.c.bf16 %v2008_v34, %v2006_v28 }
 0x5b2   : > { %1913 = vmatmul.bf16.vlgmr.msrb.gmra.mxu0 %v1839_v33 }
 0x5b3   : > { %2089 = vmatmul.bf16.vlgmr.msra.gmra.mxu3 %v2015_v62 }
 0x5b7   : > { %v1835_v36 = vpop.f32.mrf.mxu3  ;;  %v1675_v37 = vpop.f32.mrf.mxu0 }
 0x5b8   : > { %v2011_v38 = vpop.f32.mrf.mxu2  ;;  %v1840_v39 = vpack.c.bf16 %v1835_v36, %v1835_v36  ;;  %v1742_v50 = vadd.f32 %v3883_v43, %v1675_v37 }
 0x5b9   : > { %v2016_v26 = vpack.c.bf16 %v2011_v38, %v2011_v38 }
 0x5bf   : > { %v1837_v42 = vpop.f32.mrf.mxu3  ;;  %v1677_v4 = vpop.f32.mrf.mxu0 }
 0x5c0   : > { %v2013_v13 = vpop.f32.mrf.mxu2  ;;  %v1744_v63 = vadd.f32 %v3885_v46, %v1677_v4 }
 0x5c2   : > { %1918 = vmatmul.bf16.gmra.mxu0 %v1840_v39 }
 0x5c3   : > { %2094 = vmatmul.bf16.gmra.mxu3 %v2016_v26 }
 0x5c7   : > { %v1680_v41 = vpop.f32.mrf.mxu0 }
 0x5c8   : > { %v1747_v55 = vadd.f32 %v1746_v18, %v1680_v41 }
 0x5cf   : > { %v1682_v47 = vpop.f32.mrf.mxu0 }
 0x62f   : > { %v1914_v49 = vpop.f32.mrf.mxu0 }
 0x630   : > { %v1923_v32 = vadd.f32 %v1914_v49, %v1742_v50 }
 0x636   : > { %v2090_v11 = vpop.f32.mrf.mxu3 }
 0x637   : > { %v2099_v3 = vadd.f32 %v2090_v11, %v1923_v32  ;;  %v1916_v51 = vpop.f32.mrf.mxu0 }
 0x638   : > { %v1924_v44 = vadd.f32 %v1916_v51, %v1744_v63  ;;  %v3293_v63 = vld [vmem:[%s4008_s7] ss:$0 sm:$0xff] }
 0x639   : > { %v2102_v52 = vadd.f32 %v3363_v57, %v2099_v3 }
 0x63b   : > { %v3934_v35 = vadd.f32 %v3292_v21, %v2102_v52 }
 0x63d   : > { %2114 = vadd.xlane.f32.xlu0 %v3934_v35  ;;  %v2123_v43 = vmul.f32 %v3934_v35, %v3934_v35 }
 0x63e   : > { %v2092_v53 = vpop.f32.mrf.mxu3 }
 0x63f   : > { %v2100_v2 = vadd.f32 %v2092_v53, %v1924_v44  ;;  %2126 = vadd.xlane.f32.xlu2 %v2123_v43  ;;  %v1919_v59 = vpop.f32.mrf.mxu0 }
 0x640   : > { %v1925_v61 = vadd.f32 %v1919_v59, %v1747_v55 }
 0x641   : > { %v2103_v56 = vadd.f32 %v3364_v54, %v2100_v2 }
 0x643   : > { %v3940_v25 = vadd.f32 %v3292_v21, %v2103_v56 }
 0x645   : > { %2116 = vadd.xlane.f32.xlu1 %v3940_v25  ;;  %v2124_v46 = vmul.f32 %v3940_v25, %v3940_v25 }
 0x646   : > { %v2095_v1 = vpop.f32.mrf.mxu3 }
 0x647   : > { %v2101_v5 = vadd.f32 %v2095_v1, %v1925_v61  ;;  %2128 = vadd.xlane.f32.xlu0 %v2124_v46  ;;  %v1921_v6 = vpop.f32.mrf.mxu0  ;;  %v3294_v61 = vld [vmem:[%s4009_s8] ss:$0 sm:$0xff] }
 0x649   : > { %v2104_v40 = vadd.f32 %v3365_v7, %v2101_v5 }
 0x64b   : > { %v3946_v9 = vadd.f32 %v3292_v21, %v2104_v40 }
 0x64d   : > { %2118 = vadd.xlane.f32.xlu1 %v3946_v9  ;;  %v2125_v10 = vmul.f32 %v3946_v9, %v3946_v9 }
 0x64e   : > { %v2097_v14 = vpop.f32.mrf.mxu3 }
 0x64f   : > { %2130 = vadd.xlane.f32.xlu2 %v2125_v10 }
 0x6b0   : > { %v2115_v24 = vpop.xlane.xlu0 %2114 }
 0x6b1   : > { %v2120_v12 = vmul.f32 0.03125, %v2115_v24  ;;  %v3228_v24 = vld [vmem:[#allocation6 + $0x30] sm:$0xff] }
 0x6b2   : > { %v2127_v27 = vpop.xlane.xlu2 %2126  ;;  %2378 = vmatpush.bf16.msra.mxu1 %v3228_v24 }
 0x6b3   : > { %v2135_v45 = vmul.f32 %v2120_v12, %v2120_v12  ;;  %v2132_v18 = vmul.f32 0.03125, %v2127_v27  ;;  %v2141_v51 = vsub.f32 %v3934_v35, %v2120_v12  ;;  %v3227_v12 = vld [vmem:[#allocation6 + $0x28] sm:$0xff]  ;;  %v3226_v27 = vld [vmem:[#allocation6 + $0x20] sm:$0xff] }
 0x6b5   : > { %v2138_v19 = vsub.f32 %v2132_v18, %v2135_v45  ;;  %v3225_v45 = vld [vmem:[#allocation6 + $0x18] sm:$0xff]  ;;  %v3224_v18 = vld [vmem:[#allocation6 + $0x10] sm:$0xff] }
 0x6b6   : > { %2379 = vmatpush.bf16.msra.mxu1 %v3227_v12 }
 0x6b7   : > { %v2144_v0 = vadd.f32 1e-05, %v2138_v19  ;;  %v3295_v19 = vld [vmem:[%s4011_s10] ss:$0 sm:$0xff] }
 0x6b8   : > { %v2117_v8 = vpop.xlane.xlu1 %2116 }
 0x6b9   : > { %3351 = vrsqrt.f32 %v2144_v0  ;;  %v2121_v29 = vmul.f32 0.03125, %v2117_v8  ;;  %vm2153_vm13 = vweird.f32 %v2144_v0 }
 0x6ba   : > { %v2129_v30 = vpop.xlane.xlu0 %2128  ;;  %2380 = vmatpush.bf16.msra.mxu1 %v3226_v27 }
 0x6bb   : > { %v2136_v20 = vmul.f32 %v2121_v29, %v2121_v29  ;;  %v2133_v28 = vmul.f32 0.03125, %v2129_v30  ;;  %v2142_v2 = vsub.f32 %v3940_v25, %v2121_v29 }
 0x6bd   : > { %v2139_v31 = vsub.f32 %v2133_v28, %v2136_v20 }
 0x6be   : > { %2381 = vmatpush.bf16.msra.mxu1 %v3225_v45 }
 0x6bf   : > { %v3352_v33 = vpop.eup %3351  ;;  %v2145_v34 = vadd.f32 1e-05, %v2139_v31 }
 0x6c0   : > { %v2148_v62 = vmul.f32 %v3352_v33, %v2144_v0  ;;  %v2119_v36 = vpop.xlane.xlu1 %2118  ;;  %vm2154_vm12 = vweird.f32 %v3352_v33 }
 0x6c1   : > { %3353 = vrsqrt.f32 %v2145_v34  ;;  %v2122_v37 = vmul.f32 0.03125, %v2119_v36  ;;  %vm2155_vm14 = vmor %vm2153_vm13, %vm2154_vm12  ;;  %vm2163_vm0 = vweird.f32 %v2145_v34 }
 0x6c2   : > { %v2149_v38 = vmul.f32 %v3352_v33, %v2148_v62  ;;  %v2131_v42 = vpop.xlane.xlu2 %2130  ;;  %2382 = vmatpush.bf16.msra.mxu1 %v3224_v18 }
 0x6c3   : > { %v2137_v39 = vmul.f32 %v2122_v37, %v2122_v37  ;;  %v2134_v4 = vmul.f32 0.03125, %v2131_v42  ;;  %v2143_v10 = vsub.f32 %v3946_v9, %v2122_v37 }
 0x6c4   : > { %v2150_v13 = vmul.f32 0.5, %v2149_v38 }
 0x6c5   : > { %v2140_v26 = vsub.f32 %v2134_v4, %v2137_v39 }
 0x6c6   : > { %v2151_v41 = vsub.f32 1.5, %v2150_v13  ;;  %2383 = vmatpush.bf16.msra.mxu1 %v3223_v60 }
 0x6c7   : > { %v3354_v47 = vpop.eup %3353  ;;  %v2146_v49 = vadd.f32 1e-05, %v2140_v26 }
 0x6c8   : > { %v2152_v50 = vmul.f32 %v3352_v33, %v2151_v41  ;;  %v2158_v32 = vmul.f32 %v3354_v47, %v2145_v34  ;;  %vm2164_vm15 = vweird.f32 %v3354_v47 }
 0x6c9   : > { %3355 = vrsqrt.f32 %v2146_v49  ;;  %vm2165_vm1 = vmor %vm2163_vm0, %vm2164_vm15  ;;  %vm2173_vm3 = vweird.f32 %v2146_v49 }
 0x6ca   : > { %v2159_v11 = vmul.f32 %v3354_v47, %v2158_v32  ;;  %v2156_v3 = vsel %vm2155_vm14, %v3352_v33, %v2152_v50  ;;  %2384 = vmatpush.bf16.msra.mxu1 %v3222_v17 }
 0x6cb   : > { %v2177_v44 = vmul.f32 %v2156_v3, %v2141_v51 }
 0x6cc   : > { %v2160_v21 = vmul.f32 0.5, %v2159_v11 }
 0x6cd   : > { %v2183_v56 = vmul.f32 %v3293_v63, %v2177_v44 }
 0x6ce   : > { %v2161_v57 = vsub.f32 1.5, %v2160_v21 }
 0x6cf   : > { %v3356_v52 = vpop.eup %3355  ;;  %v2189_v6 = vadd.f32 %v3294_v61, %v2183_v56  ;;  %v3296_v56 = vld [vmem:[%s4013_s12] ss:$0 sm:$0xff] }
 0x6d0   : > { %v2162_v43 = vmul.f32 %v3354_v47, %v2161_v57  ;;  %v2168_v53 = vmul.f32 %v3356_v52, %v2146_v49  ;;  %vm2174_vm2 = vweird.f32 %v3356_v52 }
 0x6d1   : > { %vm2175_vm4 = vmor %vm2173_vm3, %vm2174_vm2 }
 0x6d2   : > { %v2166_v59 = vsel %vm2165_vm1, %v3354_v47, %v2162_v43  ;;  %v2169_v54 = vmul.f32 %v3356_v52, %v2168_v53 }
 0x6d3   : > { %v2178_v55 = vmul.f32 %v2166_v59, %v2142_v2 }
 0x6d4   : > { %v2170_v46 = vmul.f32 0.5, %v2169_v54 }
 0x6d5   : > { %v2184_v1 = vmul.f32 %v3293_v63, %v2178_v55 }
 0x6d6   : > { %v2171_v5 = vsub.f32 1.5, %v2170_v46 }
 0x6d7   : > { %v2190_v7 = vadd.f32 %v3294_v61, %v2184_v1 }
 0x6d8   : > { %v2172_v40 = vmul.f32 %v3356_v52, %v2171_v5 }
 0x6d9   : > { %v2192_v14 = vpack.c.bf16 %v2190_v7, %v2189_v6 }
 0x6da   : > { %v2176_v15 = vsel %vm2175_vm4, %v3356_v52, %v2172_v40 }
 0x6db   : > { %v2179_v48 = vmul.f32 %v2176_v15, %v2143_v10  ;;  %2270 = vmatmul.bf16.vlgmr.msra.gmra.mxu0 %v2192_v14 }
 0x6dd   : > { %v2185_v16 = vmul.f32 %v3293_v63, %v2179_v48 }
 0x6df   : > { %v2191_v22 = vadd.f32 %v3294_v61, %v2185_v16 }
 0x6e1   : > { %v2193_v23 = vpack.c.bf16 %v2191_v22, %v2191_v22 }
 0x6e3   : > { %2275 = vmatmul.bf16.vlgmr.msra.gmra.mxu2 %v2193_v23 }
 0x758   : > { %v2271_v0 = vpop.f32.mrf.mxu0 }
 0x759   : > { %v2272_v8 = vadd.f32 %v3295_v19, %v2271_v0 }
 0x75b   : > { %v2280_v29 = vmul.f32 %v2272_v8, %v2272_v8 }
 0x75d   : > { %v2283_v30 = vmul.f32 %v2280_v29, %v2272_v8 }
 0x75f   : > { %v2286_v20 = vmul.f32 0.044715, %v2283_v30 }
 0x760   : > { %v2273_v28 = vpop.f32.mrf.mxu0 }
 0x761   : > { %v2289_v31 = vadd.f32 %v2286_v20, %v2272_v8  ;;  %v2274_v33 = vadd.f32 %v3295_v19, %v2273_v28 }
 0x763   : > { %v2292_v34 = vmul.f32 0.7978846, %v2289_v31  ;;  %v2281_v62 = vmul.f32 %v2274_v33, %v2274_v33 }
 0x765   : > { %v2284_v36 = vmul.f32 %v2281_v62, %v2274_v33  ;;  %3357 = vtanh.f32 %v2292_v34 }
 0x766   : > { %v2276_v37 = vpop.f32.mrf.mxu2 }
 0x767   : > { %v2287_v38 = vmul.f32 0.044715, %v2284_v36  ;;  %v2277_v42 = vadd.f32 %v3295_v19, %v2276_v37 }
 0x769   : > { %v2290_v39 = vadd.f32 %v2287_v38, %v2274_v33  ;;  %v2282_v4 = vmul.f32 %v2277_v42, %v2277_v42 }
 0x76b   : > { %v2293_v13 = vmul.f32 0.7978846, %v2290_v39  ;;  %v2285_v26 = vmul.f32 %v2282_v4, %v2277_v42  ;;  %v3358_v41 = vpop.eup %3357 }
 0x76c   : > { %v2298_v32 = vadd.f32 1.0, %v3358_v41 }
 0x76d   : > { %3359 = vtanh.f32 %v2293_v13  ;;  %v2288_v47 = vmul.f32 0.044715, %v2285_v26 }
 0x76e   : > { %v2278_v49 = vpop.f32.mrf.mxu2  ;;  %v2301_v21 = vmul.f32 0.5, %v2298_v32 }
 0x76f   : > { %v2291_v50 = vadd.f32 %v2288_v47, %v2277_v42 }
 0x770   : > { %v2304_v52 = vmul.f32 %v2301_v21, %v2272_v8 }
 0x771   : > { %v2294_v11 = vmul.f32 0.7978846, %v2291_v50 }
 0x773   : > { %v3360_v3 = vpop.eup %3359  ;;  %3361 = vtanh.f32 %v2294_v11 }
 0x774   : > { %v2299_v51 = vadd.f32 1.0, %v3360_v3 }
 0x776   : > { %v2302_v57 = vmul.f32 0.5, %v2299_v51 }
 0x778   : > { %v2305_v63 = vmul.f32 %v2302_v57, %v2274_v33 }
 0x779   : > { %v3362_v43 = vpop.eup %3361 }
 0x77a   : > { %v2307_v44 = vpack.c.bf16 %v2305_v63, %v2304_v52  ;;  %v2300_v53 = vadd.f32 1.0, %v3362_v43 }
 0x77c   : > { %2385 = vmatmul.bf16.vlgmr.msra.gmra.mxu1 %v2307_v44  ;;  %v2303_v2 = vmul.f32 0.5, %v2300_v53 }
 0x77e   : > { %v2306_v59 = vmul.f32 %v2303_v2, %v2277_v42 }
 0x780   : > { %v2308_v54 = vpack.c.bf16 %v2306_v59, %v2306_v59 }
 0x78c   : > { %2390 = vmatmul.bf16.gmra.mxu1 %v2308_v54 }
 0x7f9   : > { %v2386_v55 = vpop.f32.mrf.mxu1 }
 0x7fa   : > { %v2387_v61 = vadd.f32 %v3296_v56, %v2386_v55 }
 0x7fc   : > { %v2395_v46 = vadd.f32 %v2387_v61, %v3934_v35 }
 0x7fe   : > { %2398 = vst [vmem:[%s490_s24] sm:$0xff] %v2395_v46 }
 0x801   : > { %v2388_v1 = vpop.f32.mrf.mxu1 }
 0x802   : > { %v2389_v5 = vadd.f32 %v3296_v56, %v2388_v1 }
 0x804   : > { %v2396_v6 = vadd.f32 %v2389_v5, %v3940_v25 }
 0x806   : > { %2399 = vst [vmem:[%s490_s24 + $0x8] sm:$0xff] %v2396_v6 }
 0x809   : > { %v2391_v7 = vpop.f32.mrf.mxu1 }
 0x80a   : > { %v2392_v40 = vadd.f32 %v3296_v56, %v2391_v7 }
 0x80c   : > { %v2397_v10 = vadd.f32 %v2392_v40, %v3946_v9 }
 0x80e   : > { %2400 = vst [vmem:[%s490_s24 + $0x10] sm:$0xff] %v2397_v10 }
 0x811   : > { %v2393_v14 = vpop.f32.mrf.mxu1 }
 0x812 PF: > { %s25_s25 = sadd.s32 1, %s3470_s25  }
 0x813   : > { %p22_p7 = scmp.ge.s32.totalorder %s25_s25, 4  }
 0x815   :  { %24 = sbr.rel (!%p22_p7) target bundleno = 4 (0x4), region = 115 }
 0x81a   :  { %2422 = vsyncpa [#allocation3], 1 }
 0x81b   :  { %2424 = vsyncpa [#allocation3 + $0x1], 1 }
 0x81c   :  { %2425 = vsyncpa [#allocation5], 1 }

// kernel: _lambda_.5
= control target key start
LH: loop header
LB: loop body
LE: loop exit
PB: predicated region body
PF: predicated region fallthrough
CT: control target
= control target key end

     0   :  { %18 = vsyncpa [#allocation3], 0  ;;  %s3403_s25 = smov 0   ;;  %s4416_s0 = inlined_call_operand.vmem [shape: f32[2,24,128], index: 0, kind: input, shape index: {}]   ;;  %s4417_s1 = inlined_call_operand.vmem [shape: f32[1,128], index: 1, kind: input, shape index: {}]   ;;  %s4418_s2 = inlined_call_operand.vmem [shape: f32[1,128], index: 2, kind: input, shape index: {}]   ;;  %s4419_s3 = inlined_call_operand.vmem [shape: bf16[128,1536], index: 3, kind: input, shape index: {}]   ;;  %s4420_s4 = inlined_call_operand.vmem [shape: f32[1,1536], index: 4, kind: input, shape index: {}]   ;;  %s4421_s5 = inlined_call_operand.hbm [shape: bf16[512,128], index: 5, kind: input, shape index: {}]   ;;  %s4422_s6 = inlined_call_operand.vmem [shape: f32[1,128], index: 6, kind: input, shape index: {}]   ;;  %s4423_s7 = inlined_call_operand.vmem [shape: f32[1,128], index: 7, kind: input, shape index: {}]   ;;  %s4424_s8 = inlined_call_operand.vmem [shape: f32[1,128], index: 8, kind: input, shape index: {}]   ;;  %s4425_s9 = inlined_call_operand.vmem [shape: bf16[128,128], index: 9, kind: input, shape index: {}]   ;;  %s4426_s10 = inlined_call_operand.vmem [shape: f32[1,128], index: 10, kind: input, shape index: {}]   ;;  %s4427_s11 = inlined_call_operand.vmem [shape: bf16[128,128], index: 11, kind: input, shape index: {}]   ;;  %s4428_s12 = inlined_call_operand.vmem [shape: f32[1,128], index: 12, kind: input, shape index: {}]   ;;  %s4429_s13 = inlined_call_operand.vmem [shape: f32[2,24,128], index: 13, kind: output, shape index: {}]  }
   0x1 LB: > { %s356_s28 = sshll.u32 %s4421_s5, 4  ;;  %s2435_s29 = sadd.s32 4294967295, %s3328_s25   ;;  %s3328_s25 = sphi %s3403_s25, %s24_s25   ;;  %s357_s28 = int_to_ptr.hbm [resolvable:$true] %s356_s28 }
   0x2   : > { %p2437_p0 = scmp.ge.s32.totalorder %s3328_s25, 1  ;;  %p333_p1 = scmp.lt.s32.totalorder %s3328_s25, 3 }
   0x3   : > { %p3199_p2 = scmp.eq.s32.totalorder %s2435_s29, 0  ;;  %s3330_s30 = smov [#allocation2]  }
   0x4   : > { %p334_p3 = pnand %p2437_p0, %p333_p1  ;;  %s358_s14 = sshll.u32 %s3330_s30, 4  ;;  %s359_s14 = int_to_ptr.vmem [resolvable:$true] %s358_s14 }
   0x5   : > { %s3331_s15 = smov 64   ;;  %s3332_s16 = smov 4  }
   0x6   : > { %p3195_p4 = pneg %p334_p3  ;;  %403 = sbr.rel (%p334_p3) target bundleno = 2054 (0x806), region = 72 }
   0x8   : > { %p3196_p5 = pnand %p3199_p2, %p3195_p4 }
   0xa   : > { %3198 = dma.hbm_to_vmem [thread:$0]  (!%p3196_p5), %s357_s28, 4096, %s359_s14, [#allocation3], %s3331_s15, %s3331_s15, %s3332_s16  }
   0xb   : > { %3323 = dma.done.wait (%p3199_p2), [#allocation3], 4096  }
   0xc   : > { %3325 = vsyncadd (%p3199_p2), [#allocation3], 4294963200  ;;  %p448_p6 = scmp.lt.s32.totalorder %s2435_s29, 1  ;;  %v2782_v6 = vld [vmem:[%s4419_s3 + $0x2a0] sm:$0xf]  ;;  %vm1438_vm9 = vcmask 1043456  }
   0xd   : > { %v3120_v7 = vld [vmem:[%s4419_s3 + $0x2cc] sm:$0xf0]  ;;  %v3114_v8 = vld [vmem:[%s4419_s3 + $0x2a4] sm:$0xf]  ;;  %v2784_v10 = vld [vmem:[%s4419_s3 + $0x2d0] sm:$0xf0] }
   0xe   : > { %s4437_s29 = smov (!%p448_p6, %s2435_s29), 1  ;;  %v2783_v9 = vor.u32 %v3120_v7, %v2782_v6  ;;  %v2790_v11 = vld [vmem:[%s4419_s3 + $0x2a8] sm:$0xf]  ;;  %v3121_v12 = vld [vmem:[%s4419_s3 + $0x2d4] sm:$0xf0]  ;;  %v2787_v13 = vor.u32 %v3114_v8, %v2784_v10  ;;  %vm1394_vm11 = vcmask 195584  }
   0xf   : > { %s3190_s17 = smul.u32 24, %s4437_s29  ;;  %v2791_v14 = vor.u32 %v3121_v12, %v2790_v11  ;;  %v3115_v15 = vld [vmem:[%s4419_s3 + $0x2ac] sm:$0xf]  ;;  %v2792_v16 = vld [vmem:[%s4419_s3 + $0x2d8] sm:$0xf0] }
  0x10   : > { %1148 = vmatpush.bf16.msra.mxu0 %v2783_v9  ;;  %v2795_v17 = vor.u32 %v3115_v15, %v2792_v16  ;;  %1166 = vmatpush.bf16.msra.mxu1 %v2787_v13  ;;  %v2734_v18 = vld [vmem:[%s4419_s3 + $0x240] sm:$0xf]  ;;  %v3108_v19 = vld [vmem:[%s4419_s3 + $0x26c] sm:$0xf0]  ;;  %v3102_v20 = vld [vmem:[%s4419_s3 + $0x244] sm:$0xf] }
  0x11   : > { %s3422_s20 = scalar_lea.vmem %s4416_s0, %s3190_s17  ;;  %1184 = vmatpush.bf16.msra.mxu2 %v2791_v14  ;;  %v2735_v21 = vor.u32 %v3108_v19, %v2734_v18  ;;  %v2736_v22 = vld [vmem:[%s4419_s3 + $0x270] sm:$0xf0]  ;;  %v2742_v23 = vld [vmem:[%s4419_s3 + $0x248] sm:$0xf]  ;;  %v3109_v24 = vld [vmem:[%s4419_s3 + $0x274] sm:$0xf0]  ;;  %s457_s26 = scalar_lea.vmem %s4429_s13, %s3190_s17 }
  0x12   : > { %v3425_v0 = vld [vmem:[%s3422_s20 + $0x10] sm:$0xff]  ;;  %v3428_v1 = vld [vmem:[%s3422_s20] sm:$0xff]  ;;  %v3435_v3 = vld [vmem:[%s3422_s20 + $0x8] sm:$0xff]  ;;  %1202 = vmatpush.bf16.msra.mxu3 %v2795_v17  ;;  %v2739_v25 = vor.u32 %v3102_v20, %v2736_v22  ;;  %v2743_v26 = vor.u32 %v3109_v24, %v2742_v23 }
  0x13   : > { %468 = vadd.xlane.f32.xlu2 %v3425_v0  ;;  %464 = vadd.xlane.f32.xlu0 %v3428_v1  ;;  %v473_v2 = vmul.f32 %v3428_v1, %v3428_v1  ;;  %v475_v4 = vmul.f32 %v3425_v0, %v3425_v0  ;;  %v474_v5 = vmul.f32 %v3435_v3, %v3435_v3  ;;  %v3103_v27 = vld [vmem:[%s4419_s3 + $0x24c] sm:$0xf]  ;;  %v2744_v28 = vld [vmem:[%s4419_s3 + $0x278] sm:$0xf0]  ;;  %v2686_v30 = vld [vmem:[%s4419_s3 + $0x1e0] sm:$0xf] }
  0x14   : > { %1149 = vmatpush.bf16.msra.mxu0 %v2735_v21  ;;  %v2747_v29 = vor.u32 %v3103_v27, %v2744_v28  ;;  %1167 = vmatpush.bf16.msra.mxu1 %v2739_v25  ;;  %v3096_v31 = vld [vmem:[%s4419_s3 + $0x20c] sm:$0xf0]  ;;  %v3090_v32 = vld [vmem:[%s4419_s3 + $0x1e4] sm:$0xf]  ;;  %v2688_v34 = vld [vmem:[%s4419_s3 + $0x210] sm:$0xf0] }
  0x15   : > { %476 = vadd.xlane.f32.xlu1 %v473_v2  ;;  %1185 = vmatpush.bf16.msra.mxu2 %v2743_v26  ;;  %v2687_v33 = vor.u32 %v3096_v31, %v2686_v30  ;;  %v2694_v35 = vld [vmem:[%s4419_s3 + $0x1e8] sm:$0xf]  ;;  %v3097_v36 = vld [vmem:[%s4419_s3 + $0x214] sm:$0xf0]  ;;  %v2691_v37 = vor.u32 %v3090_v32, %v2688_v34  ;;  %v3091_v39 = vld [vmem:[%s4419_s3 + $0x1ec] sm:$0xf] }
  0x16   : > { %1203 = vmatpush.bf16.msra.mxu3 %v2747_v29  ;;  %v2695_v38 = vor.u32 %v3097_v36, %v2694_v35  ;;  %v2696_v40 = vld [vmem:[%s4419_s3 + $0x218] sm:$0xf0]  ;;  %v2638_v42 = vld [vmem:[%s4419_s3 + $0x180] sm:$0xf]  ;;  %v3084_v43 = vld [vmem:[%s4419_s3 + $0x1ac] sm:$0xf0] }
  0x17   : > { %v2699_v41 = vor.u32 %v3091_v39, %v2696_v40  ;;  %v3078_v44 = vld [vmem:[%s4419_s3 + $0x184] sm:$0xf]  ;;  %v2639_v45 = vor.u32 %v3084_v43, %v2638_v42  ;;  %v2640_v46 = vld [vmem:[%s4419_s3 + $0x1b0] sm:$0xf0]  ;;  %v2646_v47 = vld [vmem:[%s4419_s3 + $0x188] sm:$0xf] }
  0x18   : > { %1150 = vmatpush.bf16.msra.mxu0 %v2687_v33  ;;  %1168 = vmatpush.bf16.msra.mxu1 %v2691_v37  ;;  %v3085_v48 = vld [vmem:[%s4419_s3 + $0x1b4] sm:$0xf0]  ;;  %v2643_v49 = vor.u32 %v3078_v44, %v2640_v46  ;;  %v3079_v51 = vld [vmem:[%s4419_s3 + $0x18c] sm:$0xf]  ;;  %v2648_v52 = vld [vmem:[%s4419_s3 + $0x1b8] sm:$0xf0] }
  0x19   : > { %1186 = vmatpush.bf16.msra.mxu2 %v2695_v38  ;;  %v2647_v50 = vor.u32 %v3085_v48, %v2646_v47  ;;  %v2651_v53 = vor.u32 %v3079_v51, %v2648_v52  ;;  %v2590_v54 = vld [vmem:[%s4419_s3 + $0x120] sm:$0xf]  ;;  %v3072_v55 = vld [vmem:[%s4419_s3 + $0x14c] sm:$0xf0]  ;;  %v3066_v56 = vld [vmem:[%s4419_s3 + $0x124] sm:$0xf] }
  0x1a   : > { %1204 = vmatpush.bf16.msra.mxu3 %v2699_v41  ;;  %v2591_v57 = vor.u32 %v3072_v55, %v2590_v54  ;;  %v2592_v58 = vld [vmem:[%s4419_s3 + $0x150] sm:$0xf0]  ;;  %v2598_v59 = vld [vmem:[%s4419_s3 + $0x128] sm:$0xf]  ;;  %v3073_v60 = vld [vmem:[%s4419_s3 + $0x154] sm:$0xf0] }
  0x1b   : > { %480 = vadd.xlane.f32.xlu2 %v475_v4  ;;  %466 = vadd.xlane.f32.xlu0 %v3435_v3  ;;  %v2595_v61 = vor.u32 %v3066_v56, %v2592_v58  ;;  %v2599_v62 = vor.u32 %v3073_v60, %v2598_v59  ;;  %v3067_v63 = vld [vmem:[%s4419_s3 + $0x12c] sm:$0xf]  ;;  %v2600_v2 = vld [vmem:[%s4419_s3 + $0x158] sm:$0xf0]  ;;  %v3060_v6 = vld [vmem:[%s4419_s3 + $0xec] sm:$0xf0] }
  0x1c   : > { %1151 = vmatpush.bf16.msra.mxu0 %v2639_v45  ;;  %1169 = vmatpush.bf16.msra.mxu1 %v2643_v49  ;;  %v2603_v4 = vor.u32 %v3067_v63, %v2600_v2  ;;  %v3054_v7 = vld [vmem:[%s4419_s3 + $0xc4] sm:$0xf]  ;;  %v2544_v9 = vld [vmem:[%s4419_s3 + $0xf0] sm:$0xf0]  ;;  %v2550_v10 = vld [vmem:[%s4419_s3 + $0xc8] sm:$0xf] }
  0x1d   : > { %478 = vadd.xlane.f32.xlu1 %v474_v5  ;;  %1187 = vmatpush.bf16.msra.mxu2 %v2647_v50  ;;  %v2542_v5 = vld [vmem:[%s4419_s3 + $0xc0] sm:$0xf]  ;;  %v3061_v11 = vld [vmem:[%s4419_s3 + $0xf4] sm:$0xf0]  ;;  %v2547_v14 = vor.u32 %v3054_v7, %v2544_v9  ;;  %v3055_v16 = vld [vmem:[%s4419_s3 + $0xcc] sm:$0xf] }
  0x1e   : > { %1205 = vmatpush.bf16.msra.mxu3 %v2651_v53  ;;  %v2543_v8 = vor.u32 %v3060_v6, %v2542_v5  ;;  %v2551_v15 = vor.u32 %v3061_v11, %v2550_v10  ;;  %v2552_v17 = vld [vmem:[%s4419_s3 + $0xf8] sm:$0xf0]  ;;  %v2494_v22 = vld [vmem:[%s4419_s3 + $0x60] sm:$0xf]  ;;  %v3048_v23 = vld [vmem:[%s4419_s3 + $0x8c] sm:$0xf0] }
  0x1f   : > { %v2555_v20 = vor.u32 %v3055_v16, %v2552_v17  ;;  %v3042_v24 = vld [vmem:[%s4419_s3 + $0x64] sm:$0xf]  ;;  %v2496_v26 = vld [vmem:[%s4419_s3 + $0x90] sm:$0xf0]  ;;  %v2502_v27 = vld [vmem:[%s4419_s3 + $0x68] sm:$0xf]  ;;  %v2495_v30 = vor.u32 %v3048_v23, %v2494_v22 }
  0x20   : > { %1152 = vmatpush.bf16.msra.mxu0 %v2591_v57  ;;  %1170 = vmatpush.bf16.msra.mxu1 %v2595_v61  ;;  %v3049_v28 = vld [vmem:[%s4419_s3 + $0x94] sm:$0xf0]  ;;  %v2499_v31 = vor.u32 %v3042_v24, %v2496_v26  ;;  %v3043_v33 = vld [vmem:[%s4419_s3 + $0x6c] sm:$0xf]  ;;  %v2504_v34 = vld [vmem:[%s4419_s3 + $0x98] sm:$0xf0] }
  0x21   : > { %1188 = vmatpush.bf16.msra.mxu2 %v2599_v62  ;;  %v2503_v32 = vor.u32 %v3049_v28, %v2502_v27  ;;  %v2507_v35 = vor.u32 %v3043_v33, %v2504_v34  ;;  %v2446_v37 = vld [vmem:[%s4419_s3] sm:$0xf]  ;;  %v3036_v38 = vld [vmem:[%s4419_s3 + $0x2c] sm:$0xf0]  ;;  %v3030_v39 = vld [vmem:[%s4419_s3 + $0x4] sm:$0xf] }
  0x22   : > { %1206 = vmatpush.bf16.msra.mxu3 %v2603_v4  ;;  %v2447_v41 = vor.u32 %v3036_v38, %v2446_v37  ;;  %v2448_v42 = vld [vmem:[%s4419_s3 + $0x30] sm:$0xf0]  ;;  %v2454_v43 = vld [vmem:[%s4419_s3 + $0x8] sm:$0xf]  ;;  %v3037_v44 = vld [vmem:[%s4419_s3 + $0x34] sm:$0xf0] }
  0x23   : > { %v2451_v48 = vor.u32 %v3030_v39, %v2448_v42  ;;  %v2455_v49 = vor.u32 %v3037_v44, %v2454_v43  ;;  %v3031_v50 = vld [vmem:[%s4419_s3 + $0xc] sm:$0xf]  ;;  %v2456_v51 = vld [vmem:[%s4419_s3 + $0x38] sm:$0xf0]  ;;  %v2798_v56 = vld [vmem:[%s4419_s3 + $0x2b0] sm:$0xf] }
  0x24   : > { %1153 = vmatpush.bf16.msra.mxu0 %v2543_v8  ;;  %1171 = vmatpush.bf16.msra.mxu1 %v2547_v14  ;;  %v2459_v54 = vor.u32 %v3031_v50, %v2456_v51  ;;  %v3122_v57 = vld [vmem:[%s4419_s3 + $0x2dc] sm:$0xf0]  ;;  %v3116_v58 = vld [vmem:[%s4419_s3 + $0x2b4] sm:$0xf]  ;;  %v2800_v62 = vld [vmem:[%s4419_s3 + $0x2e0] sm:$0xf0] }
  0x25   : > { %1189 = vmatpush.bf16.msra.mxu2 %v2551_v15  ;;  %v2806_v63 = vld [vmem:[%s4419_s3 + $0x2b8] sm:$0xf]  ;;  %v2799_v2 = vor.u32 %v3122_v57, %v2798_v56  ;;  %v2803_v4 = vor.u32 %v3116_v58, %v2800_v62  ;;  %v3123_v5 = vld [vmem:[%s4419_s3 + $0x2e4] sm:$0xf0]  ;;  %v3117_v6 = vld [vmem:[%s4419_s3 + $0x2bc] sm:$0xf] }
  0x26   : > { %1207 = vmatpush.bf16.msra.mxu3 %v2555_v20  ;;  %v2808_v7 = vld [vmem:[%s4419_s3 + $0x2e8] sm:$0xf0]  ;;  %v2807_v10 = vor.u32 %v3123_v5, %v2806_v63  ;;  %v3104_v15 = vld [vmem:[%s4419_s3 + $0x254] sm:$0xf]  ;;  %v2752_v16 = vld [vmem:[%s4419_s3 + $0x280] sm:$0xf0] }
  0x27   : > { %v2811_v11 = vor.u32 %v3117_v6, %v2808_v7  ;;  %v2758_v17 = vld [vmem:[%s4419_s3 + $0x258] sm:$0xf]  ;;  %v3111_v22 = vld [vmem:[%s4419_s3 + $0x284] sm:$0xf0]  ;;  %v3105_v23 = vld [vmem:[%s4419_s3 + $0x25c] sm:$0xf] }
  0x28   : > { %1154 = vmatpush.bf16.msra.mxu0 %v2495_v30  ;;  %1172 = vmatpush.bf16.msra.mxu1 %v2499_v31  ;;  %v2760_v26 = vld [vmem:[%s4419_s3 + $0x288] sm:$0xf0]  ;;  %v2702_v27 = vld [vmem:[%s4419_s3 + $0x1f0] sm:$0xf]  ;;  %v3098_v28 = vld [vmem:[%s4419_s3 + $0x21c] sm:$0xf0] }
  0x29   : > { %1190 = vmatpush.bf16.msra.mxu2 %v2503_v32  ;;  %v3092_v30 = vld [vmem:[%s4419_s3 + $0x1f4] sm:$0xf]  ;;  %v2704_v31 = vld [vmem:[%s4419_s3 + $0x220] sm:$0xf0]  ;;  %v2710_v32 = vld [vmem:[%s4419_s3 + $0x1f8] sm:$0xf]  ;;  %v2763_v33 = vor.u32 %v3105_v23, %v2760_v26  ;;  %v2703_v34 = vor.u32 %v3098_v28, %v2702_v27 }
  0x2a   : > { %1208 = vmatpush.bf16.msra.mxu3 %v2507_v35  ;;  %v2707_v35 = vor.u32 %v3092_v30, %v2704_v31  ;;  %v3093_v37 = vld [vmem:[%s4419_s3 + $0x1fc] sm:$0xf]  ;;  %v3086_v42 = vld [vmem:[%s4419_s3 + $0x1bc] sm:$0xf0]  ;;  %v3080_v44 = vld [vmem:[%s4419_s3 + $0x194] sm:$0xf] }
  0x2b   : > { %v3087_v50 = vld [vmem:[%s4419_s3 + $0x1c4] sm:$0xf0]  ;;  %v3081_v51 = vld [vmem:[%s4419_s3 + $0x19c] sm:$0xf]  ;;  %v2664_v56 = vld [vmem:[%s4419_s3 + $0x1c8] sm:$0xf0] }
  0x2c   : > { %1155 = vmatpush.bf16.msra.mxu0 %v2447_v41  ;;  %1173 = vmatpush.bf16.msra.mxu1 %v2451_v48  ;;  %v2654_v41 = vld [vmem:[%s4419_s3 + $0x190] sm:$0xf]  ;;  %v2667_v62 = vor.u32 %v3081_v51, %v2664_v56  ;;  %v3074_v7 = vld [vmem:[%s4419_s3 + $0x15c] sm:$0xf0]  ;;  %v2616_v23 = vld [vmem:[%s4419_s3 + $0x168] sm:$0xf0] }
  0x2d   : > { %1191 = vmatpush.bf16.msra.mxu2 %v2455_v49  ;;  %v2606_v6 = vld [vmem:[%s4419_s3 + $0x130] sm:$0xf]  ;;  %v3056_v27 = vld [vmem:[%s4419_s3 + $0xd4] sm:$0xf]  ;;  %v2560_v28 = vld [vmem:[%s4419_s3 + $0x100] sm:$0xf0] }
  0x2e   : > { %1209 = vmatpush.bf16.msra.mxu3 %v2459_v54  ;;  %v2655_v54 = vor.u32 %v3086_v42, %v2654_v41  ;;  %v2563_v31 = vor.u32 %v3056_v27, %v2560_v28  ;;  %v2520_v51 = vld [vmem:[%s4419_s3 + $0xa8] sm:$0xf0]  ;;  %v2462_v56 = vld [vmem:[%s4419_s3 + $0x10] sm:$0xf]  ;;  %v3106_v28 = vld [vmem:[%s4419_s3 + $0x264] sm:$0xf] }
  0x2f   : > { %v3112_v27 = vld [vmem:[%s4419_s3 + $0x28c] sm:$0xf0] }
  0x30   : > { %1220 = vmatpush.bf16.msrb.mxu0 %v2799_v2  ;;  %1238 = vmatpush.bf16.msrb.mxu1 %v2803_v4 }
  0x31   : > { %1256 = vmatpush.bf16.msrb.mxu2 %v2807_v10  ;;  %v2608_v10 = vld [vmem:[%s4419_s3 + $0x160] sm:$0xf0] }
  0x32   : > { %1274 = vmatpush.bf16.msrb.mxu3 %v2811_v11  ;;  %v2614_v11 = vld [vmem:[%s4419_s3 + $0x138] sm:$0xf] }
  0x36   : > { %1275 = vmatpush.bf16.msrb.mxu3 %v2763_v33  ;;  %v3063_v33 = vld [vmem:[%s4419_s3 + $0x104] sm:$0xf0] }
  0x86   : > { %v469_v12 = vpop.xlane.xlu2 %468  ;;  %v465_v13 = vpop.xlane.xlu0 %464 }
  0x87   : > { %v3586_v18 = vmul.f32 0.03125, %v469_v12  ;;  %v3588_v19 = vmul.f32 0.03125, %v465_v13  ;;  %v2750_v12 = vld [vmem:[%s4419_s3 + $0x250] sm:$0xf]  ;;  %v3110_v13 = vld [vmem:[%s4419_s3 + $0x27c] sm:$0xf0] }
  0x88   : > { %v477_v21 = vpop.xlane.xlu1 %476  ;;  %v2751_v14 = vor.u32 %v3110_v13, %v2750_v12 }
  0x89   : > { %v485_v25 = vmul.f32 %v3588_v19, %v3588_v19  ;;  %v482_v29 = vmul.f32 0.03125, %v477_v21  ;;  %v487_v40 = vmul.f32 %v3586_v18, %v3586_v18  ;;  %v2755_v21 = vor.u32 %v3104_v15, %v2752_v16  ;;  %v3075_v15 = vld [vmem:[%s4419_s3 + $0x164] sm:$0xf0]  ;;  %v3069_v16 = vld [vmem:[%s4419_s3 + $0x13c] sm:$0xf] }
  0x8a   : > { %1221 = vmatpush.bf16.msrb.mxu0 %v2751_v14  ;;  %v2619_v26 = vor.u32 %v3069_v16, %v2616_v23  ;;  %v3118_v16 = vld [vmem:[%s4419_s3 + $0x2c4] sm:$0xf]  ;;  %v2822_v23 = vld [vmem:[%s4419_s3 + $0x2c8] sm:$0xf] }
  0x8b   : > { %v488_v36 = vsub.f32 %v482_v29, %v485_v25  ;;  %v2759_v25 = vor.u32 %v3111_v22, %v2758_v17  ;;  %1239 = vmatpush.bf16.msrb.mxu1 %v2755_v21  ;;  %v491_v17 = vsub.f32 %v3428_v1, %v3588_v19  ;;  %v3805_v21 = vld [vmem:[%s4417_s1] ss:$0 sm:$0xff]  ;;  %v2615_v22 = vor.u32 %v3075_v15, %v2614_v11 }
  0x8c   : > { %v3062_v1 = vld [vmem:[%s4419_s3 + $0xfc] sm:$0xf0] }
  0x8d   : > { %v3636_v45 = vadd.f32 1e-05, %v488_v36  ;;  %v3099_v36 = vld [vmem:[%s4419_s3 + $0x224] sm:$0xf0]  ;;  %1257 = vmatpush.bf16.msrb.mxu2 %v2759_v25  ;;  %v2814_v15 = vld [vmem:[%s4419_s3 + $0x2c0] sm:$0xf] }
  0x8e   : > { %v481_v46 = vpop.xlane.xlu2 %480  ;;  %v467_v47 = vpop.xlane.xlu0 %466  ;;  %v2711_v39 = vor.u32 %v3099_v36, %v2710_v32  ;;  %1222 = vmatpush.bf16.msrb.mxu0 %v2703_v34  ;;  %v2566_v32 = vld [vmem:[%s4419_s3 + $0xd8] sm:$0xf]  ;;  %v3057_v34 = vld [vmem:[%s4419_s3 + $0xdc] sm:$0xf] }
  0x8f   : > { %v484_v52 = vmul.f32 0.03125, %v481_v46  ;;  %v3644_v53 = vmul.f32 0.03125, %v467_v47  ;;  %3219 = vrsqrt.f32 %v3636_v45  ;;  %v2656_v46 = vld [vmem:[%s4419_s3 + $0x1c0] sm:$0xf0]  ;;  %v2662_v47 = vld [vmem:[%s4419_s3 + $0x198] sm:$0xf]  ;;  %1240 = vmatpush.bf16.msrb.mxu1 %v2707_v35  ;;  %vm503_vm1 = vweird.f32 %v3636_v45 }
  0x90   : > { %v479_v55 = vpop.xlane.xlu1 %478  ;;  %v2567_v36 = vor.u32 %v3063_v33, %v2566_v32  ;;  %v2774_v32 = vld [vmem:[%s4419_s3 + $0x268] sm:$0xf]  ;;  %v3113_v33 = vld [vmem:[%s4419_s3 + $0x294] sm:$0xf0] }
  0x91   : > { %v490_v59 = vsub.f32 %v484_v52, %v487_v40  ;;  %v486_v60 = vmul.f32 %v3644_v53, %v3644_v53  ;;  %v483_v61 = vmul.f32 0.03125, %v479_v55  ;;  %v2712_v40 = vld [vmem:[%s4419_s3 + $0x228] sm:$0xf0]  ;;  %v2659_v55 = vor.u32 %v3080_v44, %v2656_v46  ;;  %1258 = vmatpush.bf16.msrb.mxu2 %v2711_v39  ;;  %v3050_v39 = vld [vmem:[%s4419_s3 + $0x9c] sm:$0xf0] }
  0x92   : > { %v2715_v43 = vor.u32 %v3093_v37, %v2712_v40  ;;  %1223 = vmatpush.bf16.msrb.mxu0 %v2655_v54  ;;  %v2568_v37 = vld [vmem:[%s4419_s3 + $0x108] sm:$0xf0]  ;;  %v3852_v40 = vld [vmem:[%s4418_s2] ss:$0 sm:$0xff]  ;;  %v492_v41 = vsub.f32 %v3435_v3, %v3644_v53  ;;  %v2512_v44 = vld [vmem:[%s4419_s3 + $0xa0] sm:$0xf0] }
  0x93   : > { %v3673_v8 = vadd.f32 1e-05, %v490_v59  ;;  %v489_v9 = vsub.f32 %v483_v61, %v486_v60  ;;  %v2663_v59 = vor.u32 %v3087_v50, %v2662_v47  ;;  %1241 = vmatpush.bf16.msrb.mxu1 %v2659_v55  ;;  %v2571_v42 = vor.u32 %v3057_v34, %v2568_v37  ;;  %v2518_v46 = vld [vmem:[%s4419_s3 + $0x78] sm:$0xf]  ;;  %v3045_v50 = vld [vmem:[%s4419_s3 + $0x7c] sm:$0xf] }
  0x94   : > { %1276 = vmatpush.bf16.msrb.mxu3 %v2715_v43  ;;  %v3044_v43 = vld [vmem:[%s4419_s3 + $0x74] sm:$0xf]  ;;  %v3107_v34 = vld [vmem:[%s4419_s3 + $0x26c] sm:$0xf]  ;;  %v2718_v37 = vld [vmem:[%s4419_s3 + $0x200] sm:$0xf] }
  0x95   : > { %3221 = vrsqrt.f32 %v3673_v8  ;;  %v3691_v20 = vadd.f32 1e-05, %v489_v9  ;;  %v3699_v24 = vpop.eup %3219  ;;  %1259 = vmatpush.bf16.msrb.mxu2 %v2663_v59  ;;  %v3068_v9 = vld [vmem:[%s4419_s3 + $0x134] sm:$0xf]  ;;  %v2515_v53 = vor.u32 %v3044_v43, %v2512_v44  ;;  %v2523_v59 = vor.u32 %v3045_v50, %v2520_v51  ;;  %v2726_v43 = vld [vmem:[%s4419_s3 + $0x208] sm:$0xf] }
  0x96   : > { %v498_v29 = vmul.f32 %v3699_v24, %v3636_v45  ;;  %vm504_vm0 = vweird.f32 %v3699_v24  ;;  %v2607_v45 = vor.u32 %v3074_v7, %v2606_v6  ;;  %v2611_v14 = vor.u32 %v3068_v9, %v2608_v10  ;;  %v3033_v6 = vld [vmem:[%s4419_s3 + $0x1c] sm:$0xf]  ;;  %v2472_v7 = vld [vmem:[%s4419_s3 + $0x48] sm:$0xf0]  ;;  %v3077_v10 = vld [vmem:[%s4419_s3 + $0x174] sm:$0xf0] }
  0x97   : > { %3223 = vrsqrt.f32 %v3691_v20  ;;  %vm3768_vm2 = vmor %vm503_vm1, %vm504_vm0  ;;  %vm513_vm4 = vweird.f32 %v3691_v20  ;;  %vm523_vm6 = vweird.f32 %v3673_v8 }
  0x98   : > { %v499_v38 = vmul.f32 %v3699_v24, %v498_v29  ;;  %1277 = vmatpush.bf16.msrb.mxu3 %v2667_v62  ;;  %1224 = vmatpush.bf16.msrb.mxu0 %v2607_v45  ;;  %v2470_v62 = vld [vmem:[%s4419_s3 + $0x18] sm:$0xf] }
  0x99   : > { %1242 = vmatpush.bf16.msrb.mxu1 %v2611_v14  ;;  %1260 = vmatpush.bf16.msrb.mxu2 %v2615_v22  ;;  %v2816_v22 = vld [vmem:[%s4419_s3 + $0x2f0] sm:$0xf0] }
  0x9a   : > { %v500_v49 = vmul.f32 0.5, %v499_v38  ;;  %v2510_v38 = vld [vmem:[%s4419_s3 + $0x70] sm:$0xf] }
  0x9b   : > { %v3747_v48 = vpop.eup %3221  ;;  %v2511_v3 = vor.u32 %v3050_v39, %v2510_v38  ;;  %v3100_v38 = vld [vmem:[%s4419_s3 + $0x22c] sm:$0xf0] }
  0x9c   : > { %v518_v52 = vmul.f32 %v3747_v48, %v3673_v8  ;;  %v501_v58 = vsub.f32 1.5, %v500_v49  ;;  %1278 = vmatpush.bf16.msrb.mxu3 %v2619_v26  ;;  %v3051_v49 = vld [vmem:[%s4419_s3 + $0xa4] sm:$0xf0]  ;;  %vm524_vm7 = vweird.f32 %v3747_v48  ;;  %v3124_v8 = vld [vmem:[%s4419_s3 + $0x2ec] sm:$0xf0] }
  0x9d   : > { %v3760_v57 = vpop.eup %3223  ;;  %1243 = vmatpush.bf16.msrb.mxu1 %v2563_v31  ;;  %1261 = vmatpush.bf16.msrb.mxu2 %v2567_v36  ;;  %v2519_v55 = vor.u32 %v3051_v49, %v2518_v46  ;;  %vm3910_vm8 = vmor %vm523_vm6, %vm524_vm7  ;;  %v2776_v36 = vld [vmem:[%s4419_s3 + $0x298] sm:$0xf0]  ;;  %v3101_v46 = vld [vmem:[%s4419_s3 + $0x234] sm:$0xf0] }
  0x9e   : > { %v519_v60 = vmul.f32 %v3747_v48, %v518_v52  ;;  %v508_v61 = vmul.f32 %v3760_v57, %v3691_v20  ;;  %v502_v63 = vmul.f32 %v3699_v24, %v501_v58  ;;  %vm514_vm3 = vweird.f32 %v3760_v57  ;;  %v3032_v58 = vld [vmem:[%s4419_s3 + $0x14] sm:$0xf] }
  0x9f   : > { %vm3820_vm5 = vmor %vm513_vm4, %vm514_vm3  ;;  %v2779_v39 = vor.u32 %v3107_v34, %v2776_v36  ;;  %v2727_v50 = vor.u32 %v3101_v46, %v2726_v43  ;;  %v3047_v34 = vld [vmem:[%s4419_s3 + $0x8c] sm:$0xf]  ;;  %v2478_v36 = vld [vmem:[%s4419_s3 + $0x20] sm:$0xf] }
  0xa0   : > { %v3772_v4 = vmul.f32 0.5, %v519_v60  ;;  %v509_v5 = vmul.f32 %v3760_v57, %v508_v61  ;;  %v506_v12 = vsel %vm3768_vm2, %v3699_v24, %v502_v63  ;;  %v2558_v24 = vld [vmem:[%s4419_s3 + $0xd0] sm:$0xf]  ;;  %1279 = vmatpush.bf16.msrb.mxu3 %v2571_v42  ;;  %v2464_v60 = vld [vmem:[%s4419_s3 + $0x40] sm:$0xf0] }
  0xa1   : > { %v527_v29 = vmul.f32 %v506_v12, %v491_v17  ;;  %v2559_v30 = vor.u32 %v3062_v1, %v2558_v24  ;;  %1244 = vmatpush.bf16.msrb.mxu1 %v2515_v53  ;;  %1262 = vmatpush.bf16.msrb.mxu2 %v2519_v55  ;;  %v493_v17 = vsub.f32 %v3425_v0, %v3586_v18  ;;  %v3125_v24 = vld [vmem:[%s4419_s3 + $0x2f4] sm:$0xf0]  ;;  %v3119_v1 = vld [vmem:[%s4419_s3 + $0x2cc] sm:$0xf]  ;;  %v2720_v42 = vld [vmem:[%s4419_s3 + $0x230] sm:$0xf0] }
  0xa2   : > { %v510_v13 = vmul.f32 0.5, %v509_v5  ;;  %v521_v19 = vsub.f32 1.5, %v3772_v4  ;;  %v2467_v4 = vor.u32 %v3032_v58, %v2464_v60  ;;  %v3039_v5 = vld [vmem:[%s4419_s3 + $0x44] sm:$0xf0]  ;;  %v2819_v0 = vor.u32 %v3118_v16, %v2816_v22  ;;  %v2672_v55 = vld [vmem:[%s4419_s3 + $0x1d0] sm:$0xf0] }
  0xa3   : > { %1225 = vmatpush.bf16.msrb.mxu0 %v2559_v30  ;;  %v533_v52 = vmul.f32 %v3805_v21, %v527_v29  ;;  %v2471_v12 = vor.u32 %v3039_v5, %v2470_v62  ;;  %v2823_v18 = vor.u32 %v3125_v24, %v2822_v23  ;;  %v2768_v29 = vld [vmem:[%s4419_s3 + $0x290] sm:$0xf0]  ;;  %v2719_v53 = vor.u32 %v3100_v38, %v2718_v37  ;;  %v3089_v60 = vld [vmem:[%s4419_s3 + $0x1d4] sm:$0xf0]  ;;  %v3076_v5 = vld [vmem:[%s4419_s3 + $0x16c] sm:$0xf0] }
  0xa4   : > { %v511_v25 = vsub.f32 1.5, %v510_v13  ;;  %v522_v63 = vmul.f32 %v3747_v48, %v521_v19  ;;  %1280 = vmatpush.bf16.msrb.mxu3 %v2523_v59  ;;  %v2475_v13 = vor.u32 %v3033_v6, %v2472_v7  ;;  %v2824_v19 = vld [vmem:[%s4419_s3 + $0x2f8] sm:$0xf0]  ;;  %v2771_v31 = vor.u32 %v3106_v28, %v2768_v29  ;;  %v3070_v6 = vld [vmem:[%s4419_s3 + $0x144] sm:$0xf] }
  0xa5   : > { %v539_v45 = vadd.f32 %v3852_v40, %v533_v52  ;;  %1245 = vmatpush.bf16.msrb.mxu1 %v2467_v4  ;;  %1263 = vmatpush.bf16.msrb.mxu2 %v2471_v12  ;;  %v2827_v26 = vor.u32 %v3119_v1, %v2824_v19  ;;  %v3088_v52 = vld [vmem:[%s4419_s3 + $0x1cc] sm:$0xf0]  ;;  %v2622_v4 = vld [vmem:[%s4419_s3 + $0x140] sm:$0xf]  ;;  %v2576_v22 = vld [vmem:[%s4419_s3 + $0x110] sm:$0xf0] }
  0xa6   : > { %v512_v35 = vmul.f32 %v3760_v57, %v511_v25  ;;  %v526_v14 = vsel %vm3910_vm8, %v3747_v48, %v522_v63  ;;  %v2815_v48 = vor.u32 %v3124_v8, %v2814_v15  ;;  %v2766_v25 = vld [vmem:[%s4419_s3 + $0x260] sm:$0xf]  ;;  %v2623_v7 = vor.u32 %v3076_v5, %v2622_v4  ;;  %v3059_v1 = vld [vmem:[%s4419_s3 + $0xec] sm:$0xf]  ;;  %v2584_v19 = vld [vmem:[%s4419_s3 + $0x118] sm:$0xf0] }
  0xa7   : > { %1226 = vmatpush.bf16.msrb.mxu0 %v2511_v3  ;;  %v529_v20 = vmul.f32 %v526_v14, %v493_v17  ;;  %v2767_v30 = vor.u32 %v3112_v27, %v2766_v25  ;;  %v2728_v3 = vld [vmem:[%s4419_s3 + $0x238] sm:$0xf0]  ;;  %v2574_v15 = vld [vmem:[%s4419_s3 + $0xe0] sm:$0xf]  ;;  %v3064_v17 = vld [vmem:[%s4419_s3 + $0x10c] sm:$0xf0]  ;;  %v2587_v29 = vor.u32 %v3059_v1, %v2584_v19 }
  0xa8   : > { %v516_v47 = vsel %vm3820_vm5, %v3760_v57, %v512_v35  ;;  %v3038_v57 = vld [vmem:[%s4419_s3 + $0x3c] sm:$0xf0]  ;;  %1281 = vmatpush.bf16.msrb.mxu3 %v2475_v13  ;;  %v2775_v35 = vor.u32 %v3113_v33, %v2774_v32  ;;  %v3071_v13 = vld [vmem:[%s4419_s3 + $0x14c] sm:$0xf]  ;;  %v2632_v14 = vld [vmem:[%s4419_s3 + $0x178] sm:$0xf0]  ;;  %v2575_v23 = vor.u32 %v3064_v17, %v2574_v15 }
  0xa9   : > { %v528_v54 = vmul.f32 %v516_v47, %v492_v41  ;;  %v2463_v2 = vor.u32 %v3038_v57, %v2462_v56  ;;  %v3094_v41 = vld [vmem:[%s4419_s3 + $0x204] sm:$0xf]  ;;  %v535_v44 = vmul.f32 %v3805_v21, %v529_v20  ;;  %v3095_v47 = vld [vmem:[%s4419_s3 + $0x20c] sm:$0xf]  ;;  %v2678_v57 = vld [vmem:[%s4419_s3 + $0x1a8] sm:$0xf]  ;;  %v2635_v16 = vor.u32 %v3071_v13, %v2632_v14 }
  0xaa   : > { %v2723_v49 = vor.u32 %v3094_v41, %v2720_v42  ;;  %v2731_v51 = vor.u32 %v3095_v47, %v2728_v3  ;;  %v2679_v63 = vor.u32 %v3089_v60, %v2678_v57  ;;  %v2526_v25 = vld [vmem:[%s4419_s3 + $0x80] sm:$0xf]  ;;  %v3052_v20 = vld [vmem:[%s4419_s3 + $0xac] sm:$0xf0]  ;;  %v2528_v27 = vld [vmem:[%s4419_s3 + $0xb0] sm:$0xf0] }
  0xab   : > { %v534_v61 = vmul.f32 %v3805_v21, %v528_v54  ;;  %1227 = vmatpush.bf16.msrb.mxu0 %v2463_v2  ;;  %v2670_v21 = vld [vmem:[%s4419_s3 + $0x1a0] sm:$0xf]  ;;  %v3082_v54 = vld [vmem:[%s4419_s3 + $0x1a4] sm:$0xf]  ;;  %v541_v56 = vadd.f32 %v3852_v40, %v535_v44  ;;  %v2527_v32 = vor.u32 %v3052_v20, %v2526_v25  ;;  %v3040_v37 = vld [vmem:[%s4419_s3 + $0x4c] sm:$0xf0] }
  0xac   : > { %v2671_v58 = vor.u32 %v3088_v52, %v2670_v21  ;;  %v2675_v59 = vor.u32 %v3082_v54, %v2672_v55  ;;  %v3034_v38 = vld [vmem:[%s4419_s3 + $0x24] sm:$0xf]  ;;  %v2486_v43 = vld [vmem:[%s4419_s3 + $0x28] sm:$0xf]  ;;  %v2479_v44 = vor.u32 %v3040_v37, %v2478_v36  ;;  %v3041_v47 = vld [vmem:[%s4419_s3 + $0x54] sm:$0xf0] }
  0xad   : > { %v540_v9 = vadd.f32 %v3852_v40, %v534_v61  ;;  %v3083_v61 = vld [vmem:[%s4419_s3 + $0x1ac] sm:$0xf]  ;;  %v2680_v40 = vld [vmem:[%s4419_s3 + $0x1d8] sm:$0xf0]  ;;  %v4023_v62 = vpack.c.bf16 %v541_v56, %v541_v56 }
  0xae   : > { %v2683_v2 = vor.u32 %v3083_v61, %v2680_v40  ;;  %v3035_v3 = vld [vmem:[%s4419_s3 + $0x2c] sm:$0xf] }
  0xaf   : > { %v3914_v11 = vpack.c.bf16 %v540_v9, %v539_v45  ;;  %v2624_v45 = vld [vmem:[%s4419_s3 + $0x170] sm:$0xf0]  ;;  %v2630_v9 = vld [vmem:[%s4419_s3 + $0x148] sm:$0xf] }
  0xb0   : > { %v2627_v12 = vor.u32 %v3070_v6, %v2624_v45  ;;  %v2631_v8 = vor.u32 %v3077_v10, %v2630_v9  ;;  %v4160_v10 = vld [vmem:[%s4420_s4] sm:$0xff] }
  0xb1   : > { %1156 = vmatmul.bf16.vlgmr.msra.gmra.mxu0 %v3914_v11  ;;  %1174 = vmatmul.bf16.vlgmr.msra.gmra.mxu1 %v3914_v11  ;;  %v648_v13 = vperm.slane %v4160_v10, 4  ;;  %v649_v14 = vperm.slane %v4160_v10, 5  ;;  %v650_v19 = vperm.slane %v4160_v10, 6  ;;  %v645_v36 = vperm.slane %v4160_v10, 1 }
  0xb2   : > { %1192 = vmatmul.bf16.vlgmr.msra.gmra.mxu2 %v3914_v11  ;;  %1210 = vmatmul.bf16.vlgmr.msra.gmra.mxu3 %v3914_v11 }
  0xb3   : > { %1292 = vmatpush.bf16.msra.mxu0 %v2815_v48  ;;  %1310 = vmatpush.bf16.msra.mxu1 %v2819_v0  ;;  %v3058_v48 = vld [vmem:[%s4419_s3 + $0xe4] sm:$0xf]  ;;  %v2582_v0 = vld [vmem:[%s4419_s3 + $0xe8] sm:$0xf] }
  0xb4   : > { %1328 = vmatpush.bf16.msra.mxu2 %v2823_v18  ;;  %1346 = vmatpush.bf16.msra.mxu3 %v2827_v26  ;;  %v2579_v24 = vor.u32 %v3058_v48, %v2576_v22  ;;  %v3065_v18 = vld [vmem:[%s4419_s3 + $0x114] sm:$0xf0]  ;;  %v3046_v26 = vld [vmem:[%s4419_s3 + $0x84] sm:$0xf] }
  0xb5   : > { %v2583_v28 = vor.u32 %v3065_v18, %v2582_v0  ;;  %v2531_v33 = vor.u32 %v3046_v26, %v2528_v27 }
  0xb7   : > { %1293 = vmatpush.bf16.msra.mxu0 %v2767_v30  ;;  %1311 = vmatpush.bf16.msra.mxu1 %v2771_v31  ;;  %v2534_v30 = vld [vmem:[%s4419_s3 + $0x88] sm:$0xf]  ;;  %v3053_v31 = vld [vmem:[%s4419_s3 + $0xb4] sm:$0xf0] }
  0xb8   : > { %1329 = vmatpush.bf16.msra.mxu2 %v2775_v35  ;;  %1347 = vmatpush.bf16.msra.mxu3 %v2779_v39  ;;  %v2536_v35 = vld [vmem:[%s4419_s3 + $0xb8] sm:$0xf0]  ;;  %v2480_v39 = vld [vmem:[%s4419_s3 + $0x50] sm:$0xf0]  ;;  %v2535_v41 = vor.u32 %v3053_v31, %v2534_v30 }
  0xb9   : > { %v2539_v42 = vor.u32 %v3047_v34, %v2536_v35  ;;  %v2483_v46 = vor.u32 %v3034_v38, %v2480_v39  ;;  %v644_v35 = vperm.slane %v4160_v10, 0 }
  0xbb   : > { %1294 = vmatpush.bf16.msra.mxu0 %v2719_v53  ;;  %1312 = vmatpush.bf16.msra.mxu1 %v2723_v49  ;;  %v2488_v53 = vld [vmem:[%s4419_s3 + $0x58] sm:$0xf0]  ;;  %v2487_v49 = vor.u32 %v3041_v47, %v2486_v43 }
  0xbc   : > { %1330 = vmatpush.bf16.msra.mxu2 %v2727_v50  ;;  %1348 = vmatpush.bf16.msra.mxu3 %v2731_v51  ;;  %v2491_v21 = vor.u32 %v3035_v3, %v2488_v53 }
  0xbf   : > { %1295 = vmatpush.bf16.msra.mxu0 %v2671_v58  ;;  %1313 = vmatpush.bf16.msra.mxu1 %v2675_v59 }
  0xc0   : > { %1331 = vmatpush.bf16.msra.mxu2 %v2679_v63  ;;  %1349 = vmatpush.bf16.msra.mxu3 %v2683_v2 }
  0xc1   : > { %1161 = vmatmul.bf16.gmra.mxu0 %v4023_v62  ;;  %1179 = vmatmul.bf16.gmra.mxu1 %v4023_v62 }
  0xc2   : > { %1197 = vmatmul.bf16.gmra.mxu2 %v4023_v62  ;;  %1215 = vmatmul.bf16.gmra.mxu3 %v4023_v62 }
  0xc3   : > { %1296 = vmatpush.bf16.msra.mxu0 %v2623_v7  ;;  %1314 = vmatpush.bf16.msra.mxu1 %v2627_v12  ;;  %v4163_v12 = vperm.slane %v4160_v10, 7 }
  0xc4   : > { %1332 = vmatpush.bf16.msra.mxu2 %v2631_v8  ;;  %1350 = vmatpush.bf16.msra.mxu3 %v2635_v16 }
  0xc7   : > { %1297 = vmatpush.bf16.msra.mxu0 %v2575_v23  ;;  %1315 = vmatpush.bf16.msra.mxu1 %v2579_v24 }
  0xc8   : > { %1333 = vmatpush.bf16.msra.mxu2 %v2583_v28  ;;  %1351 = vmatpush.bf16.msra.mxu3 %v2587_v29 }
  0xcb   : > { %1298 = vmatpush.bf16.msra.mxu0 %v2527_v32  ;;  %1316 = vmatpush.bf16.msra.mxu1 %v2531_v33 }
  0xcc   : > { %1334 = vmatpush.bf16.msra.mxu2 %v2535_v41  ;;  %1352 = vmatpush.bf16.msra.mxu3 %v2539_v42 }
  0xcf   : > { %1299 = vmatpush.bf16.msra.mxu0 %v2479_v44  ;;  %1317 = vmatpush.bf16.msra.mxu1 %v2483_v46 }
  0xd0   : > { %1335 = vmatpush.bf16.msra.mxu2 %v2487_v49  ;;  %1353 = vmatpush.bf16.msra.mxu3 %v2491_v21 }
  0xd1   : > { %1228 = vmatmul.bf16.vlgmr.msrb.gmra.mxu0 %v3914_v11  ;;  %1246 = vmatmul.bf16.vlgmr.msrb.gmra.mxu1 %v3914_v11 }
  0xd2   : > { %1264 = vmatmul.bf16.vlgmr.msrb.gmra.mxu2 %v3914_v11  ;;  %1282 = vmatmul.bf16.vlgmr.msrb.gmra.mxu3 %v3914_v11 }
  0xe1   : > { %1233 = vmatmul.bf16.gmra.mxu0 %v4023_v62  ;;  %1251 = vmatmul.bf16.gmra.mxu1 %v4023_v62 }
  0xe2   : > { %1269 = vmatmul.bf16.gmra.mxu2 %v4023_v62  ;;  %1287 = vmatmul.bf16.gmra.mxu3 %v4023_v62 }
  0xf1   : > { %1300 = vmatmul.bf16.vlgmr.msra.gmra.mxu0 %v3914_v11  ;;  %1318 = vmatmul.bf16.vlgmr.msra.gmra.mxu1 %v3914_v11 }
  0xf2   : > { %1336 = vmatmul.bf16.vlgmr.msra.gmra.mxu2 %v3914_v11  ;;  %1354 = vmatmul.bf16.vlgmr.msra.gmra.mxu3 %v3914_v11 }
 0x101   : > { %1305 = vmatmul.bf16.gmra.mxu0 %v4023_v62  ;;  %1323 = vmatmul.bf16.gmra.mxu1 %v4023_v62 }
 0x102   : > { %1341 = vmatmul.bf16.gmra.mxu2 %v4023_v62  ;;  %1359 = vmatmul.bf16.gmra.mxu3 %v4023_v62 }
 0x12e   : > { %v1157_v50 = vpop.f32.mrf.mxu0  ;;  %v1175_v51 = vpop.f32.mrf.mxu1 }
 0x12f   : > { %v1158_v43 = vadd.f32 %v1157_v50, %v644_v35  ;;  %v1176_v44 = vadd.f32 %v1175_v51, %v645_v36 }
 0x135   : > { %v4141_v52 = vpop.f32.mrf.mxu2  ;;  %v4143_v54 = vpop.f32.mrf.mxu3 }
 0x136   : > { %v1159_v55 = vpop.f32.mrf.mxu0  ;;  %v1177_v56 = vpop.f32.mrf.mxu1 }
 0x137   : > { %v1160_v38 = vadd.f32 %v1159_v55, %v644_v35  ;;  %v1178_v39 = vadd.f32 %v1177_v56, %v645_v36 }
 0x139   : > { %v1367_v53 = vpack.c.bf16 %v1160_v38, %v1158_v43  ;;  %v1478_v49 = vpack.c.bf16 %v1178_v39, %v1176_v44 }
 0x13d   : > { %v4145_v57 = vpop.f32.mrf.mxu2  ;;  %v4147_v58 = vpop.f32.mrf.mxu3 }
 0x13e   : > { %v4149_v11 = vpop.f32.mrf.mxu0  ;;  %v4151_v59 = vpop.f32.mrf.mxu1 }
 0x145   : > { %v4153_v60 = vpop.f32.mrf.mxu2  ;;  %v4155_v61 = vpop.f32.mrf.mxu3 }
 0x146   : > { %v1164_v40 = vpop.f32.mrf.mxu0  ;;  %v1182_v62 = vpop.f32.mrf.mxu1 }
 0x147   : > { %v641_v40 = vld [vmem:[%s4420_s4 + $0x8] sm:$0xf] }
 0x148   : > { %v654_v55 = vperm.slane %v641_v40, 2 }
 0x14d   : > { %v1200_v63 = vpop.f32.mrf.mxu2  ;;  %v1218_v2 = vpop.f32.mrf.mxu3 }
 0x14e   : > { %v1229_v4 = vpop.f32.mrf.mxu0  ;;  %v1247_v5 = vpop.f32.mrf.mxu1 }
 0x14f   : > { %v1230_v31 = vadd.f32 %v1229_v4, %v648_v13  ;;  %v1248_v32 = vadd.f32 %v1247_v5, %v649_v14  ;;  %v1163_v4 = vadd.f32 %v4149_v11, %v644_v35  ;;  %v1181_v5 = vadd.f32 %v4151_v59, %v645_v36 }
 0x155   : > { %v1265_v6 = vpop.f32.mrf.mxu2  ;;  %v1283_v7 = vpop.f32.mrf.mxu3 }
 0x156   : > { %v1231_v45 = vpop.f32.mrf.mxu0  ;;  %v1249_v9 = vpop.f32.mrf.mxu1  ;;  %v4168_v16 = vadd.f32 %v1283_v7, %v4163_v12  ;;  %v1266_v21 = vadd.f32 %v1265_v6, %v650_v19  ;;  %v652_v6 = vperm.slane %v641_v40, 0  ;;  %v653_v7 = vperm.slane %v641_v40, 1 }
 0x157   : > { %v1232_v25 = vadd.f32 %v1231_v45, %v648_v13  ;;  %v1250_v20 = vadd.f32 %v1249_v9, %v649_v14 }
 0x159   : > { %v1369_v33 = vpack.c.bf16 %v1232_v25, %v1230_v31  ;;  %v1480_v34 = vpack.c.bf16 %v1250_v20, %v1248_v32 }
 0x15d   : > { %v1267_v15 = vpop.f32.mrf.mxu2  ;;  %v1285_v8 = vpop.f32.mrf.mxu3 }
 0x15e   : > { %v4171_v17 = vadd.f32 %v1285_v8, %v4163_v12  ;;  %v1234_v48 = vpop.f32.mrf.mxu0  ;;  %v1252_v22 = vpop.f32.mrf.mxu1  ;;  %v1268_v46 = vadd.f32 %v1267_v15, %v650_v19 }
 0x15f   : > { %v1235_v23 = vadd.f32 %v1234_v48, %v648_v13  ;;  %v1253_v24 = vadd.f32 %v1252_v22, %v649_v14  ;;  %v1368_v22 = vpack.c.bf16 %v1163_v4, %v1163_v4 }
 0x160   : > { %v1895_v0 = vpack.c.bf16 %v4171_v17, %v4168_v16  ;;  %v1719_v62 = vpack.c.bf16 %v1268_v46, %v1266_v21 }
 0x161   : > { %v1370_v18 = vpack.c.bf16 %v1235_v23, %v1235_v23  ;;  %v1481_v1 = vpack.c.bf16 %v1253_v24, %v1253_v24  ;;  %v1479_v23 = vpack.c.bf16 %v1181_v5, %v1181_v5 }
 0x163   : > { %1377 = vmatpush.bf16.xpose.msrb.mxu0 %v1370_v18  ;;  %1488 = vmatpush.bf16.xpose.msrb.mxu2 %v1481_v1 }
 0x165   : > { %v1270_v26 = vpop.f32.mrf.mxu2  ;;  %v4176_v27 = vpop.f32.mrf.mxu3 }
 0x166   : > { %v1271_v28 = vadd.f32 %v1270_v26, %v650_v19  ;;  %v1236_v29 = vpop.f32.mrf.mxu0  ;;  %v1254_v30 = vpop.f32.mrf.mxu1 }
 0x168   : > { %v1720_v37 = vpack.c.bf16 %v1271_v28, %v1271_v28  ;;  %v655_v28 = vperm.slane %v641_v40, 3 }
 0x16b   : > { %1378 = vmatpush.bf16.xpose.msrb.mxu0 %v1369_v33  ;;  %1489 = vmatpush.bf16.xpose.msrb.mxu2 %v1480_v34 }
 0x16d   : > { %v1272_v41 = vpop.f32.mrf.mxu2  ;;  %v1290_v42 = vpop.f32.mrf.mxu3 }
 0x16e   : > { %v1301_v47 = vpop.f32.mrf.mxu0  ;;  %v1319_v3 = vpop.f32.mrf.mxu1  ;;  %v646_v41 = vperm.slane %v4160_v10, 2 }
 0x16f   : > { %v1302_v20 = vadd.f32 %v1301_v47, %v652_v6  ;;  %v1320_v26 = vadd.f32 %v1319_v3, %v653_v7 }
 0x170   : > { %v1196_v46 = vadd.f32 %v4145_v57, %v646_v41  ;;  %v1199_v40 = vadd.f32 %v4153_v60, %v646_v41 }
 0x172   : > { %1379 = vmatmul.bf16.vlgmr.msrb.gmra.mxu0 %v1367_v53  ;;  %1490 = vmatmul.bf16.vlgmr.msrb.gmra.mxu2 %v1478_v49  ;;  %v1194_v49 = vadd.f32 %v4141_v52, %v646_v41  ;;  %v3132_v41 = vld [vmem:[#allocation2 + $0x30] sm:$0xff] }
 0x173   : > { %1727 = vmatpush.bf16.xpose.msra.mxu2 %v1720_v37 }
 0x174   : > { %v1717_v21 = vpack.c.bf16 %v1196_v46, %v1194_v49 }
 0x175   : > { %v1337_v56 = vpop.f32.mrf.mxu2  ;;  %v1355_v63 = vpop.f32.mrf.mxu3 }
 0x176   : > { %v4183_v2 = vadd.f32 %v1337_v56, %v654_v55  ;;  %v1303_v50 = vpop.f32.mrf.mxu0  ;;  %v1321_v51 = vpop.f32.mrf.mxu1  ;;  %v1356_v44 = vadd.f32 %v1355_v63, %v655_v28 }
 0x177   : > { %v1304_v1 = vadd.f32 %v1303_v50, %v652_v6  ;;  %v1322_v59 = vadd.f32 %v1321_v51, %v653_v7 }
 0x179   : > { %v1430_v31 = vpack.c.bf16 %v1304_v1, %v1302_v20  ;;  %v1538_v32 = vpack.c.bf16 %v1322_v59, %v1320_v26 }
 0x17b   : > { %1728 = vmatpush.bf16.xpose.msra.mxu2 %v1719_v62  ;;  %v1718_v62 = vpack.c.bf16 %v1199_v40, %v1199_v40 }
 0x17d   : > { %v1339_v45 = vpop.f32.mrf.mxu2  ;;  %v1357_v9 = vpop.f32.mrf.mxu3 }
 0x17e   : > { %v4187_v13 = vadd.f32 %v1339_v45, %v654_v55  ;;  %v1306_v14 = vpop.f32.mrf.mxu0  ;;  %v1324_v15 = vpop.f32.mrf.mxu1  ;;  %v1358_v39 = vadd.f32 %v1357_v9, %v655_v28 }
 0x17f   : > { %v1307_v8 = vadd.f32 %v1306_v14, %v652_v6  ;;  %v1325_v48 = vadd.f32 %v1324_v15, %v653_v7 }
 0x180   : > { %v1777_v24 = vpack.c.bf16 %v4187_v13, %v4183_v2  ;;  %v1953_v47 = vpack.c.bf16 %v1358_v39, %v1356_v44  ;;  %v3133_v39 = vld [vmem:[#allocation2 + $0x38] sm:$0xff]  ;;  %v3138_v2 = vld [vmem:[#allocation2 + $0x60] sm:$0xff] }
 0x181   : > { %v1431_v18 = vpack.c.bf16 %v1307_v8, %v1307_v8  ;;  %v1539_v11 = vpack.c.bf16 %v1325_v48, %v1325_v48  ;;  %v3137_v13 = vld [vmem:[#allocation2 + $0x58] sm:$0xff] }
 0x182   : > { %1384 = vmatmul.bf16.gmra.mxu0 %v1368_v22  ;;  %1495 = vmatmul.bf16.gmra.mxu2 %v1479_v23 }
 0x183   : > { %v1440_v19 = vsel %vm1438_vm9, %v1431_v18, 0  ;;  %v1547_v25 = vsel %vm1438_vm9, %v1539_v11, 0 }
 0x184   : > { %1448 = vmatpush.bf16.msrb.mxu1 %v1440_v19  ;;  %1555 = vmatpush.bf16.msrb.mxu3 %v1547_v25 }
 0x185   : > { %v1342_v29 = vpop.f32.mrf.mxu2  ;;  %v1360_v30 = vpop.f32.mrf.mxu3 }
 0x186   : > { %v1343_v33 = vadd.f32 %v1342_v29, %v654_v55  ;;  %v1361_v34 = vadd.f32 %v1360_v30, %v655_v28  ;;  %v1308_v35 = vpop.f32.mrf.mxu0  ;;  %v1326_v36 = vpop.f32.mrf.mxu1  ;;  %v1364_v55 = vlaneseq }
 0x188   : > { %v1778_v37 = vpack.c.bf16 %v1343_v33, %v1343_v33  ;;  %v1954_v38 = vpack.c.bf16 %v1361_v34, %v1361_v34  ;;  %1449 = vmatpush.bf16.msrb.mxu1 %v1430_v31  ;;  %1556 = vmatpush.bf16.msrb.mxu3 %v1538_v32  ;;  %v4201_v56 = vand.u32 127, %v1364_v55 }
 0x18a   : > { %v4195_v42 = vsel %vm1438_vm9, %v1778_v37, 0  ;;  %v1962_v43 = vsel %vm1438_vm9, %v1954_v38, 0  ;;  %vm1366_vm10 = vcmp.lt.s32.totalorder %v4201_v56, 17 }
 0x18b   : > { %1970 = vmatpush.bf16.msrb.mxu2 %v1962_v43 }
 0x18c   : > { %1699 = vmatpush.bf16.msra.mxu1 %v3133_v39  ;;  %3174 = vmatpush.bf16.msra.mxu3 %v3133_v39 }
 0x18d   : > { %v1344_v3 = vpop.f32.mrf.mxu2  ;;  %v1362_v53 = vpop.f32.mrf.mxu3 }
 0x18f   : > { %1971 = vmatpush.bf16.msrb.mxu2 %v1953_v47  ;;  %v3131_v47 = vld [vmem:[#allocation2 + $0x28] sm:$0xff] }
 0x190   : > { %1700 = vmatpush.bf16.msra.mxu1 %v3132_v41  ;;  %3175 = vmatpush.bf16.msra.mxu3 %v3132_v41 }
 0x192   : > { %1729 = vmatmul.bf16.vlgmr.msra.gmra.mxu2 %v1717_v21 }
 0x194   : > { %1701 = vmatpush.bf16.msra.mxu1 %v3131_v47  ;;  %3176 = vmatpush.bf16.msra.mxu3 %v3131_v47 }
 0x1a2   : > { %1734 = vmatmul.bf16.gmra.mxu2 %v1718_v62 }
 0x1ef   : > { %v1380_v63 = vpop.f32.mrf.mxu0 }
 0x1f0   : > { %v1391_v57 = vsel %vm1366_vm10, %v1380_v63, -1e+30 }
 0x1f1   : > { %v1395_v50 = vsel %vm1394_vm11, %v1391_v57, -inf }
 0x1f2   : > { %1396 = vmax.xlane.f32.xlu0 %v1395_v50  ;;  %v3129_v50 = vld [vmem:[#allocation2 + $0x18] sm:$0xff] }
 0x1f5   : > { %v1491_v52 = vpop.f32.mrf.mxu2 }
 0x1f6   : > { %v4225_v35 = vsel %vm1366_vm10, %v1491_v52, -1e+30  ;;  %v3128_v52 = vld [vmem:[#allocation2 + $0x10] sm:$0xff] }
 0x1f7   : > { %v1382_v51 = vpop.f32.mrf.mxu0  ;;  %v1503_v37 = vsel %vm1394_vm11, %v4225_v35, -inf }
 0x1f8   : > { %v1392_v60 = vsel %vm1366_vm10, %v1382_v51, -1e+30  ;;  %v3127_v51 = vld [vmem:[#allocation2 + $0x8] sm:$0xff] }
 0x1f9   : > { %v1398_v4 = vsel %vm1394_vm11, %v1392_v60, -inf }
 0x1fa   : > { %1399 = vmax.xlane.f32.xlu1 %v1398_v4 }
 0x1fd   : > { %v1493_v5 = vpop.f32.mrf.mxu2 }
 0x1fe   : > { %v1501_v14 = vsel %vm1366_vm10, %v1493_v5, -1e+30 }
 0x1ff   : > { %v1385_v6 = vpop.f32.mrf.mxu0  ;;  %v1506_v8 = vsel %vm1394_vm11, %v1501_v14, -inf }
 0x200   : > { %v1393_v7 = vsel %vm1366_vm10, %v1385_v6, -1e+30 }
 0x201   : > { %v1401_v45 = vsel %vm1394_vm11, %v1393_v7, -inf }
 0x202   : > { %1402 = vmax.xlane.f32.xlu1 %v1401_v45  ;;  %v1289_v45 = vadd.f32 %v4176_v27, %v4163_v12 }
 0x205   : > { %v1496_v9 = vpop.f32.mrf.mxu2 }
 0x206   : > { %v4235_v44 = vsel %vm1366_vm10, %v1496_v9, -1e+30 }
 0x207   : > { %v1387_v15 = vpop.f32.mrf.mxu0  ;;  %v1509_v3 = vsel %vm1394_vm11, %v4235_v44, -inf }
 0x20a   : > { %1507 = vmax.xlane.f32.xlu1 %v1506_v8 }
 0x20d   : > { %v1498_v48 = vpop.f32.mrf.mxu2 }
 0x20e   : > { %v1896_v48 = vpack.c.bf16 %v1289_v45, %v1289_v45 }
 0x215   : > { %v1730_v22 = vpop.f32.mrf.mxu2 }
 0x216   : > { %v1739_v49 = vsel %vm1366_vm10, %v1730_v22, -1e+30 }
 0x217   : > { %v1742_v21 = vsel %vm1394_vm11, %v1739_v49, -inf }
 0x21d   : > { %v4216_v23 = vpop.f32.mrf.mxu2 }
 0x225   : > { %v1735_v18 = vpop.f32.mrf.mxu2 }
 0x226   : > { %v1741_v55 = vsel %vm1366_vm10, %v1735_v18, -1e+30 }
 0x227   : > { %v1748_v63 = vsel %vm1394_vm11, %v1741_v55, -inf }
 0x22d   : > { %v1737_v11 = vpop.f32.mrf.mxu2 }
 0x265   : > { %v1397_v1 = vpop.xlane.xlu0 %1396 }
 0x266   : > { %v1404_v59 = vsub.f32 %v1391_v57, %v1397_v1  ;;  %v3130_v57 = vld [vmem:[#allocation2 + $0x20] sm:$0xff] }
 0x267   : > { %1702 = vmatpush.bf16.msra.mxu1 %v3130_v57  ;;  %3177 = vmatpush.bf16.msra.mxu3 %v3130_v57 }
 0x268   : > { %v1407_v19 = vmul.f32 1.442695, %v1404_v59 }
 0x26a   : > { %3225 = vpow2.f32 %v1407_v19 }
 0x26b   : > { %1703 = vmatpush.bf16.msra.mxu1 %v3129_v50  ;;  %3178 = vmatpush.bf16.msra.mxu3 %v3129_v50 }
 0x26d   : > { %v1400_v25 = vpop.xlane.xlu1 %1399 }
 0x26e   : > { %v1405_v20 = vsub.f32 %v1392_v60, %v1400_v25  ;;  %v3126_v60 = vld [vmem:[#allocation2] sm:$0xff] }
 0x26f   : > { %1704 = vmatpush.bf16.msra.mxu1 %v3128_v52  ;;  %3179 = vmatpush.bf16.msra.mxu3 %v3128_v52 }
 0x270   : > { %v4218_v26 = vpop.eup %3225  ;;  %v1409_v28 = vmul.f32 1.442695, %v1405_v20 }
 0x271   : > { %v1413_v29 = vsel %vm1394_vm11, %v4218_v26, 0.0 }
 0x272   : > { %3227 = vpow2.f32 %v1409_v28  ;;  %1414 = vadd.xlane.f32.xlu2 %v1413_v29 }
 0x273   : > { %1705 = vmatpush.bf16.msra.mxu1 %v3127_v51  ;;  %3180 = vmatpush.bf16.msra.mxu3 %v3127_v51 }
 0x275   : > { %v1403_v30 = vpop.xlane.xlu1 %1402 }
 0x276   : > { %v1406_v31 = vsub.f32 %v1393_v7, %v1403_v30 }
 0x277   : > { %1706 = vmatpush.bf16.msra.mxu1 %v3126_v60  ;;  %3181 = vmatpush.bf16.msra.mxu3 %v3126_v60 }
 0x278   : > { %v3228_v32 = vpop.eup %3227  ;;  %v1411_v33 = vmul.f32 1.442695, %v1406_v31 }
 0x279   : > { %v1416_v34 = vsel %vm1394_vm11, %v3228_v32, 0.0 }
 0x27a   : > { %3229 = vpow2.f32 %v1411_v33  ;;  %1417 = vadd.xlane.f32.xlu0 %v1416_v34  ;;  %v647_v33 = vperm.slane %v4160_v10, 3 }
 0x27c   : > { %v1214_v34 = vadd.f32 %v4147_v58, %v647_v33  ;;  %v1217_v39 = vadd.f32 %v4155_v61, %v647_v33 }
 0x27d   : > { %v1508_v43 = vpop.xlane.xlu1 %1507 }
 0x27e   : > { %v1513_v46 = vsub.f32 %v1501_v14, %v1508_v43  ;;  %v1894_v41 = vpack.c.bf16 %v1217_v39, %v1217_v39  ;;  %v3139_v39 = vld [vmem:[#allocation2 + $0x68] sm:$0xff] }
 0x280   : > { %v4227_v36 = vpop.eup %3229  ;;  %v1517_v53 = vmul.f32 1.442695, %v1513_v46 }
 0x281   : > { %v1419_v38 = vsel %vm1394_vm11, %v4227_v36, 0.0 }
 0x282   : > { %1504 = vmax.xlane.f32.xlu0 %v1503_v37  ;;  %1420 = vadd.xlane.f32.xlu2 %v1419_v38  ;;  %3231 = vpow2.f32 %v1517_v53 }
 0x288   : > { %v4242_v40 = vpop.eup %3231 }
 0x289   : > { %v1524_v62 = vsel %vm1394_vm11, %v4242_v40, 0.0 }
 0x28a   : > { %1510 = vmax.xlane.f32.xlu2 %v1509_v3 }
 0x292   : > { %1743 = vmax.xlane.f32.xlu2 %v1742_v21  ;;  %v1740_v21 = vsel %vm1366_vm10, %v4216_v23, -1e+30 }
 0x29a   : > { %1525 = vadd.xlane.f32.xlu2 %v1524_v62 }
 0x2a2   : > { %1749 = vmax.xlane.f32.xlu2 %v1748_v63 }
 0x2e5   : > { %v1415_v4 = vpop.xlane.xlu2 %1414 }
 0x2e6   : > { %3233 = vrcp.f32 %v1415_v4 }
 0x2ec   : > { %v3234_v6 = vpop.eup %3233 }
 0x2ed   : > { %v1418_v5 = vpop.xlane.xlu0 %1417  ;;  %v1425_v9 = vmul.f32 %v3234_v6, %v4218_v26 }
 0x2ee   : > { %3235 = vrcp.f32 %v1418_v5 }
 0x2f4   : > { %v3236_v7 = vpop.eup %3235 }
 0x2f5   : > { %v1426_v14 = vmul.f32 %v3236_v7, %v3228_v32  ;;  %v1421_v15 = vpop.xlane.xlu2 %1420  ;;  %v1505_v47 = vpop.xlane.xlu0 %1504 }
 0x2f6   : > { %3237 = vrcp.f32 %v1421_v15  ;;  %v1512_v3 = vsub.f32 %v4225_v35, %v1505_v47  ;;  %v3135_v47 = vld [vmem:[#allocation2 + $0x48] sm:$0xff] }
 0x2f7   : > { %v1428_v8 = vpack.c.bf16 %v1426_v14, %v1425_v9 }
 0x2f9   : > { %2828 = vmatmul.msk.bf16.vlgmr.msrb.gmra.mxu1 %vm1394_vm11, %v1428_v8 }
 0x2fa   : > { %1903 = vmatpush.bf16.xpose.msrb.mxu1 %v1896_v48 }
 0x2fc   : > { %v3238_v18 = vpop.eup %3237 }
 0x2fd   : > { %v1511_v22 = vpop.xlane.xlu2 %1510  ;;  %v1427_v11 = vmul.f32 %v3238_v18, %v4227_v36  ;;  %v1212_v36 = vadd.f32 %v4143_v54, %v647_v33 }
 0x2fe   : > { %v1514_v10 = vsub.f32 %v4235_v44, %v1511_v22  ;;  %v1745_v44 = vsel %vm1394_vm11, %v1740_v21, -inf }
 0x2ff   : > { %v1429_v27 = vpack.c.bf16 %v1427_v11, %v1427_v11  ;;  %v1893_v38 = vpack.c.bf16 %v1214_v34, %v1212_v36 }
 0x300   : > { %v1519_v61 = vmul.f32 1.442695, %v1514_v10 }
 0x302   : > { %1904 = vmatpush.bf16.xpose.msrb.mxu1 %v1895_v0 }
 0x305   : > { %v1744_v1 = vpop.xlane.xlu2 %1743 }
 0x306   : > { %v1751_v12 = vsub.f32 %v1739_v49, %v1744_v1  ;;  %v1515_v49 = vmul.f32 1.442695, %v1512_v3 }
 0x308   : > { %v1754_v59 = vmul.f32 1.442695, %v1751_v12 }
 0x309   : > { %2829 = vmatmul.msk.bf16.gmra.mxu1 %vm1394_vm11, %v1429_v27 }
 0x30a   : > { %3239 = vpow2.f32 %v1754_v59 }
 0x30d   : > { %v4258_v19 = vpop.xlane.xlu2 %1525 }
 0x310   : > { %v4260_v25 = vpop.eup %3239 }
 0x311   : > { %v1760_v20 = vsel %vm1394_vm11, %v4260_v25, 0.0 }
 0x312   : > { %1761 = vadd.xlane.f32.xlu2 %v1760_v20 }
 0x315   : > { %v1750_v26 = vpop.xlane.xlu2 %1749 }
 0x316   : > { %v1753_v16 = vsub.f32 %v1741_v55, %v1750_v26 }
 0x318   : > { %v1758_v17 = vmul.f32 1.442695, %v1753_v16 }
 0x31a   : > { %3241 = vpow2.f32 %v1758_v17 }
 0x31b   : > { %3243 = vpow2.f32 %v1515_v49 }
 0x31c   : > { %3245 = vpow2.f32 %v1519_v61 }
 0x320   : > { %v4264_v0 = vpop.eup %3241 }
 0x321   : > { %v1766_v28 = vsel %vm1394_vm11, %v4264_v0, 0.0  ;;  %v3244_v63 = vpop.eup %3243 }
 0x322   : > { %1767 = vadd.xlane.f32.xlu2 %v1766_v28  ;;  %v3246_v57 = vpop.eup %3245  ;;  %v1521_v52 = vsel %vm1394_vm11, %v3244_v63, 0.0 }
 0x323   : > { %v1527_v51 = vsel %vm1394_vm11, %v3246_v57, 0.0 }
 0x376   : > { %v1451_v29 = vpop.f32.mrf.mxu1 }
 0x37e   : > { %v1453_v30 = vpop.f32.mrf.mxu1 }
 0x37f   : > { %v1460_v31 = vpack.c.bf16 %v1453_v30, %v1451_v29 }
 0x381   : > { %1707 = vmatmul.bf16.vlgmr.msra.gmra.mxu1 %v1460_v31 }
 0x385   : > { %v1762_v3 = vpop.xlane.xlu2 %1761 }
 0x386   : > { %v4268_v32 = vpop.f32.mrf.mxu1 }
 0x38e   : > { %v1458_v37 = vpop.f32.mrf.mxu1 }
 0x38f   : > { %v1461_v37 = vpack.c.bf16 %v4268_v32, %v4268_v32 }
 0x391   : > { %1905 = vmatmul.bf16.vlgmr.msrb.gmra.mxu1 %v1893_v38  ;;  %v3141_v38 = vld [vmem:[#allocation2 + $0x78] sm:$0xff] }
 0x392   : > { %1633 = vmatpush.bf16.msra.mxu0 %v3141_v38 }
 0x3a1   : > { %1910 = vmatmul.bf16.gmra.mxu1 %v1894_v41 }
 0x3fe   : > { %v4274_v43 = vpop.f32.mrf.mxu1 }
 0x406   : > { %v4276_v46 = vpop.f32.mrf.mxu1 }
 0x40e   : > { %v1906_v53 = vpop.f32.mrf.mxu1 }
 0x40f   : > { %v1915_v54 = vsel %vm1366_vm10, %v1906_v53, -1e+30  ;;  %v3134_v53 = vld [vmem:[#allocation2 + $0x40] sm:$0xff] }
 0x410   : > { %v1918_v58 = vsel %vm1394_vm11, %v1915_v54, -inf }
 0x411   : > { %1919 = vmax.xlane.f32.xlu0 %v1918_v58 }
 0x416   : > { %v1908_v62 = vpop.f32.mrf.mxu1 }
 0x417   : > { %v1916_v35 = vsel %vm1366_vm10, %v1908_v62, -1e+30 }
 0x418   : > { %v1921_v55 = vsel %vm1394_vm11, %v1916_v35, -inf }
 0x419   : > { %1746 = vmax.xlane.f32.xlu0 %v1745_v44  ;;  %1922 = vmax.xlane.f32.xlu1 %v1921_v55  ;;  %v1768_v55 = vpop.xlane.xlu2 %1767 }
 0x41e   : > { %v1911_v50 = vpop.f32.mrf.mxu1 }
 0x41f   : > { %v1917_v23 = vsel %vm1366_vm10, %v1911_v50, -1e+30 }
 0x420   : > { %v1924_v4 = vsel %vm1394_vm11, %v1917_v23, -inf }
 0x421   : > { %1522 = vadd.xlane.f32.xlu1 %v1521_v52  ;;  %1528 = vadd.xlane.f32.xlu0 %v1527_v51 }
 0x426   : > { %v1913_v60 = vpop.f32.mrf.mxu1 }
 0x429   : > { %1925 = vmax.xlane.f32.xlu1 %v1924_v4 }
 0x484   : > { %v1920_v5 = vpop.xlane.xlu0 %1919 }
 0x485   : > { %v1927_v6 = vsub.f32 %v1915_v54, %v1920_v5 }
 0x487   : > { %v1930_v7 = vmul.f32 1.442695, %v1927_v6 }
 0x489   : > { %3247 = vpow2.f32 %v1930_v7  ;;  %v3149_v7 = vld [vmem:[#allocation2 + $0xb8] sm:$0xff] }
 0x48c   : > { %v1747_v45 = vpop.xlane.xlu0 %1746  ;;  %v1923_v9 = vpop.xlane.xlu1 %1922 }
 0x48d   : > { %v1752_v14 = vsub.f32 %v1740_v21, %v1747_v45  ;;  %v1928_v15 = vsub.f32 %v1916_v35, %v1923_v9  ;;  %v3157_v45 = vld [vmem:[#allocation2 + $0xf8] sm:$0xff] }
 0x48f   : > { %v4295_v8 = vpop.eup %3247  ;;  %v1756_v48 = vmul.f32 1.442695, %v1752_v14  ;;  %v1932_v22 = vmul.f32 1.442695, %v1928_v15  ;;  %v3148_v14 = vld [vmem:[#allocation2 + $0xb0] sm:$0xff] }
 0x490   : > { %v1936_v56 = vsel %vm1394_vm11, %v4295_v8, 0.0  ;;  %v3156_v15 = vld [vmem:[#allocation2 + $0xf0] sm:$0xff] }
 0x491   : > { %3249 = vpow2.f32 %v1756_v48  ;;  %1937 = vadd.xlane.f32.xlu0 %v1936_v56  ;;  %v3154_v56 = vld [vmem:[#allocation2 + $0xe0] sm:$0xff] }
 0x492   : > { %3251 = vpow2.f32 %v1932_v22  ;;  %v3146_v22 = vld [vmem:[#allocation2 + $0xa0] sm:$0xff] }
 0x493   : > { %3253 = vrcp.f32 %v4258_v19 }
 0x494   : > { %v1523_v18 = vpop.xlane.xlu1 %1522  ;;  %v1529_v29 = vpop.xlane.xlu0 %1528 }
 0x495   : > { %3255 = vrcp.f32 %v1523_v18  ;;  %v3145_v18 = vld [vmem:[#allocation2 + $0x98] sm:$0xff] }
 0x497   : > { %v3250_v11 = vpop.eup %3249 }
 0x498   : > { %v3252_v1 = vpop.eup %3251  ;;  %v1763_v12 = vsel %vm1394_vm11, %v3250_v11, 0.0 }
 0x499   : > { %1764 = vadd.xlane.f32.xlu0 %v1763_v12  ;;  %v1939_v27 = vsel %vm1394_vm11, %v3252_v1, 0.0  ;;  %v3254_v59 = vpop.eup %3253 }
 0x49a   : > { %1940 = vadd.xlane.f32.xlu1 %v1939_v27  ;;  %v1534_v16 = vmul.f32 %v3254_v59, %v4242_v40 }
 0x49b   : > { %v3256_v20 = vpop.eup %3255 }
 0x49c   : > { %v1926_v26 = vpop.xlane.xlu1 %1925  ;;  %v1533_v17 = vmul.f32 %v3256_v20, %v3244_v63  ;;  %v3144_v20 = vld [vmem:[#allocation2 + $0x90] sm:$0xff] }
 0x49d   : > { %v1929_v28 = vsub.f32 %v1917_v23, %v1926_v26  ;;  %v3152_v26 = vld [vmem:[#allocation2 + $0xd0] sm:$0xff] }
 0x49e   : > { %v1536_v30 = vpack.c.bf16 %v1534_v16, %v1533_v17  ;;  %v3143_v16 = vld [vmem:[#allocation2 + $0x88] sm:$0xff] }
 0x49f   : > { %v1934_v19 = vmul.f32 1.442695, %v1929_v28  ;;  %v3151_v17 = vld [vmem:[#allocation2 + $0xc8] sm:$0xff]  ;;  %v3142_v28 = vld [vmem:[#allocation2 + $0x80] sm:$0xff] }
 0x4a0   : > { %2830 = vmatmul.msk.bf16.vlgmr.msrb.gmra.mxu3 %vm1394_vm11, %v1536_v30 }
 0x4a1   : > { %3257 = vpow2.f32 %v1934_v19  ;;  %1794 = vmatpush.bf16.msrb.mxu3 %v4195_v42  ;;  %v3140_v42 = vld [vmem:[#allocation2 + $0x70] sm:$0xff] }
 0x4a2   : > { %3259 = vrcp.f32 %v1529_v29  ;;  %1634 = vmatpush.bf16.msra.mxu0 %v3140_v42  ;;  %v3150_v29 = vld [vmem:[#allocation2 + $0xc0] sm:$0xff] }
 0x4a3   : > { %3261 = vrcp.f32 %v1762_v3 }
 0x4a5   : > { %1795 = vmatpush.bf16.msrb.mxu3 %v1777_v24  ;;  %v3136_v24 = vld [vmem:[#allocation2 + $0x50] sm:$0xff] }
 0x4a6   : > { %1635 = vmatpush.bf16.msra.mxu0 %v3139_v39 }
 0x4a7   : > { %v3258_v31 = vpop.eup %3257 }
 0x4a8   : > { %v3260_v33 = vpop.eup %3259  ;;  %v1942_v34 = vsel %vm1394_vm11, %v3258_v31, 0.0 }
 0x4a9   : > { %1943 = vadd.xlane.f32.xlu1 %v1942_v34  ;;  %v1535_v40 = vmul.f32 %v3260_v33, %v3246_v57  ;;  %v3262_v54 = vpop.eup %3261 }
 0x4aa   : > { %1636 = vmatpush.bf16.msra.mxu0 %v3138_v2  ;;  %v1772_v21 = vmul.f32 %v3262_v54, %v4260_v25 }
 0x4ab   : > { %v1537_v36 = vpack.c.bf16 %v1535_v40, %v1535_v40 }
 0x4ae   : > { %1637 = vmatpush.bf16.msra.mxu0 %v3137_v13 }
 0x4b0   : > { %2831 = vmatmul.msk.bf16.gmra.mxu3 %vm1394_vm11, %v1537_v36 }
 0x4b2   : > { %1638 = vmatpush.bf16.msra.mxu0 %v3136_v24 }
 0x4b6   : > { %1639 = vmatpush.bf16.msra.mxu0 %v3135_v47 }
 0x4ba   : > { %1640 = vmatpush.bf16.msra.mxu0 %v3134_v53 }
 0x4be   : > { %1872 = vmatpush.bf16.msrb.mxu0 %v3149_v7 }
 0x4c0   : > { %1712 = vmatmul.bf16.vlgmr.msra.gmra.mxu3 %v1461_v37 }
 0x4c1   : > { %2048 = vmatpush.bf16.msra.mxu3 %v3157_v45 }
 0x4c2   : > { %1873 = vmatpush.bf16.msrb.mxu0 %v3148_v14 }
 0x4c5   : > { %2049 = vmatpush.bf16.msra.mxu3 %v3156_v15  ;;  %v3165_v15 = vld [vmem:[%s4425_s9 + $0x38] sm:$0xff] }
 0x4c6   : > { %3182 = vmatpush.bf16.msra.mxu2 %v3165_v15 }
 0x504   : > { %v1938_v41 = vpop.xlane.xlu0 %1937 }
 0x505   : > { %3263 = vrcp.f32 %v1938_v41 }
 0x50b   : > { %v3264_v58 = vpop.eup %3263 }
 0x50c   : > { %v1765_v32 = vpop.xlane.xlu0 %1764  ;;  %v1948_v35 = vmul.f32 %v3264_v58, %v4295_v8  ;;  %v3155_v8 = vld [vmem:[#allocation2 + $0xe8] sm:$0xff]  ;;  %v3214_v58 = vld [vmem:[%s4422_s6] ss:$0 sm:$0xff] }
 0x50d   : > { %3265 = vrcp.f32 %v1765_v32  ;;  %v1941_v10 = vpop.xlane.xlu1 %1940  ;;  %2050 = vmatpush.bf16.msra.mxu3 %v3155_v8  ;;  %v3163_v8 = vld [vmem:[%s4425_s9 + $0x28] sm:$0xff] }
 0x50e   : > { %3267 = vrcp.f32 %v1941_v10 }
 0x50f   : > { %3269 = vrcp.f32 %v1768_v55 }
 0x511   : > { %2051 = vmatpush.bf16.msra.mxu3 %v3154_v56  ;;  %v3160_v56 = vld [vmem:[%s4425_s9 + $0x10] sm:$0xff] }
 0x513   : > { %v3266_v49 = vpop.eup %3265 }
 0x514   : > { %v3268_v61 = vpop.eup %3267  ;;  %v1773_v62 = vmul.f32 %v3266_v49, %v3250_v11  ;;  %v3153_v11 = vld [vmem:[#allocation2 + $0xd8] sm:$0xff] }
 0x515   : > { %v1949_v44 = vmul.f32 %v3268_v61, %v3252_v1  ;;  %v3270_v52 = vpop.eup %3269  ;;  %2052 = vmatpush.bf16.msra.mxu3 %v3153_v11  ;;  %v3285_v61 = vld [vmem:[%s3422_s20] sm:$0xff] }
 0x516   : > { %v1775_v63 = vpack.c.bf16 %v1773_v62, %v1772_v21  ;;  %v1774_v51 = vmul.f32 %v3270_v52, %v4264_v0  ;;  %v3147_v0 = vld [vmem:[#allocation2 + $0xa8] sm:$0xff] }
 0x517   : > { %v1951_v57 = vpack.c.bf16 %v1949_v44, %v1948_v35  ;;  %1874 = vmatpush.bf16.msrb.mxu0 %v3147_v0  ;;  %v3164_v0 = vld [vmem:[%s4425_s9 + $0x30] sm:$0xff] }
 0x518   : > { %2896 = vmatmul.msk.bf16.vlgmr.msrb.gmra.mxu3 %vm1394_vm11, %v1775_v63  ;;  %v1776_v4 = vpack.c.bf16 %v1774_v51, %v1774_v51  ;;  %3183 = vmatpush.bf16.msra.mxu2 %v3164_v0 }
 0x519   : > { %2930 = vmatmul.msk.bf16.vlgmr.msrb.gmra.mxu2 %vm1394_vm11, %v1951_v57  ;;  %2053 = vmatpush.bf16.msra.mxu3 %v3152_v26 }
 0x51b   : > { %1875 = vmatpush.bf16.msrb.mxu0 %v3146_v22  ;;  %v3161_v22 = vld [vmem:[%s4425_s9 + $0x18] sm:$0xff] }
 0x51c   : > { %v1944_v50 = vpop.xlane.xlu1 %1943  ;;  %3184 = vmatpush.bf16.msra.mxu2 %v3163_v8 }
 0x51d   : > { %3271 = vrcp.f32 %v1944_v50  ;;  %2054 = vmatpush.bf16.msra.mxu3 %v3151_v17  ;;  %v3286_v50 = vld [vmem:[%s3422_s20 + $0x8] sm:$0xff] }
 0x51f   : > { %1876 = vmatpush.bf16.msrb.mxu0 %v3145_v18 }
 0x521   : > { %2055 = vmatpush.bf16.msra.mxu3 %v3150_v29 }
 0x523   : > { %v3272_v23 = vpop.eup %3271  ;;  %v1558_v60 = vpop.f32.mrf.mxu3  ;;  %1877 = vmatpush.bf16.msrb.mxu0 %v3144_v20 }
 0x524   : > { %v1950_v25 = vmul.f32 %v3272_v23, %v3258_v31 }
 0x526   : > { %v1952_v5 = vpack.c.bf16 %v1950_v25, %v1950_v25 }
 0x527   : > { %1878 = vmatpush.bf16.msrb.mxu0 %v3143_v16  ;;  %v3158_v16 = vld [vmem:[%s4425_s9] sm:$0xff] }
 0x528   : > { %2897 = vmatmul.msk.bf16.gmra.mxu3 %vm1394_vm11, %v1776_v4 }
 0x529   : > { %2931 = vmatmul.msk.bf16.gmra.mxu2 %vm1394_vm11, %v1952_v5 }
 0x52b   : > { %v1560_v6 = vpop.f32.mrf.mxu3  ;;  %1879 = vmatpush.bf16.msrb.mxu0 %v3142_v28 }
 0x52c   : > { %v1567_v9 = vpack.c.bf16 %v1560_v6, %v1558_v60  ;;  %v3287_v6 = vld [vmem:[%s3422_s20 + $0x10] sm:$0xff] }
 0x52e   : > { %1641 = vmatmul.bf16.vlgmr.msra.gmra.mxu0 %v1567_v9 }
 0x52f   : > { %2229 = vmatpush.bf16.msra.mxu0 %v3165_v15 }
 0x533   : > { %v1563_v48 = vpop.f32.mrf.mxu3  ;;  %2230 = vmatpush.bf16.msra.mxu0 %v3164_v0 }
 0x534   : > { %v1568_v12 = vpack.c.bf16 %v1563_v48, %v1563_v48  ;;  %v3162_v48 = vld [vmem:[%s4425_s9 + $0x20] sm:$0xff] }
 0x535   : > { %3185 = vmatpush.bf16.msra.mxu2 %v3162_v48 }
 0x537   : > { %2231 = vmatpush.bf16.msra.mxu0 %v3163_v8 }
 0x539   : > { %3186 = vmatpush.bf16.msra.mxu2 %v3161_v22 }
 0x53b   : > { %v1565_v1 = vpop.f32.mrf.mxu3  ;;  %2232 = vmatpush.bf16.msra.mxu0 %v3162_v48 }
 0x53d   : > { %3187 = vmatpush.bf16.msra.mxu2 %v3160_v56 }
 0x53e   : > { %1646 = vmatmul.bf16.gmra.mxu0 %v1568_v12 }
 0x53f   : > { %2233 = vmatpush.bf16.msra.mxu0 %v3161_v22 }
 0x543   : > { %v1713_v27 = vpop.f32.mrf.mxu3  ;;  %2234 = vmatpush.bf16.msra.mxu0 %v3160_v56  ;;  %v3173_v56 = vld [vmem:[%s4427_s11 + $0x38] sm:$0xff] }
 0x544   : > { %2344 = vmatpush.bf16.msra.mxu1 %v3173_v56 }
 0x54b   : > { %v1715_v59 = vpop.f32.mrf.mxu3 }
 0x54c   : > { %v3159_v59 = vld [vmem:[%s4425_s9 + $0x8] sm:$0xff] }
 0x54d   : > { %2235 = vmatpush.bf16.msra.mxu0 %v3159_v59  ;;  %3188 = vmatpush.bf16.msra.mxu2 %v3159_v59  ;;  %v3167_v59 = vld [vmem:[%s4427_s11 + $0x8] sm:$0xff] }
 0x551   : > { %2236 = vmatpush.bf16.msra.mxu0 %v3158_v16  ;;  %3189 = vmatpush.bf16.msra.mxu2 %v3158_v16  ;;  %v3166_v16 = vld [vmem:[%s4427_s11] sm:$0xff] }
 0x59b   : > { %v1797_v30 = vpop.f32.mrf.mxu3 }
 0x59c   : > { %v1973_v19 = vpop.f32.mrf.mxu2 }
 0x5a3   : > { %v1799_v31 = vpop.f32.mrf.mxu3 }
 0x5a4   : > { %v1806_v33 = vpack.c.bf16 %v1799_v31, %v1797_v30  ;;  %v1975_v34 = vpop.f32.mrf.mxu2 }
 0x5a5   : > { %v1982_v40 = vpack.c.bf16 %v1975_v34, %v1973_v19 }
 0x5a6   : > { %1880 = vmatmul.bf16.vlgmr.msrb.gmra.mxu0 %v1806_v33 }
 0x5a7   : > { %2056 = vmatmul.bf16.vlgmr.msra.gmra.mxu3 %v1982_v40 }
 0x5ab   : > { %v1802_v36 = vpop.f32.mrf.mxu3  ;;  %v1642_v37 = vpop.f32.mrf.mxu0 }
 0x5ac   : > { %v1978_v38 = vpop.f32.mrf.mxu2  ;;  %v1807_v39 = vpack.c.bf16 %v1802_v36, %v1802_v36  ;;  %v1709_v53 = vadd.f32 %v4274_v43, %v1642_v37 }
 0x5ad   : > { %v1983_v24 = vpack.c.bf16 %v1978_v38, %v1978_v38 }
 0x5b3   : > { %v1804_v42 = vpop.f32.mrf.mxu3  ;;  %v1644_v2 = vpop.f32.mrf.mxu0 }
 0x5b4   : > { %v1980_v13 = vpop.f32.mrf.mxu2  ;;  %v1711_v62 = vadd.f32 %v4276_v46, %v1644_v2 }
 0x5b6   : > { %1885 = vmatmul.bf16.gmra.mxu0 %v1807_v39 }
 0x5b7   : > { %2061 = vmatmul.bf16.gmra.mxu3 %v1983_v24 }
 0x5bb   : > { %v1647_v41 = vpop.f32.mrf.mxu0 }
 0x5bc   : > { %v1714_v51 = vadd.f32 %v1713_v27, %v1647_v41 }
 0x5c3   : > { %v1649_v47 = vpop.f32.mrf.mxu0 }
 0x623   : > { %v1881_v3 = vpop.f32.mrf.mxu0 }
 0x624   : > { %v1890_v32 = vadd.f32 %v1881_v3, %v1709_v53 }
 0x62a   : > { %v2057_v10 = vpop.f32.mrf.mxu3 }
 0x62b   : > { %v2066_v54 = vadd.f32 %v2057_v10, %v1890_v32  ;;  %v1883_v49 = vpop.f32.mrf.mxu0 }
 0x62c   : > { %v1891_v44 = vadd.f32 %v1883_v49, %v1711_v62  ;;  %v3215_v62 = vld [vmem:[%s4423_s7] ss:$0 sm:$0xff] }
 0x62d   : > { %v2069_v21 = vadd.f32 %v3285_v61, %v2066_v54 }
 0x62f   : > { %v4325_v35 = vadd.f32 %v3214_v58, %v2069_v21 }
 0x631   : > { %2081 = vadd.xlane.f32.xlu0 %v4325_v35  ;;  %v2090_v43 = vmul.f32 %v4325_v35, %v4325_v35 }
 0x632   : > { %v2059_v55 = vpop.f32.mrf.mxu3 }
 0x633   : > { %v2067_v63 = vadd.f32 %v2059_v55, %v1891_v44  ;;  %2093 = vadd.xlane.f32.xlu2 %v2090_v43  ;;  %v1886_v57 = vpop.f32.mrf.mxu0 }
 0x634   : > { %v1892_v60 = vadd.f32 %v1886_v57, %v1714_v51 }
 0x635   : > { %v2070_v52 = vadd.f32 %v3286_v50, %v2067_v63 }
 0x637   : > { %v4331_v23 = vadd.f32 %v3214_v58, %v2070_v52 }
 0x639   : > { %2083 = vadd.xlane.f32.xlu1 %v4331_v23  ;;  %v2091_v46 = vmul.f32 %v4331_v23, %v4331_v23 }
 0x63a   : > { %v2062_v25 = vpop.f32.mrf.mxu3 }
 0x63b   : > { %v2068_v4 = vadd.f32 %v2062_v25, %v1892_v60  ;;  %2095 = vadd.xlane.f32.xlu0 %v2091_v46  ;;  %v1888_v5 = vpop.f32.mrf.mxu0  ;;  %v3216_v60 = vld [vmem:[%s4424_s8] ss:$0 sm:$0xff] }
 0x63d   : > { %v2071_v7 = vadd.f32 %v3287_v6, %v2068_v4 }
 0x63f   : > { %v4337_v45 = vadd.f32 %v3214_v58, %v2071_v7 }
 0x641   : > { %2085 = vadd.xlane.f32.xlu1 %v4337_v45  ;;  %v2092_v9 = vmul.f32 %v4337_v45, %v4337_v45 }
 0x642   : > { %v2064_v14 = vpop.f32.mrf.mxu3 }
 0x643   : > { %2097 = vadd.xlane.f32.xlu2 %v2092_v9 }
 0x6a4   : > { %v2082_v18 = vpop.xlane.xlu0 %2081 }
 0x6a5   : > { %v2087_v11 = vmul.f32 0.03125, %v2082_v18  ;;  %v3172_v18 = vld [vmem:[%s4427_s11 + $0x30] sm:$0xff] }
 0x6a6   : > { %v2094_v1 = vpop.xlane.xlu2 %2093  ;;  %2345 = vmatpush.bf16.msra.mxu1 %v3172_v18 }
 0x6a7   : > { %v2102_v12 = vmul.f32 %v2087_v11, %v2087_v11  ;;  %v2099_v27 = vmul.f32 0.03125, %v2094_v1  ;;  %v2108_v49 = vsub.f32 %v4325_v35, %v2087_v11  ;;  %v3171_v11 = vld [vmem:[%s4427_s11 + $0x28] sm:$0xff]  ;;  %v3170_v1 = vld [vmem:[%s4427_s11 + $0x20] sm:$0xff] }
 0x6a9   : > { %v2105_v20 = vsub.f32 %v2099_v27, %v2102_v12  ;;  %v3169_v12 = vld [vmem:[%s4427_s11 + $0x18] sm:$0xff]  ;;  %v3168_v27 = vld [vmem:[%s4427_s11 + $0x10] sm:$0xff] }
 0x6aa   : > { %2346 = vmatpush.bf16.msra.mxu1 %v3171_v11 }
 0x6ab   : > { %v2111_v26 = vadd.f32 1e-05, %v2105_v20  ;;  %v3217_v20 = vld [vmem:[%s4426_s10] ss:$0 sm:$0xff] }
 0x6ac   : > { %v2084_v17 = vpop.xlane.xlu1 %2083 }
 0x6ad   : > { %3273 = vrsqrt.f32 %v2111_v26  ;;  %v2088_v28 = vmul.f32 0.03125, %v2084_v17  ;;  %vm2120_vm13 = vweird.f32 %v2111_v26 }
 0x6ae   : > { %v2096_v29 = vpop.xlane.xlu0 %2095  ;;  %2347 = vmatpush.bf16.msra.mxu1 %v3170_v1 }
 0x6af   : > { %v2103_v30 = vmul.f32 %v2088_v28, %v2088_v28  ;;  %v2100_v19 = vmul.f32 0.03125, %v2096_v29  ;;  %v2109_v63 = vsub.f32 %v4331_v23, %v2088_v28 }
 0x6b1   : > { %v2106_v31 = vsub.f32 %v2100_v19, %v2103_v30 }
 0x6b2   : > { %2348 = vmatpush.bf16.msra.mxu1 %v3169_v12 }
 0x6b3   : > { %v3274_v33 = vpop.eup %3273  ;;  %v2112_v34 = vadd.f32 1e-05, %v2106_v31 }
 0x6b4   : > { %v2115_v40 = vmul.f32 %v3274_v33, %v2111_v26  ;;  %v2086_v36 = vpop.xlane.xlu1 %2085  ;;  %vm2121_vm12 = vweird.f32 %v3274_v33 }
 0x6b5   : > { %3275 = vrsqrt.f32 %v2112_v34  ;;  %v2089_v37 = vmul.f32 0.03125, %v2086_v36  ;;  %vm2122_vm14 = vmor %vm2120_vm13, %vm2121_vm12  ;;  %vm2130_vm0 = vweird.f32 %v2112_v34 }
 0x6b6   : > { %v2116_v38 = vmul.f32 %v3274_v33, %v2115_v40  ;;  %v2098_v42 = vpop.xlane.xlu2 %2097  ;;  %2349 = vmatpush.bf16.msra.mxu1 %v3168_v27 }
 0x6b7   : > { %v2104_v39 = vmul.f32 %v2089_v37, %v2089_v37  ;;  %v2101_v2 = vmul.f32 0.03125, %v2098_v42  ;;  %v2110_v9 = vsub.f32 %v4337_v45, %v2089_v37 }
 0x6b8   : > { %v2117_v13 = vmul.f32 0.5, %v2116_v38 }
 0x6b9   : > { %v2107_v24 = vsub.f32 %v2101_v2, %v2104_v39 }
 0x6ba   : > { %v2118_v41 = vsub.f32 1.5, %v2117_v13  ;;  %2350 = vmatpush.bf16.msra.mxu1 %v3167_v59 }
 0x6bb   : > { %v3276_v47 = vpop.eup %3275  ;;  %v2113_v3 = vadd.f32 1e-05, %v2107_v24 }
 0x6bc   : > { %v2119_v53 = vmul.f32 %v3274_v33, %v2118_v41  ;;  %v2125_v32 = vmul.f32 %v3276_v47, %v2112_v34  ;;  %vm2131_vm15 = vweird.f32 %v3276_v47 }
 0x6bd   : > { %3277 = vrsqrt.f32 %v2113_v3  ;;  %vm2132_vm1 = vmor %vm2130_vm0, %vm2131_vm15  ;;  %vm2140_vm3 = vweird.f32 %v2113_v3 }
 0x6be   : > { %v2126_v10 = vmul.f32 %v3276_v47, %v2125_v32  ;;  %v2123_v54 = vsel %vm2122_vm14, %v3274_v33, %v2119_v53  ;;  %2351 = vmatpush.bf16.msra.mxu1 %v3166_v16 }
 0x6bf   : > { %v2144_v44 = vmul.f32 %v2123_v54, %v2108_v49 }
 0x6c0   : > { %v2127_v58 = vmul.f32 0.5, %v2126_v10 }
 0x6c1   : > { %v2150_v52 = vmul.f32 %v3215_v62, %v2144_v44 }
 0x6c2   : > { %v2128_v61 = vsub.f32 1.5, %v2127_v58 }
 0x6c3   : > { %v3278_v21 = vpop.eup %3277  ;;  %v2156_v5 = vadd.f32 %v3216_v60, %v2150_v52  ;;  %v3218_v52 = vld [vmem:[%s4428_s12] ss:$0 sm:$0xff] }
 0x6c4   : > { %v2129_v43 = vmul.f32 %v3276_v47, %v2128_v61  ;;  %v2135_v55 = vmul.f32 %v3278_v21, %v2113_v3  ;;  %vm2141_vm2 = vweird.f32 %v3278_v21 }
 0x6c5   : > { %vm2142_vm4 = vmor %vm2140_vm3, %vm2141_vm2 }
 0x6c6   : > { %v2133_v57 = vsel %vm2132_vm1, %v3276_v47, %v2129_v43  ;;  %v2136_v50 = vmul.f32 %v3278_v21, %v2135_v55 }
 0x6c7   : > { %v2145_v51 = vmul.f32 %v2133_v57, %v2109_v63 }
 0x6c8   : > { %v2137_v46 = vmul.f32 0.5, %v2136_v50 }
 0x6c9   : > { %v2151_v25 = vmul.f32 %v3215_v62, %v2145_v51 }
 0x6ca   : > { %v2138_v4 = vsub.f32 1.5, %v2137_v46 }
 0x6cb   : > { %v2157_v6 = vadd.f32 %v3216_v60, %v2151_v25 }
 0x6cc   : > { %v2139_v7 = vmul.f32 %v3278_v21, %v2138_v4 }
 0x6cd   : > { %v2159_v14 = vpack.c.bf16 %v2157_v6, %v2156_v5 }
 0x6ce   : > { %v2143_v15 = vsel %vm2142_vm4, %v3278_v21, %v2139_v7 }
 0x6cf   : > { %v2146_v0 = vmul.f32 %v2143_v15, %v2110_v9  ;;  %2237 = vmatmul.bf16.vlgmr.msra.gmra.mxu0 %v2159_v14 }
 0x6d1   : > { %v2152_v8 = vmul.f32 %v3215_v62, %v2146_v0 }
 0x6d3   : > { %v2158_v48 = vadd.f32 %v3216_v60, %v2152_v8 }
 0x6d5   : > { %v2160_v22 = vpack.c.bf16 %v2158_v48, %v2158_v48 }
 0x6d7   : > { %2242 = vmatmul.bf16.vlgmr.msra.gmra.mxu2 %v2160_v22 }
 0x74c   : > { %v2238_v26 = vpop.f32.mrf.mxu0 }
 0x74d   : > { %v2239_v17 = vadd.f32 %v3217_v20, %v2238_v26 }
 0x74f   : > { %v2247_v28 = vmul.f32 %v2239_v17, %v2239_v17 }
 0x751   : > { %v2250_v29 = vmul.f32 %v2247_v28, %v2239_v17 }
 0x753   : > { %v2253_v30 = vmul.f32 0.044715, %v2250_v29 }
 0x754   : > { %v2240_v19 = vpop.f32.mrf.mxu0 }
 0x755   : > { %v2256_v31 = vadd.f32 %v2253_v30, %v2239_v17  ;;  %v2241_v33 = vadd.f32 %v3217_v20, %v2240_v19 }
 0x757   : > { %v2259_v34 = vmul.f32 0.7978846, %v2256_v31  ;;  %v2248_v40 = vmul.f32 %v2241_v33, %v2241_v33 }
 0x759   : > { %v2251_v36 = vmul.f32 %v2248_v40, %v2241_v33  ;;  %3279 = vtanh.f32 %v2259_v34 }
 0x75a   : > { %v2243_v37 = vpop.f32.mrf.mxu2 }
 0x75b   : > { %v2254_v38 = vmul.f32 0.044715, %v2251_v36  ;;  %v2244_v42 = vadd.f32 %v3217_v20, %v2243_v37 }
 0x75d   : > { %v2257_v39 = vadd.f32 %v2254_v38, %v2241_v33  ;;  %v2249_v2 = vmul.f32 %v2244_v42, %v2244_v42 }
 0x75f   : > { %v2260_v13 = vmul.f32 0.7978846, %v2257_v39  ;;  %v2252_v24 = vmul.f32 %v2249_v2, %v2244_v42  ;;  %v3280_v41 = vpop.eup %3279 }
 0x760   : > { %v2265_v32 = vadd.f32 1.0, %v3280_v41 }
 0x761   : > { %3281 = vtanh.f32 %v2260_v13  ;;  %v2255_v47 = vmul.f32 0.044715, %v2252_v24 }
 0x762   : > { %v2245_v3 = vpop.f32.mrf.mxu2  ;;  %v2268_v58 = vmul.f32 0.5, %v2265_v32 }
 0x763   : > { %v2258_v53 = vadd.f32 %v2255_v47, %v2244_v42 }
 0x764   : > { %v2271_v21 = vmul.f32 %v2268_v58, %v2239_v17 }
 0x765   : > { %v2261_v10 = vmul.f32 0.7978846, %v2258_v53 }
 0x767   : > { %v3282_v54 = vpop.eup %3281  ;;  %3283 = vtanh.f32 %v2261_v10 }
 0x768   : > { %v2266_v49 = vadd.f32 1.0, %v3282_v54 }
 0x76a   : > { %v2269_v61 = vmul.f32 0.5, %v2266_v49 }
 0x76c   : > { %v2272_v62 = vmul.f32 %v2269_v61, %v2241_v33 }
 0x76d   : > { %v3284_v43 = vpop.eup %3283 }
 0x76e   : > { %v2274_v44 = vpack.c.bf16 %v2272_v62, %v2271_v21  ;;  %v2267_v55 = vadd.f32 1.0, %v3284_v43 }
 0x770   : > { %2352 = vmatmul.bf16.vlgmr.msra.gmra.mxu1 %v2274_v44  ;;  %v2270_v63 = vmul.f32 0.5, %v2267_v55 }
 0x772   : > { %v2273_v57 = vmul.f32 %v2270_v63, %v2244_v42 }
 0x774   : > { %v2275_v50 = vpack.c.bf16 %v2273_v57, %v2273_v57 }
 0x780   : > { %2357 = vmatmul.bf16.gmra.mxu1 %v2275_v50 }
 0x7ed   : > { %v2353_v51 = vpop.f32.mrf.mxu1 }
 0x7ee   : > { %v2354_v60 = vadd.f32 %v3218_v52, %v2353_v51 }
 0x7f0   : > { %v2362_v46 = vadd.f32 %v2354_v60, %v4325_v35 }
 0x7f2   : > { %2365 = vst [vmem:[%s457_s26] sm:$0xff] %v2362_v46 }
 0x7f5   : > { %v2355_v25 = vpop.f32.mrf.mxu1 }
 0x7f6   : > { %v2356_v4 = vadd.f32 %v3218_v52, %v2355_v25 }
 0x7f8   : > { %v2363_v5 = vadd.f32 %v2356_v4, %v4331_v23 }
 0x7fa   : > { %2366 = vst [vmem:[%s457_s26 + $0x8] sm:$0xff] %v2363_v5 }
 0x7fd   : > { %v2358_v6 = vpop.f32.mrf.mxu1 }
 0x7fe   : > { %v2359_v7 = vadd.f32 %v3218_v52, %v2358_v6 }
 0x800   : > { %v2364_v9 = vadd.f32 %v2359_v7, %v4337_v45 }
 0x802   : > { %2367 = vst [vmem:[%s457_s26 + $0x10] sm:$0xff] %v2364_v9 }
 0x805   : > { %v2360_v14 = vpop.f32.mrf.mxu1 }
 0x806 PF: > { %s24_s25 = sadd.s32 1, %s3328_s25  }
 0x807   : > { %p21_p7 = scmp.ge.s32.totalorder %s24_s25, 4  }
 0x809   :  { %23 = sbr.rel (!%p21_p7) target bundleno = 1 (0x1), region = 107 }
 0x80e   :  { %2389 = vsyncpa [#allocation3], 1 }
 0x80f   :  { %2391 = vsyncpa [#allocation3 + $0x1], 1 }

</bundles_post_ra>
